<compile_context>
chip_gen: v5e
topology: v5e:2x2
jax: 0.10.0
libtpu: 0.0.40
codegen_flags: <defaults>
</compile_context>

<pallas_src>
import jax
import jax.numpy as jnp
from jax.experimental import pallas as pl
from jax.experimental.pallas import tpu as pltpu


def _round_up(x, m):
    return ((x + m - 1) // m) * m


# ----------------------------------------------------------------------------
# Pallas kernel: one grid step == one GRU layer over the full sequence.
# ----------------------------------------------------------------------------
def gru_stack_kernel(x_ref,       # (T*B_pad, H_pad)   bf16 padded input seq (time-major)
                     wih_ref,     # (H_pad, 3*H_pad)   bf16 this layer's input weights
                     whh_ref,     # (H_pad, 3*H_pad)   bf16 this layer's hidden weights
                     bx_ref,      # (1, 3*H_pad)       f32  folded input-path biases
                     bhn_ref,     # (1, H_pad)         f32  hidden-path bias of n gate
                     fcw_ref,     # (H_pad, O_pad)     bf16 fc weight (transposed, padded)
                     fcb_ref,     # (1, O_pad)         f32  fc bias (padded)
                     out_ref,     # (B_pad, O_pad)     f32  final output (resident)
                     seq_buf,     # VMEM (T*B_pad, H_pad)   f32 layer output seq (carried)
                     gx_buf):     # VMEM (T*B_pad, 3*H_pad) f32 input-path gate pre-acts
    l = pl.program_id(0)
    L = pl.num_programs(0)
    TB, H_pad = seq_buf.shape
    B_pad = out_ref.shape[0]
    T = TB // B_pad

    # ---- input path: ONE fused batched matmul over all T timesteps ----------
    @pl.when(l == 0)
    def _():
        out_ref[...] = jnp.zeros_like(out_ref)          # cheap insurance init
        gx_buf[...] = (jnp.dot(x_ref[...], wih_ref[...],
                               preferred_element_type=jnp.float32)
                       + bx_ref[...])

    @pl.when(l > 0)
    def _():
        gx_buf[...] = (jnp.dot(seq_buf[...].astype(jnp.bfloat16), wih_ref[...],
                               preferred_element_type=jnp.float32)
                       + bx_ref[...])

    # Hoisted: broadcast_in_dim is not CSE'd, keep it out of the unrolled loop.
    b_hn = jnp.broadcast_to(bhn_ref[...], (B_pad, H_pad))

    # ---- serial recurrence: one fused (B,H)@(H,3H) MXU push per timestep ----
    def step(t, h):
        gh = jnp.dot(h.astype(jnp.bfloat16), whh_ref[...],
                     preferred_element_type=jnp.float32)      # (B_pad, 3*H_pad)
        row = pl.multiple_of(t * B_pad, B_pad)
        gx = gx_buf[pl.ds(row, B_pad), :]                     # aligned tile load
        r = jax.nn.sigmoid(gx[:, 0:H_pad] + gh[:, 0:H_pad])
        z = jax.nn.sigmoid(gx[:, H_pad:2 * H_pad] + gh[:, H_pad:2 * H_pad])
        n = jnp.tanh(gx[:, 2 * H_pad:] + r * (gh[:, 2 * H_pad:] + b_hn))
        h_new = n + z * (h - n)                               # == (1-z)*n + z*h
        seq_buf[pl.ds(row, B_pad), :] = h_new                 # feed next layer
        return h_new

    h0 = jnp.zeros((B_pad, H_pad), jnp.float32)
    h_last = jax.lax.fori_loop(0, T, step, h0, unroll=min(T, 8))

    # ---- final Linear on h[-1] (dropout is identity in eval mode) -----------
    @pl.when(l == L - 1)
    def _():
        out_ref[...] = (jnp.dot(h_last.astype(jnp.bfloat16), fcw_ref[...],
                                preferred_element_type=jnp.float32)
                        + fcb_ref[...])


# ----------------------------------------------------------------------------
# One-time parameter preparation (hoisted out of the forward call).
# ----------------------------------------------------------------------------
def prepare_params(params, num_channel):
    """Pack PyTorch-layout GRU/Linear weights into gate-fused, (8,128)-tile
    padded, bf16 MXU operands."""
    L = len(params["w_ih"])
    H = params["w_hh"][0].shape[1]
    O = params["fc_w"].shape[0]
    H_pad = _round_up(max(H, num_channel), 128)
    O_pad = _round_up(O, 128)
    GH = 3 * H_pad

    def pack_gates(w, in_dim):
        # (3H, in_dim) torch layout -> (H_pad, 3*H_pad); gate g occupies lane
        # block [g*H_pad, g*H_pad+H). Zero padding keeps the padded state at 0.
        out = jnp.zeros((H_pad, GH), jnp.float32)
        for g in range(3):
            out = out.at[:in_dim, g * H_pad:g * H_pad + H].set(
                w[g * H:(g + 1) * H, :].T)
        return out

    wih = jnp.stack([pack_gates(params["w_ih"][l], num_channel if l == 0 else H)
                     for l in range(L)]).astype(jnp.bfloat16)        # (L,H_pad,GH)
    whh = jnp.stack([pack_gates(params["w_hh"][l], H)
                     for l in range(L)]).astype(jnp.bfloat16)        # (L,H_pad,GH)

    def pack_bias(b_ih, b_hh):
        # Fold b_ih + b_hh for the r/z gates; keep only b_ih for n (its b_hh
        # term sits inside the r*(...) factor and stays separate).
        bx = jnp.zeros((GH,), jnp.float32)
        bx = bx.at[0 * H_pad:0 * H_pad + H].set(b_ih[0:H] + b_hh[0:H])
        bx = bx.at[1 * H_pad:1 * H_pad + H].set(b_ih[H:2 * H] + b_hh[H:2 * H])
        bx = bx.at[2 * H_pad:2 * H_pad + H].set(b_ih[2 * H:3 * H])
        bhn = jnp.zeros((H_pad,), jnp.float32).at[:H].set(b_hh[2 * H:3 * H])
        return bx[None, :], bhn[None, :]

    packed = [pack_bias(params["b_ih"][l], params["b_hh"][l]) for l in range(L)]
    bx = jnp.stack([p[0] for p in packed])                           # (L,1,GH)
    bhn = jnp.stack([p[1] for p in packed])                          # (L,1,H_pad)

    fcw = jnp.zeros((H_pad, O_pad), jnp.float32).at[:H, :O].set(
        params["fc_w"].T).astype(jnp.bfloat16)                       # (H_pad,O_pad)
    fcb = jnp.zeros((1, O_pad), jnp.float32).at[0, :O].set(params["fc_b"])

    return dict(wih=wih, whh=whh, bx=bx, bhn=bhn, fcw=fcw, fcb=fcb,
                num_layers=L, hidden=H, output_size=O,
                H_pad=H_pad, O_pad=O_pad)


# ----------------------------------------------------------------------------
# Forward wrapper
# ----------------------------------------------------------------------------
def custom_gru_forward(x, prep):
    """x: (B, T, C) float32, batch_first like the PyTorch module. Returns (B, O)."""
    B, T, C = x.shape
    L = prep["num_layers"]
    H_pad, O_pad = prep["H_pad"], prep["O_pad"]
    GH = 3 * H_pad
    B_pad = _round_up(B, 8)

    # Time-major, padded to the (8,128) vreg tile, bf16 = MXU operand dtype.
    x_tm = jnp.transpose(x, (1, 0, 2)).astype(jnp.float32)           # (T, B, C)
    x_pad = jnp.zeros((T, B_pad, H_pad), jnp.float32).at[:, :B, :C].set(x_tm)
    x_flat = x_pad.reshape(T * B_pad, H_pad).astype(jnp.bfloat16)

    grid_spec = pltpu.PrefetchScalarGridSpec(
        num_scalar_prefetch=0,
        grid=(L,),
        in_specs=[
            # Grid-invariant inputs (x, fcw, fcb) use constant index maps, so
            # they are DMA'd once.  (pipeline_mode=pl.Buffered(1) would halve
            # their VMEM footprint for very large T on v7x; unnecessary here.)
            pl.BlockSpec((T * B_pad, H_pad), lambda l: (0, 0)),      # x
            pl.BlockSpec((None, H_pad, GH), lambda l: (l, 0, 0)),    # wih (per layer)
            pl.BlockSpec((None, H_pad, GH), lambda l: (l, 0, 0)),    # whh (per layer)
            pl.BlockSpec((None, 1, GH), lambda l: (l, 0, 0)),        # bx  (per layer)
            pl.BlockSpec((None, 1, H_pad), lambda l: (l, 0, 0)),     # bhn (per layer)
            pl.BlockSpec((H_pad, O_pad), lambda l: (0, 0)),          # fcw
            pl.BlockSpec((1, O_pad), lambda l: (0, 0)),              # fcb
        ],
        out_specs=pl.BlockSpec((B_pad, O_pad), lambda l: (0, 0)),    # resident output
        scratch_shapes=[
            pltpu.VMEM((T * B_pad, H_pad), jnp.float32),   # seq_buf (layer -> layer)
            pltpu.VMEM((T * B_pad, GH), jnp.float32),      # gx_buf (gate pre-acts)
        ],
    )

    out_pad = pl.pallas_call(
        gru_stack_kernel,
        out_shape=jax.ShapeDtypeStruct((B_pad, O_pad), jnp.float32),
        grid_spec=grid_spec,
        compiler_params=pltpu.CompilerParams(
            dimension_semantics=("arbitrary",),            # layers are sequential
            vmem_limit_bytes=32 * 1024 * 1024),
    )(x_flat, prep["wih"], prep["whh"], prep["bx"], prep["bhn"],
      prep["fcw"], prep["fcb"])

    return out_pad[:B, :prep["output_size"]]


# ----------------------------------------------------------------------------
# Pure-JAX reference (mirrors torch.nn.GRU + Linear) for validation.
# matmul_dtype=jnp.bfloat16 emulates the kernel's MXU operand casting.
# ----------------------------------------------------------------------------
def custom_gru_reference(x, params, matmul_dtype=jnp.float32):
    B, T, C = x.shape
    L = len(params["w_ih"])
    H = params["w_hh"][0].shape[1]

    def mm(a, b):
        return jnp.dot(a.astype(matmul_dtype), b.astype(matmul_dtype),
                       preferred_element_type=jnp.float32)

    inp = x
    h_final = None
    for l in range(L):
        w_ih, w_hh = params["w_ih"][l], params["w_hh"][l]
        b_ih, b_hh = params["b_ih"][l], params["b_hh"][l]

        def step(h, x_t):
            gx = mm(x_t, w_ih.T) + b_ih
            gh = mm(h, w_hh.T) + b_hh
            r = jax.nn.sigmoid(gx[:, :H] + gh[:, :H])
            z = jax.nn.sigmoid(gx[:, H:2 * H] + gh[:, H:2 * H])
            n = jnp.tanh(gx[:, 2 * H:] + r * gh[:, 2 * H:])
            h_new = (1.0 - z) * n + z * h
            return h_new, h_new

        h0 = jnp.zeros((B, H), jnp.float32)
        h_final, seq = jax.lax.scan(step, h0, jnp.swapaxes(inp, 0, 1))
        inp = jnp.swapaxes(seq, 0, 1)

    return mm(h_final, params["fc_w"].T) + params["fc_b"]


# ----------------------------------------------------------------------------
# Deterministic parameter init (matches nn.GRU / nn.Linear shapes).
# ----------------------------------------------------------------------------
def init_params(key, num_channel, hidden_size, output_size, num_layers):
    k = 1.0 / jnp.sqrt(hidden_size)
    params = {"w_ih": [], "w_hh": [], "b_ih": [], "b_hh": []}
    for l in range(num_layers):
        in_dim = num_channel if l == 0 else hidden_size
        key, k1, k2, k3, k4 = jax.random.split(key, 5)
        params["w_ih"].append(jax.random.uniform(
            k1, (3 * hidden_size, in_dim), jnp.float32, -k, k))
        params["w_hh"].append(jax.random.uniform(
            k2, (3 * hidden_size, hidden_size), jnp.float32, -k, k))
        params["b_ih"].append(jax.random.uniform(
            k3, (3 * hidden_size,), jnp.float32, -k, k))
        params["b_hh"].append(jax.random.uniform(
            k4, (3 * hidden_size,), jnp.float32, -k, k))
    key, k5, k6 = jax.random.split(key, 3)
    params["fc_w"] = jax.random.uniform(
        k5, (output_size, hidden_size), jnp.float32, -k, k)
    params["fc_b"] = jax.random.uniform(
        k6, (output_size,), jnp.float32, -k, k)
    return params


if __name__ == "__main__":
    B, T, C = 2, 8, 4          # batch, seq, num_channel
    H, O, L = 32, 8, 2         # hidden_size, output_size, num_layers
    dropout = 0.1              # identity in eval semantics

    key = jax.random.PRNGKey(0)
    key, xk = jax.random.split(key)
    x = jax.random.normal(xk, (B, T, C), jnp.float32)
    params = init_params(key, C, H, O, L)

    prep = prepare_params(params, num_channel=C)    # one-time weight packing
    out = custom_gru_forward(x, prep)
    out = jax.block_until_ready(out)
    assert out.shape == (B, O)

    # Tight check vs. a reference that emulates the kernel's bf16 MXU operands.
    ref_bf16 = custom_gru_reference(x, params, matmul_dtype=jnp.bfloat16)
    assert jnp.allclose(out, ref_bf16, atol=2e-3, rtol=2e-3), (
        f"bf16-ref mismatch: max abs err {jnp.max(jnp.abs(out - ref_bf16))}")

    # Loose semantic check vs. the pure-f32 reference (bf16 matmul noise only).
    ref_f32 = custom_gru_reference(x, params, matmul_dtype=jnp.float32)
    assert jnp.allclose(out, ref_f32, atol=1e-1, rtol=1e-1), (
        f"f32-ref mismatch: max abs err {jnp.max(jnp.abs(out - ref_f32))}")

    print("KERNEL_OK")
</pallas_src>

<mosaic_0001>
module attributes {stable_mosaic.version = 11 : i64} {
  func.func @gru_stack_kernel(%arg0: i32, %arg1: memref<64x128xbf16, #tpu.memory_space<vmem>>, %arg2: memref<1x128x384xbf16, #tpu.memory_space<vmem>>, %arg3: memref<1x128x384xbf16, #tpu.memory_space<vmem>>, %arg4: memref<1x1x384xf32, #tpu.memory_space<vmem>>, %arg5: memref<1x1x128xf32, #tpu.memory_space<vmem>>, %arg6: memref<128x128xbf16, #tpu.memory_space<vmem>>, %arg7: memref<1x128xf32, #tpu.memory_space<vmem>>, %arg8: memref<8x128xf32, #tpu.memory_space<vmem>>, %arg9: memref<64x128xf32, #tpu.memory_space<vmem>>, %arg10: memref<64x384xf32, #tpu.memory_space<vmem>>) attributes {dimension_semantics = [#tpu.dimension_semantics<arbitrary>], iteration_bounds = array<i64: 2>, scalar_prefetch = 0 : i64, scratch_operands = 2 : i64, tpu.core_type = #tpu.core_type<tc>, window_params = [{pipeline_mode = #tpu.pipeline_mode<synchronous>, transform_indices = @transform_0, window_bounds = array<i64: 64, 128>}, {transform_indices = @transform_1, window_bounds = array<i64: 1, 128, 384>}, {transform_indices = @transform_2, window_bounds = array<i64: 1, 128, 384>}, {transform_indices = @transform_3, window_bounds = array<i64: 1, 1, 384>}, {transform_indices = @transform_4, window_bounds = array<i64: 1, 1, 128>}, {pipeline_mode = #tpu.pipeline_mode<synchronous>, transform_indices = @transform_5, window_bounds = array<i64: 128, 128>}, {pipeline_mode = #tpu.pipeline_mode<synchronous>, transform_indices = @transform_6, window_bounds = array<i64: 1, 128>}, {pipeline_mode = #tpu.pipeline_mode<synchronous>, transform_indices = @transform_7, window_bounds = array<i64: 8, 128>}]} {
    %c0_i32 = arith.constant 0 : i32
    %0 = arith.cmpi eq, %arg0, %c0_i32 : i32
    %1 = arith.extui %0 : i1 to i32
    %c0_i32_0 = arith.constant 0 : i32
    %2 = arith.cmpi ne, %1, %c0_i32_0 : i32
    scf.if %2 {
      %cst_80 = arith.constant 0.000000e+00 : f32
      %294 = vector.broadcast %cst_80 : f32 to vector<8x128xf32>
      %c0_81 = arith.constant 0 : index
      %c0_82 = arith.constant 0 : index
      %295 = vector.load %arg8[%c0_81, %c0_82] : memref<8x128xf32, #tpu.memory_space<vmem>>, vector<8x128xf32>
      tpu.vector_store %arg8[%c0_81, %c0_82], %294 {strides = array<i32>} : memref<8x128xf32, #tpu.memory_space<vmem>>, vector<8x128xf32>,
      %c0_83 = arith.constant 0 : index
      %c0_84 = arith.constant 0 : index
      %296 = vector.load %arg1[%c0_83, %c0_84] : memref<64x128xbf16, #tpu.memory_space<vmem>>, vector<64x128xbf16>
      %c0_85 = arith.constant 0 : index
      %c0_86 = arith.constant 0 : index
      %c0_87 = arith.constant 0 : index
      %297 = vector.load %arg2[%c0_85, %c0_86, %c0_87] : memref<1x128x384xbf16, #tpu.memory_space<vmem>>, vector<1x128x384xbf16>
      %298 = vector.shape_cast %297 : vector<1x128x384xbf16> to vector<128x384xbf16>
      %cst_88 = arith.constant dense<0.000000e+00> : vector<64x384xf32>
      %299 = tpu.matmul %296, %298, %cst_88 {dimension_numbers = #tpu.dot_dimension_numbers<[1], [0], [0], [1], [0, 0, 1, 1], [], []>} : vector<64x128xbf16>, vector<128x384xbf16>, vector<64x384xf32> -> vector<64x384xf32>
      %c0_89 = arith.constant 0 : index
      %c0_90 = arith.constant 0 : index
      %c0_91 = arith.constant 0 : index
      %300 = vector.load %arg4[%c0_89, %c0_90, %c0_91] : memref<1x1x384xf32, #tpu.memory_space<vmem>>, vector<1x1x384xf32>
      %301 = vector.shape_cast %300 : vector<1x1x384xf32> to vector<1x384xf32>
      %302 = vector.broadcast %301 : vector<1x384xf32> to vector<64x384xf32>
      %303 = arith.addf %299, %302 : vector<64x384xf32>
      %c0_92 = arith.constant 0 : index
      %c0_93 = arith.constant 0 : index
      %304 = vector.load %arg10[%c0_92, %c0_93] : memref<64x384xf32, #tpu.memory_space<vmem>>, vector<64x384xf32>
      tpu.vector_store %arg10[%c0_92, %c0_93], %303 {strides = array<i32>} : memref<64x384xf32, #tpu.memory_space<vmem>>, vector<64x384xf32>,
    } else {
    }
    %c0_i32_1 = arith.constant 0 : i32
    %3 = arith.cmpi sgt, %arg0, %c0_i32_1 : i32
    %4 = arith.extui %3 : i1 to i32
    %c0_i32_2 = arith.constant 0 : i32
    %5 = arith.cmpi ne, %4, %c0_i32_2 : i32
    scf.if %5 {
      %c0_80 = arith.constant 0 : index
      %c0_81 = arith.constant 0 : index
      %294 = vector.load %arg9[%c0_80, %c0_81] : memref<64x128xf32, #tpu.memory_space<vmem>>, vector<64x128xf32>
      %295 = arith.truncf %294 : vector<64x128xf32> to vector<64x128xbf16>
      %c0_82 = arith.constant 0 : index
      %c0_83 = arith.constant 0 : index
      %c0_84 = arith.constant 0 : index
      %296 = vector.load %arg2[%c0_82, %c0_83, %c0_84] : memref<1x128x384xbf16, #tpu.memory_space<vmem>>, vector<1x128x384xbf16>
      %297 = vector.shape_cast %296 : vector<1x128x384xbf16> to vector<128x384xbf16>
      %cst_85 = arith.constant dense<0.000000e+00> : vector<64x384xf32>
      %298 = tpu.matmul %295, %297, %cst_85 {dimension_numbers = #tpu.dot_dimension_numbers<[1], [0], [0], [1], [0, 0, 1, 1], [], []>} : vector<64x128xbf16>, vector<128x384xbf16>, vector<64x384xf32> -> vector<64x384xf32>
      %c0_86 = arith.constant 0 : index
      %c0_87 = arith.constant 0 : index
      %c0_88 = arith.constant 0 : index
      %299 = vector.load %arg4[%c0_86, %c0_87, %c0_88] : memref<1x1x384xf32, #tpu.memory_space<vmem>>, vector<1x1x384xf32>
      %300 = vector.shape_cast %299 : vector<1x1x384xf32> to vector<1x384xf32>
      %301 = vector.broadcast %300 : vector<1x384xf32> to vector<64x384xf32>
      %302 = arith.addf %298, %301 : vector<64x384xf32>
      %c0_89 = arith.constant 0 : index
      %c0_90 = arith.constant 0 : index
      %303 = vector.load %arg10[%c0_89, %c0_90] : memref<64x384xf32, #tpu.memory_space<vmem>>, vector<64x384xf32>
      tpu.vector_store %arg10[%c0_89, %c0_90], %302 {strides = array<i32>} : memref<64x384xf32, #tpu.memory_space<vmem>>, vector<64x384xf32>,
    } else {
    }
    %c0 = arith.constant 0 : index
    %c0_3 = arith.constant 0 : index
    %c0_4 = arith.constant 0 : index
    %6 = vector.load %arg5[%c0, %c0_3, %c0_4] : memref<1x1x128xf32, #tpu.memory_space<vmem>>, vector<1x1x128xf32>
    %7 = vector.shape_cast %6 : vector<1x1x128xf32> to vector<1x128xf32>
    %8 = vector.shape_cast %7 : vector<1x128xf32> to vector<1x128xf32>
    %9 = vector.broadcast %8 : vector<1x128xf32> to vector<8x128xf32>
    %cst = arith.constant 0.000000e+00 : f32
    %10 = vector.broadcast %cst : f32 to vector<8x128xf32>
    %c0_i32_5 = arith.constant 0 : i32
    %11 = arith.truncf %10 : vector<8x128xf32> to vector<8x128xbf16>
    %c0_6 = arith.constant 0 : index
    %c0_7 = arith.constant 0 : index
    %c0_8 = arith.constant 0 : index
    %12 = vector.load %arg3[%c0_6, %c0_7, %c0_8] : memref<1x128x384xbf16, #tpu.memory_space<vmem>>, vector<1x128x384xbf16>
    %13 = vector.shape_cast %12 : vector<1x128x384xbf16> to vector<128x384xbf16>
    %cst_9 = arith.constant dense<0.000000e+00> : vector<8x384xf32>
    %14 = tpu.matmul %11, %13, %cst_9 {dimension_numbers = #tpu.dot_dimension_numbers<[1], [0], [0], [1], [0, 0, 1, 1], [], []>} : vector<8x128xbf16>, vector<128x384xbf16>, vector<8x384xf32> -> vector<8x384xf32>
    %c8_i32 = arith.constant 8 : i32
    %15 = arith.muli %c0_i32_5, %c8_i32 : i32
    %16 = tpu.assume_multiple %15, 8 : i32
    %17 = arith.index_cast %16 : i32 to index
    %c0_10 = arith.constant 0 : index
    %18 = vector.load %arg10[%17, %c0_10] : memref<64x384xf32, #tpu.memory_space<vmem>>, vector<8x384xf32>
    %19 = vector.extract_strided_slice %18 {offsets = [0, 0], sizes = [8, 128], strides = [1, 1]} : vector<8x384xf32> to vector<8x128xf32>
    %20 = vector.extract_strided_slice %14 {offsets = [0, 0], sizes = [8, 128], strides = [1, 1]} : vector<8x384xf32> to vector<8x128xf32>
    %21 = arith.addf %19, %20 : vector<8x128xf32>
    %22 = arith.negf %21 : vector<8x128xf32>
    %23 = math.exp %22 : vector<8x128xf32>
    %cst_11 = arith.constant 1.000000e+00 : f32
    %24 = vector.broadcast %cst_11 : f32 to vector<8x128xf32>
    %25 = arith.addf %24, %23 : vector<8x128xf32>
    %26 = arith.divf %24, %25 : vector<8x128xf32>
    %27 = vector.extract_strided_slice %18 {offsets = [0, 128], sizes = [8, 128], strides = [1, 1]} : vector<8x384xf32> to vector<8x128xf32>
    %28 = vector.extract_strided_slice %14 {offsets = [0, 128], sizes = [8, 128], strides = [1, 1]} : vector<8x384xf32> to vector<8x128xf32>
    %29 = arith.addf %27, %28 : vector<8x128xf32>
    %30 = arith.negf %29 : vector<8x128xf32>
    %31 = math.exp %30 : vector<8x128xf32>
    %cst_12 = arith.constant 1.000000e+00 : f32
    %32 = vector.broadcast %cst_12 : f32 to vector<8x128xf32>
    %33 = arith.addf %32, %31 : vector<8x128xf32>
    %34 = arith.divf %32, %33 : vector<8x128xf32>
    %35 = vector.extract_strided_slice %18 {offsets = [0, 256], sizes = [8, 128], strides = [1, 1]} : vector<8x384xf32> to vector<8x128xf32>
    %36 = vector.extract_strided_slice %14 {offsets = [0, 256], sizes = [8, 128], strides = [1, 1]} : vector<8x384xf32> to vector<8x128xf32>
    %37 = arith.addf %36, %9 : vector<8x128xf32>
    %38 = arith.mulf %26, %37 : vector<8x128xf32>
    %39 = arith.addf %35, %38 : vector<8x128xf32>
    %40 = math.tanh %39 : vector<8x128xf32>
    %41 = arith.subf %10, %40 : vector<8x128xf32>
    %42 = arith.mulf %34, %41 : vector<8x128xf32>
    %43 = arith.addf %40, %42 : vector<8x128xf32>
    %44 = arith.index_cast %16 : i32 to index
    %c0_13 = arith.constant 0 : index
    %45 = vector.load %arg9[%44, %c0_13] : memref<64x128xf32, #tpu.memory_space<vmem>>, vector<8x128xf32>
    tpu.vector_store %arg9[%44, %c0_13], %43 {strides = array<i32>} : memref<64x128xf32, #tpu.memory_space<vmem>>, vector<8x128xf32>,
    %c1_i32 = arith.constant 1 : i32
    %46 = arith.truncf %43 : vector<8x128xf32> to vector<8x128xbf16>
    %c0_14 = arith.constant 0 : index
    %c0_15 = arith.constant 0 : index
    %c0_16 = arith.constant 0 : index
    %47 = vector.load %arg3[%c0_14, %c0_15, %c0_16] : memref<1x128x384xbf16, #tpu.memory_space<vmem>>, vector<1x128x384xbf16>
    %48 = vector.shape_cast %47 : vector<1x128x384xbf16> to vector<128x384xbf16>
    %cst_17 = arith.constant dense<0.000000e+00> : vector<8x384xf32>
    %49 = tpu.matmul %46, %48, %cst_17 {dimension_numbers = #tpu.dot_dimension_numbers<[1], [0], [0], [1], [0, 0, 1, 1], [], []>} : vector<8x128xbf16>, vector<128x384xbf16>, vector<8x384xf32> -> vector<8x384xf32>
    %c8_i32_18 = arith.constant 8 : i32
    %50 = arith.muli %c1_i32, %c8_i32_18 : i32
    %51 = tpu.assume_multiple %50, 8 : i32
    %52 = arith.index_cast %51 : i32 to index
    %c0_19 = arith.constant 0 : index
    %53 = vector.load %arg10[%52, %c0_19] : memref<64x384xf32, #tpu.memory_space<vmem>>, vector<8x384xf32>
    %54 = vector.extract_strided_slice %53 {offsets = [0, 0], sizes = [8, 128], strides = [1, 1]} : vector<8x384xf32> to vector<8x128xf32>
    %55 = vector.extract_strided_slice %49 {offsets = [0, 0], sizes = [8, 128], strides = [1, 1]} : vector<8x384xf32> to vector<8x128xf32>
    %56 = arith.addf %54, %55 : vector<8x128xf32>
    %57 = arith.negf %56 : vector<8x128xf32>
    %58 = math.exp %57 : vector<8x128xf32>
    %cst_20 = arith.constant 1.000000e+00 : f32
    %59 = vector.broadcast %cst_20 : f32 to vector<8x128xf32>
    %60 = arith.addf %59, %58 : vector<8x128xf32>
    %61 = arith.divf %59, %60 : vector<8x128xf32>
    %62 = vector.extract_strided_slice %53 {offsets = [0, 128], sizes = [8, 128], strides = [1, 1]} : vector<8x384xf32> to vector<8x128xf32>
    %63 = vector.extract_strided_slice %49 {offsets = [0, 128], sizes = [8, 128], strides = [1, 1]} : vector<8x384xf32> to vector<8x128xf32>
    %64 = arith.addf %62, %63 : vector<8x128xf32>
    %65 = arith.negf %64 : vector<8x128xf32>
    %66 = math.exp %65 : vector<8x128xf32>
    %cst_21 = arith.constant 1.000000e+00 : f32
    %67 = vector.broadcast %cst_21 : f32 to vector<8x128xf32>
    %68 = arith.addf %67, %66 : vector<8x128xf32>
    %69 = arith.divf %67, %68 : vector<8x128xf32>
    %70 = vector.extract_strided_slice %53 {offsets = [0, 256], sizes = [8, 128], strides = [1, 1]} : vector<8x384xf32> to vector<8x128xf32>
    %71 = vector.extract_strided_slice %49 {offsets = [0, 256], sizes = [8, 128], strides = [1, 1]} : vector<8x384xf32> to vector<8x128xf32>
    %72 = arith.addf %71, %9 : vector<8x128xf32>
    %73 = arith.mulf %61, %72 : vector<8x128xf32>
    %74 = arith.addf %70, %73 : vector<8x128xf32>
    %75 = math.tanh %74 : vector<8x128xf32>
    %76 = arith.subf %43, %75 : vector<8x128xf32>
    %77 = arith.mulf %69, %76 : vector<8x128xf32>
    %78 = arith.addf %75, %77 : vector<8x128xf32>
    %79 = arith.index_cast %51 : i32 to index
    %c0_22 = arith.constant 0 : index
    %80 = vector.load %arg9[%79, %c0_22] : memref<64x128xf32, #tpu.memory_space<vmem>>, vector<8x128xf32>
    tpu.vector_store %arg9[%79, %c0_22], %78 {strides = array<i32>} : memref<64x128xf32, #tpu.memory_space<vmem>>, vector<8x128xf32>,
    %c2_i32 = arith.constant 2 : i32
    %81 = arith.truncf %78 : vector<8x128xf32> to vector<8x128xbf16>
    %c0_23 = arith.constant 0 : index
    %c0_24 = arith.constant 0 : index
    %c0_25 = arith.constant 0 : index
    %82 = vector.load %arg3[%c0_23, %c0_24, %c0_25] : memref<1x128x384xbf16, #tpu.memory_space<vmem>>, vector<1x128x384xbf16>
    %83 = vector.shape_cast %82 : vector<1x128x384xbf16> to vector<128x384xbf16>
    %cst_26 = arith.constant dense<0.000000e+00> : vector<8x384xf32>
    %84 = tpu.matmul %81, %83, %cst_26 {dimension_numbers = #tpu.dot_dimension_numbers<[1], [0], [0], [1], [0, 0, 1, 1], [], []>} : vector<8x128xbf16>, vector<128x384xbf16>, vector<8x384xf32> -> vector<8x384xf32>
    %c8_i32_27 = arith.constant 8 : i32
    %85 = arith.muli %c2_i32, %c8_i32_27 : i32
    %86 = tpu.assume_multiple %85, 8 : i32
    %87 = arith.index_cast %86 : i32 to index
    %c0_28 = arith.constant 0 : index
    %88 = vector.load %arg10[%87, %c0_28] : memref<64x384xf32, #tpu.memory_space<vmem>>, vector<8x384xf32>
    %89 = vector.extract_strided_slice %88 {offsets = [0, 0], sizes = [8, 128], strides = [1, 1]} : vector<8x384xf32> to vector<8x128xf32>
    %90 = vector.extract_strided_slice %84 {offsets = [0, 0], sizes = [8, 128], strides = [1, 1]} : vector<8x384xf32> to vector<8x128xf32>
    %91 = arith.addf %89, %90 : vector<8x128xf32>
    %92 = arith.negf %91 : vector<8x128xf32>
    %93 = math.exp %92 : vector<8x128xf32>
    %cst_29 = arith.constant 1.000000e+00 : f32
    %94 = vector.broadcast %cst_29 : f32 to vector<8x128xf32>
    %95 = arith.addf %94, %93 : vector<8x128xf32>
    %96 = arith.divf %94, %95 : vector<8x128xf32>
    %97 = vector.extract_strided_slice %88 {offsets = [0, 128], sizes = [8, 128], strides = [1, 1]} : vector<8x384xf32> to vector<8x128xf32>
    %98 = vector.extract_strided_slice %84 {offsets = [0, 128], sizes = [8, 128], strides = [1, 1]} : vector<8x384xf32> to vector<8x128xf32>
    %99 = arith.addf %97, %98 : vector<8x128xf32>
    %100 = arith.negf %99 : vector<8x128xf32>
    %101 = math.exp %100 : vector<8x128xf32>
    %cst_30 = arith.constant 1.000000e+00 : f32
    %102 = vector.broadcast %cst_30 : f32 to vector<8x128xf32>
    %103 = arith.addf %102, %101 : vector<8x128xf32>
    %104 = arith.divf %102, %103 : vector<8x128xf32>
    %105 = vector.extract_strided_slice %88 {offsets = [0, 256], sizes = [8, 128], strides = [1, 1]} : vector<8x384xf32> to vector<8x128xf32>
    %106 = vector.extract_strided_slice %84 {offsets = [0, 256], sizes = [8, 128], strides = [1, 1]} : vector<8x384xf32> to vector<8x128xf32>
    %107 = arith.addf %106, %9 : vector<8x128xf32>
    %108 = arith.mulf %96, %107 : vector<8x128xf32>
    %109 = arith.addf %105, %108 : vector<8x128xf32>
    %110 = math.tanh %109 : vector<8x128xf32>
    %111 = arith.subf %78, %110 : vector<8x128xf32>
    %112 = arith.mulf %104, %111 : vector<8x128xf32>
    %113 = arith.addf %110, %112 : vector<8x128xf32>
    %114 = arith.index_cast %86 : i32 to index
    %c0_31 = arith.constant 0 : index
    %115 = vector.load %arg9[%114, %c0_31] : memref<64x128xf32, #tpu.memory_space<vmem>>, vector<8x128xf32>
    tpu.vector_store %arg9[%114, %c0_31], %113 {strides = array<i32>} : memref<64x128xf32, #tpu.memory_space<vmem>>, vector<8x128xf32>,
    %c3_i32 = arith.constant 3 : i32
    %116 = arith.truncf %113 : vector<8x128xf32> to vector<8x128xbf16>
    %c0_32 = arith.constant 0 : index
    %c0_33 = arith.constant 0 : index
    %c0_34 = arith.constant 0 : index
    %117 = vector.load %arg3[%c0_32, %c0_33, %c0_34] : memref<1x128x384xbf16, #tpu.memory_space<vmem>>, vector<1x128x384xbf16>
    %118 = vector.shape_cast %117 : vector<1x128x384xbf16> to vector<128x384xbf16>
    %cst_35 = arith.constant dense<0.000000e+00> : vector<8x384xf32>
    %119 = tpu.matmul %116, %118, %cst_35 {dimension_numbers = #tpu.dot_dimension_numbers<[1], [0], [0], [1], [0, 0, 1, 1], [], []>} : vector<8x128xbf16>, vector<128x384xbf16>, vector<8x384xf32> -> vector<8x384xf32>
    %c8_i32_36 = arith.constant 8 : i32
    %120 = arith.muli %c3_i32, %c8_i32_36 : i32
    %121 = tpu.assume_multiple %120, 8 : i32
    %122 = arith.index_cast %121 : i32 to index
    %c0_37 = arith.constant 0 : index
    %123 = vector.load %arg10[%122, %c0_37] : memref<64x384xf32, #tpu.memory_space<vmem>>, vector<8x384xf32>
    %124 = vector.extract_strided_slice %123 {offsets = [0, 0], sizes = [8, 128], strides = [1, 1]} : vector<8x384xf32> to vector<8x128xf32>
    %125 = vector.extract_strided_slice %119 {offsets = [0, 0], sizes = [8, 128], strides = [1, 1]} : vector<8x384xf32> to vector<8x128xf32>
    %126 = arith.addf %124, %125 : vector<8x128xf32>
    %127 = arith.negf %126 : vector<8x128xf32>
    %128 = math.exp %127 : vector<8x128xf32>
    %cst_38 = arith.constant 1.000000e+00 : f32
    %129 = vector.broadcast %cst_38 : f32 to vector<8x128xf32>
    %130 = arith.addf %129, %128 : vector<8x128xf32>
    %131 = arith.divf %129, %130 : vector<8x128xf32>
    %132 = vector.extract_strided_slice %123 {offsets = [0, 128], sizes = [8, 128], strides = [1, 1]} : vector<8x384xf32> to vector<8x128xf32>
    %133 = vector.extract_strided_slice %119 {offsets = [0, 128], sizes = [8, 128], strides = [1, 1]} : vector<8x384xf32> to vector<8x128xf32>
    %134 = arith.addf %132, %133 : vector<8x128xf32>
    %135 = arith.negf %134 : vector<8x128xf32>
    %136 = math.exp %135 : vector<8x128xf32>
    %cst_39 = arith.constant 1.000000e+00 : f32
    %137 = vector.broadcast %cst_39 : f32 to vector<8x128xf32>
    %138 = arith.addf %137, %136 : vector<8x128xf32>
    %139 = arith.divf %137, %138 : vector<8x128xf32>
    %140 = vector.extract_strided_slice %123 {offsets = [0, 256], sizes = [8, 128], strides = [1, 1]} : vector<8x384xf32> to vector<8x128xf32>
    %141 = vector.extract_strided_slice %119 {offsets = [0, 256], sizes = [8, 128], strides = [1, 1]} : vector<8x384xf32> to vector<8x128xf32>
    %142 = arith.addf %141, %9 : vector<8x128xf32>
    %143 = arith.mulf %131, %142 : vector<8x128xf32>
    %144 = arith.addf %140, %143 : vector<8x128xf32>
    %145 = math.tanh %144 : vector<8x128xf32>
    %146 = arith.subf %113, %145 : vector<8x128xf32>
    %147 = arith.mulf %139, %146 : vector<8x128xf32>
    %148 = arith.addf %145, %147 : vector<8x128xf32>
    %149 = arith.index_cast %121 : i32 to index
    %c0_40 = arith.constant 0 : index
    %150 = vector.load %arg9[%149, %c0_40] : memref<64x128xf32, #tpu.memory_space<vmem>>, vector<8x128xf32>
    tpu.vector_store %arg9[%149, %c0_40], %148 {strides = array<i32>} : memref<64x128xf32, #tpu.memory_space<vmem>>, vector<8x128xf32>,
    %c4_i32 = arith.constant 4 : i32
    %151 = arith.truncf %148 : vector<8x128xf32> to vector<8x128xbf16>
    %c0_41 = arith.constant 0 : index
    %c0_42 = arith.constant 0 : index
    %c0_43 = arith.constant 0 : index
    %152 = vector.load %arg3[%c0_41, %c0_42, %c0_43] : memref<1x128x384xbf16, #tpu.memory_space<vmem>>, vector<1x128x384xbf16>
    %153 = vector.shape_cast %152 : vector<1x128x384xbf16> to vector<128x384xbf16>
    %cst_44 = arith.constant dense<0.000000e+00> : vector<8x384xf32>
    %154 = tpu.matmul %151, %153, %cst_44 {dimension_numbers = #tpu.dot_dimension_numbers<[1], [0], [0], [1], [0, 0, 1, 1], [], []>} : vector<8x128xbf16>, vector<128x384xbf16>, vector<8x384xf32> -> vector<8x384xf32>
    %c8_i32_45 = arith.constant 8 : i32
    %155 = arith.muli %c4_i32, %c8_i32_45 : i32
    %156 = tpu.assume_multiple %155, 8 : i32
    %157 = arith.index_cast %156 : i32 to index
    %c0_46 = arith.constant 0 : index
    %158 = vector.load %arg10[%157, %c0_46] : memref<64x384xf32, #tpu.memory_space<vmem>>, vector<8x384xf32>
    %159 = vector.extract_strided_slice %158 {offsets = [0, 0], sizes = [8, 128], strides = [1, 1]} : vector<8x384xf32> to vector<8x128xf32>
    %160 = vector.extract_strided_slice %154 {offsets = [0, 0], sizes = [8, 128], strides = [1, 1]} : vector<8x384xf32> to vector<8x128xf32>
    %161 = arith.addf %159, %160 : vector<8x128xf32>
    %162 = arith.negf %161 : vector<8x128xf32>
    %163 = math.exp %162 : vector<8x128xf32>
    %cst_47 = arith.constant 1.000000e+00 : f32
    %164 = vector.broadcast %cst_47 : f32 to vector<8x128xf32>
    %165 = arith.addf %164, %163 : vector<8x128xf32>
    %166 = arith.divf %164, %165 : vector<8x128xf32>
    %167 = vector.extract_strided_slice %158 {offsets = [0, 128], sizes = [8, 128], strides = [1, 1]} : vector<8x384xf32> to vector<8x128xf32>
    %168 = vector.extract_strided_slice %154 {offsets = [0, 128], sizes = [8, 128], strides = [1, 1]} : vector<8x384xf32> to vector<8x128xf32>
    %169 = arith.addf %167, %168 : vector<8x128xf32>
    %170 = arith.negf %169 : vector<8x128xf32>
    %171 = math.exp %170 : vector<8x128xf32>
    %cst_48 = arith.constant 1.000000e+00 : f32
    %172 = vector.broadcast %cst_48 : f32 to vector<8x128xf32>
    %173 = arith.addf %172, %171 : vector<8x128xf32>
    %174 = arith.divf %172, %173 : vector<8x128xf32>
    %175 = vector.extract_strided_slice %158 {offsets = [0, 256], sizes = [8, 128], strides = [1, 1]} : vector<8x384xf32> to vector<8x128xf32>
    %176 = vector.extract_strided_slice %154 {offsets = [0, 256], sizes = [8, 128], strides = [1, 1]} : vector<8x384xf32> to vector<8x128xf32>
    %177 = arith.addf %176, %9 : vector<8x128xf32>
    %178 = arith.mulf %166, %177 : vector<8x128xf32>
    %179 = arith.addf %175, %178 : vector<8x128xf32>
    %180 = math.tanh %179 : vector<8x128xf32>
    %181 = arith.subf %148, %180 : vector<8x128xf32>
    %182 = arith.mulf %174, %181 : vector<8x128xf32>
    %183 = arith.addf %180, %182 : vector<8x128xf32>
    %184 = arith.index_cast %156 : i32 to index
    %c0_49 = arith.constant 0 : index
    %185 = vector.load %arg9[%184, %c0_49] : memref<64x128xf32, #tpu.memory_space<vmem>>, vector<8x128xf32>
    tpu.vector_store %arg9[%184, %c0_49], %183 {strides = array<i32>} : memref<64x128xf32, #tpu.memory_space<vmem>>, vector<8x128xf32>,
    %c5_i32 = arith.constant 5 : i32
    %186 = arith.truncf %183 : vector<8x128xf32> to vector<8x128xbf16>
    %c0_50 = arith.constant 0 : index
    %c0_51 = arith.constant 0 : index
    %c0_52 = arith.constant 0 : index
    %187 = vector.load %arg3[%c0_50, %c0_51, %c0_52] : memref<1x128x384xbf16, #tpu.memory_space<vmem>>, vector<1x128x384xbf16>
    %188 = vector.shape_cast %187 : vector<1x128x384xbf16> to vector<128x384xbf16>
    %cst_53 = arith.constant dense<0.000000e+00> : vector<8x384xf32>
    %189 = tpu.matmul %186, %188, %cst_53 {dimension_numbers = #tpu.dot_dimension_numbers<[1], [0], [0], [1], [0, 0, 1, 1], [], []>} : vector<8x128xbf16>, vector<128x384xbf16>, vector<8x384xf32> -> vector<8x384xf32>
    %c8_i32_54 = arith.constant 8 : i32
    %190 = arith.muli %c5_i32, %c8_i32_54 : i32
    %191 = tpu.assume_multiple %190, 8 : i32
    %192 = arith.index_cast %191 : i32 to index
    %c0_55 = arith.constant 0 : index
    %193 = vector.load %arg10[%192, %c0_55] : memref<64x384xf32, #tpu.memory_space<vmem>>, vector<8x384xf32>
    %194 = vector.extract_strided_slice %193 {offsets = [0, 0], sizes = [8, 128], strides = [1, 1]} : vector<8x384xf32> to vector<8x128xf32>
    %195 = vector.extract_strided_slice %189 {offsets = [0, 0], sizes = [8, 128], strides = [1, 1]} : vector<8x384xf32> to vector<8x128xf32>
    %196 = arith.addf %194, %195 : vector<8x128xf32>
    %197 = arith.negf %196 : vector<8x128xf32>
    %198 = math.exp %197 : vector<8x128xf32>
    %cst_56 = arith.constant 1.000000e+00 : f32
    %199 = vector.broadcast %cst_56 : f32 to vector<8x128xf32>
    %200 = arith.addf %199, %198 : vector<8x128xf32>
    %201 = arith.divf %199, %200 : vector<8x128xf32>
    %202 = vector.extract_strided_slice %193 {offsets = [0, 128], sizes = [8, 128], strides = [1, 1]} : vector<8x384xf32> to vector<8x128xf32>
    %203 = vector.extract_strided_slice %189 {offsets = [0, 128], sizes = [8, 128], strides = [1, 1]} : vector<8x384xf32> to vector<8x128xf32>
    %204 = arith.addf %202, %203 : vector<8x128xf32>
    %205 = arith.negf %204 : vector<8x128xf32>
    %206 = math.exp %205 : vector<8x128xf32>
    %cst_57 = arith.constant 1.000000e+00 : f32
    %207 = vector.broadcast %cst_57 : f32 to vector<8x128xf32>
    %208 = arith.addf %207, %206 : vector<8x128xf32>
    %209 = arith.divf %207, %208 : vector<8x128xf32>
    %210 = vector.extract_strided_slice %193 {offsets = [0, 256], sizes = [8, 128], strides = [1, 1]} : vector<8x384xf32> to vector<8x128xf32>
    %211 = vector.extract_strided_slice %189 {offsets = [0, 256], sizes = [8, 128], strides = [1, 1]} : vector<8x384xf32> to vector<8x128xf32>
    %212 = arith.addf %211, %9 : vector<8x128xf32>
    %213 = arith.mulf %201, %212 : vector<8x128xf32>
    %214 = arith.addf %210, %213 : vector<8x128xf32>
    %215 = math.tanh %214 : vector<8x128xf32>
    %216 = arith.subf %183, %215 : vector<8x128xf32>
    %217 = arith.mulf %209, %216 : vector<8x128xf32>
    %218 = arith.addf %215, %217 : vector<8x128xf32>
    %219 = arith.index_cast %191 : i32 to index
    %c0_58 = arith.constant 0 : index
    %220 = vector.load %arg9[%219, %c0_58] : memref<64x128xf32, #tpu.memory_space<vmem>>, vector<8x128xf32>
    tpu.vector_store %arg9[%219, %c0_58], %218 {strides = array<i32>} : memref<64x128xf32, #tpu.memory_space<vmem>>, vector<8x128xf32>,
    %c6_i32 = arith.constant 6 : i32
    %221 = arith.truncf %218 : vector<8x128xf32> to vector<8x128xbf16>
    %c0_59 = arith.constant 0 : index
    %c0_60 = arith.constant 0 : index
    %c0_61 = arith.constant 0 : index
    %222 = vector.load %arg3[%c0_59, %c0_60, %c0_61] : memref<1x128x384xbf16, #tpu.memory_space<vmem>>, vector<1x128x384xbf16>
    %223 = vector.shape_cast %222 : vector<1x128x384xbf16> to vector<128x384xbf16>
    %cst_62 = arith.constant dense<0.000000e+00> : vector<8x384xf32>
    %224 = tpu.matmul %221, %223, %cst_62 {dimension_numbers = #tpu.dot_dimension_numbers<[1], [0], [0], [1], [0, 0, 1, 1], [], []>} : vector<8x128xbf16>, vector<128x384xbf16>, vector<8x384xf32> -> vector<8x384xf32>
    %c8_i32_63 = arith.constant 8 : i32
    %225 = arith.muli %c6_i32, %c8_i32_63 : i32
    %226 = tpu.assume_multiple %225, 8 : i32
    %227 = arith.index_cast %226 : i32 to index
    %c0_64 = arith.constant 0 : index
    %228 = vector.load %arg10[%227, %c0_64] : memref<64x384xf32, #tpu.memory_space<vmem>>, vector<8x384xf32>
    %229 = vector.extract_strided_slice %228 {offsets = [0, 0], sizes = [8, 128], strides = [1, 1]} : vector<8x384xf32> to vector<8x128xf32>
    %230 = vector.extract_strided_slice %224 {offsets = [0, 0], sizes = [8, 128], strides = [1, 1]} : vector<8x384xf32> to vector<8x128xf32>
    %231 = arith.addf %229, %230 : vector<8x128xf32>
    %232 = arith.negf %231 : vector<8x128xf32>
    %233 = math.exp %232 : vector<8x128xf32>
    %cst_65 = arith.constant 1.000000e+00 : f32
    %234 = vector.broadcast %cst_65 : f32 to vector<8x128xf32>
    %235 = arith.addf %234, %233 : vector<8x128xf32>
    %236 = arith.divf %234, %235 : vector<8x128xf32>
    %237 = vector.extract_strided_slice %228 {offsets = [0, 128], sizes = [8, 128], strides = [1, 1]} : vector<8x384xf32> to vector<8x128xf32>
    %238 = vector.extract_strided_slice %224 {offsets = [0, 128], sizes = [8, 128], strides = [1, 1]} : vector<8x384xf32> to vector<8x128xf32>
    %239 = arith.addf %237, %238 : vector<8x128xf32>
    %240 = arith.negf %239 : vector<8x128xf32>
    %241 = math.exp %240 : vector<8x128xf32>
    %cst_66 = arith.constant 1.000000e+00 : f32
    %242 = vector.broadcast %cst_66 : f32 to vector<8x128xf32>
    %243 = arith.addf %242, %241 : vector<8x128xf32>
    %244 = arith.divf %242, %243 : vector<8x128xf32>
    %245 = vector.extract_strided_slice %228 {offsets = [0, 256], sizes = [8, 128], strides = [1, 1]} : vector<8x384xf32> to vector<8x128xf32>
    %246 = vector.extract_strided_slice %224 {offsets = [0, 256], sizes = [8, 128], strides = [1, 1]} : vector<8x384xf32> to vector<8x128xf32>
    %247 = arith.addf %246, %9 : vector<8x128xf32>
    %248 = arith.mulf %236, %247 : vector<8x128xf32>
    %249 = arith.addf %245, %248 : vector<8x128xf32>
    %250 = math.tanh %249 : vector<8x128xf32>
    %251 = arith.subf %218, %250 : vector<8x128xf32>
    %252 = arith.mulf %244, %251 : vector<8x128xf32>
    %253 = arith.addf %250, %252 : vector<8x128xf32>
    %254 = arith.index_cast %226 : i32 to index
    %c0_67 = arith.constant 0 : index
    %255 = vector.load %arg9[%254, %c0_67] : memref<64x128xf32, #tpu.memory_space<vmem>>, vector<8x128xf32>
    tpu.vector_store %arg9[%254, %c0_67], %253 {strides = array<i32>} : memref<64x128xf32, #tpu.memory_space<vmem>>, vector<8x128xf32>,
    %c7_i32 = arith.constant 7 : i32
    %256 = arith.truncf %253 : vector<8x128xf32> to vector<8x128xbf16>
    %c0_68 = arith.constant 0 : index
    %c0_69 = arith.constant 0 : index
    %c0_70 = arith.constant 0 : index
    %257 = vector.load %arg3[%c0_68, %c0_69, %c0_70] : memref<1x128x384xbf16, #tpu.memory_space<vmem>>, vector<1x128x384xbf16>
    %258 = vector.shape_cast %257 : vector<1x128x384xbf16> to vector<128x384xbf16>
    %cst_71 = arith.constant dense<0.000000e+00> : vector<8x384xf32>
    %259 = tpu.matmul %256, %258, %cst_71 {dimension_numbers = #tpu.dot_dimension_numbers<[1], [0], [0], [1], [0, 0, 1, 1], [], []>} : vector<8x128xbf16>, vector<128x384xbf16>, vector<8x384xf32> -> vector<8x384xf32>
    %c8_i32_72 = arith.constant 8 : i32
    %260 = arith.muli %c7_i32, %c8_i32_72 : i32
    %261 = tpu.assume_multiple %260, 8 : i32
    %262 = arith.index_cast %261 : i32 to index
    %c0_73 = arith.constant 0 : index
    %263 = vector.load %arg10[%262, %c0_73] : memref<64x384xf32, #tpu.memory_space<vmem>>, vector<8x384xf32>
    %264 = vector.extract_strided_slice %263 {offsets = [0, 0], sizes = [8, 128], strides = [1, 1]} : vector<8x384xf32> to vector<8x128xf32>
    %265 = vector.extract_strided_slice %259 {offsets = [0, 0], sizes = [8, 128], strides = [1, 1]} : vector<8x384xf32> to vector<8x128xf32>
    %266 = arith.addf %264, %265 : vector<8x128xf32>
    %267 = arith.negf %266 : vector<8x128xf32>
    %268 = math.exp %267 : vector<8x128xf32>
    %cst_74 = arith.constant 1.000000e+00 : f32
    %269 = vector.broadcast %cst_74 : f32 to vector<8x128xf32>
    %270 = arith.addf %269, %268 : vector<8x128xf32>
    %271 = arith.divf %269, %270 : vector<8x128xf32>
    %272 = vector.extract_strided_slice %263 {offsets = [0, 128], sizes = [8, 128], strides = [1, 1]} : vector<8x384xf32> to vector<8x128xf32>
    %273 = vector.extract_strided_slice %259 {offsets = [0, 128], sizes = [8, 128], strides = [1, 1]} : vector<8x384xf32> to vector<8x128xf32>
    %274 = arith.addf %272, %273 : vector<8x128xf32>
    %275 = arith.negf %274 : vector<8x128xf32>
    %276 = math.exp %275 : vector<8x128xf32>
    %cst_75 = arith.constant 1.000000e+00 : f32
    %277 = vector.broadcast %cst_75 : f32 to vector<8x128xf32>
    %278 = arith.addf %277, %276 : vector<8x128xf32>
    %279 = arith.divf %277, %278 : vector<8x128xf32>
    %280 = vector.extract_strided_slice %263 {offsets = [0, 256], sizes = [8, 128], strides = [1, 1]} : vector<8x384xf32> to vector<8x128xf32>
    %281 = vector.extract_strided_slice %259 {offsets = [0, 256], sizes = [8, 128], strides = [1, 1]} : vector<8x384xf32> to vector<8x128xf32>
    %282 = arith.addf %281, %9 : vector<8x128xf32>
    %283 = arith.mulf %271, %282 : vector<8x128xf32>
    %284 = arith.addf %280, %283 : vector<8x128xf32>
    %285 = math.tanh %284 : vector<8x128xf32>
    %286 = arith.subf %253, %285 : vector<8x128xf32>
    %287 = arith.mulf %279, %286 : vector<8x128xf32>
    %288 = arith.addf %285, %287 : vector<8x128xf32>
    %289 = arith.index_cast %261 : i32 to index
    %c0_76 = arith.constant 0 : index
    %290 = vector.load %arg9[%289, %c0_76] : memref<64x128xf32, #tpu.memory_space<vmem>>, vector<8x128xf32>
    tpu.vector_store %arg9[%289, %c0_76], %288 {strides = array<i32>} : memref<64x128xf32, #tpu.memory_space<vmem>>, vector<8x128xf32>,
    %c8_i32_77 = arith.constant 8 : i32
    %c1_i32_78 = arith.constant 1 : i32
    %291 = arith.cmpi eq, %arg0, %c1_i32_78 : i32
    %292 = arith.extui %291 : i1 to i32
    %c0_i32_79 = arith.constant 0 : i32
    %293 = arith.cmpi ne, %292, %c0_i32_79 : i32
    scf.if %293 {
      %294 = arith.truncf %288 : vector<8x128xf32> to vector<8x128xbf16>
      %c0_80 = arith.constant 0 : index
      %c0_81 = arith.constant 0 : index
      %295 = vector.load %arg6[%c0_80, %c0_81] : memref<128x128xbf16, #tpu.memory_space<vmem>>, vector<128x128xbf16>
      %cst_82 = arith.constant dense<0.000000e+00> : vector<8x128xf32>
      %296 = tpu.matmul %294, %295, %cst_82 {dimension_numbers = #tpu.dot_dimension_numbers<[1], [0], [0], [1], [0, 0, 1, 1], [], []>} : vector<8x128xbf16>, vector<128x128xbf16>, vector<8x128xf32> -> vector<8x128xf32>
      %c0_83 = arith.constant 0 : index
      %c0_84 = arith.constant 0 : index
      %297 = vector.load %arg7[%c0_83, %c0_84] : memref<1x128xf32, #tpu.memory_space<vmem>>, vector<1x128xf32>
      %298 = vector.broadcast %297 : vector<1x128xf32> to vector<8x128xf32>
      %299 = arith.addf %296, %298 : vector<8x128xf32>
      %c0_85 = arith.constant 0 : index
      %c0_86 = arith.constant 0 : index
      %300 = vector.load %arg8[%c0_85, %c0_86] : memref<8x128xf32, #tpu.memory_space<vmem>>, vector<8x128xf32>
      tpu.vector_store %arg8[%c0_85, %c0_86], %299 {strides = array<i32>} : memref<8x128xf32, #tpu.memory_space<vmem>>, vector<8x128xf32>,
    } else {
    }
    return
  }
  func.func @transform_0(%arg0: i32) -> (i32, i32) {
    %c0_i32 = arith.constant 0 : i32
    %c0_i32_0 = arith.constant 0 : i32
    %c0_i32_1 = arith.constant 0 : i32
    return %c0_i32, %c0_i32_0 : i32, i32
  }
  func.func @transform_1(%arg0: i32) -> (i32, i32, i32) {
    %c0_i32 = arith.constant 0 : i32
    %c0_i32_0 = arith.constant 0 : i32
    %c0_i32_1 = arith.constant 0 : i32
    return %arg0, %c0_i32, %c0_i32_0 : i32, i32, i32
  }
  func.func @transform_2(%arg0: i32) -> (i32, i32, i32) {
    %c0_i32 = arith.constant 0 : i32
    %c0_i32_0 = arith.constant 0 : i32
    %c0_i32_1 = arith.constant 0 : i32
    return %arg0, %c0_i32, %c0_i32_0 : i32, i32, i32
  }
  func.func @transform_3(%arg0: i32) -> (i32, i32, i32) {
    %c0_i32 = arith.constant 0 : i32
    %c0_i32_0 = arith.constant 0 : i32
    %c0_i32_1 = arith.constant 0 : i32
    return %arg0, %c0_i32, %c0_i32_0 : i32, i32, i32
  }
  func.func @transform_4(%arg0: i32) -> (i32, i32, i32) {
    %c0_i32 = arith.constant 0 : i32
    %c0_i32_0 = arith.constant 0 : i32
    %c0_i32_1 = arith.constant 0 : i32
    return %arg0, %c0_i32, %c0_i32_0 : i32, i32, i32
  }
  func.func @transform_5(%arg0: i32) -> (i32, i32) {
    %c0_i32 = arith.constant 0 : i32
    %c0_i32_0 = arith.constant 0 : i32
    %c0_i32_1 = arith.constant 0 : i32
    return %c0_i32, %c0_i32_0 : i32, i32
  }
  func.func @transform_6(%arg0: i32) -> (i32, i32) {
    %c0_i32 = arith.constant 0 : i32
    %c0_i32_0 = arith.constant 0 : i32
    %c0_i32_1 = arith.constant 0 : i32
    return %c0_i32, %c0_i32_0 : i32, i32
  }
  func.func @transform_7(%arg0: i32) -> (i32, i32) {
    %c0_i32 = arith.constant 0 : i32
    %c0_i32_0 = arith.constant 0 : i32
    %c0_i32_1 = arith.constant 0 : i32
    return %c0_i32, %c0_i32_0 : i32, i32
  }
}

</mosaic_0001>

<bundles_post_ra>
// kernel: tpu_custom_call.1
= control target key start
LH: loop header
LB: loop body
LE: loop exit
PB: predicated region body
PF: predicated region fallthrough
CT: control target
= control target key end

     0   :  { %s5849_s0 = inlined_call_operand.hbm [shape: bf16[64,128], index: 0, kind: input, shape index: {}]   ;;  %s5850_s1 = inlined_call_operand.hbm [shape: bf16[2,128,384], index: 1, kind: input, shape index: {}]   ;;  %s5851_s2 = inlined_call_operand.hbm [shape: bf16[2,128,384], index: 2, kind: input, shape index: {}]   ;;  %s5852_s3 = inlined_call_operand.hbm [shape: f32[2,1,384], index: 3, kind: input, shape index: {}]   ;;  %s5853_s4 = inlined_call_operand.vmem [shape: f32[2,1,128], index: 4, kind: input, shape index: {}]   ;;  %s5854_s5 = inlined_call_operand.hbm [shape: bf16[128,128], index: 5, kind: input, shape index: {}]   ;;  %s5855_s6 = inlined_call_operand.vmem [shape: f32[1,128], index: 6, kind: input, shape index: {}]   ;;  %s5856_s7 = inlined_call_operand.hbm [shape: f32[8,128], index: 7, kind: output, shape index: {}]  }
   0x1   :  { %5865 = sst [smem:[#allocation21_spill]] %s5850_s1 }
   0x2   :  { %5866 = sst [smem:[#allocation22_spill]] %s5854_s5 }
   0x3   :  { %12 = vsyncpa [#allocation5], 0 }
   0x4   :  { %13 = vsyncpa [#allocation8], 0 }
   0x5   :  { %15 = vsyncpa [#allocation8 + $0x1], 0 }
   0x6   :  { %16 = vsyncpa [#allocation11], 0 }
   0x7   :  { %18 = vsyncpa [#allocation11 + $0x1], 0 }
   0x8   :  { %19 = vsyncpa [#allocation6], 0  ;;  %s5054_s24 = smov 0   ;;  %s5056_s25 = smov 0  }
   0x9   :  { %s5058_s26 = smov 0   ;;  %s5060_s27 = smov 0  }
   0xa LB: > { %s5073_s28 = sadd.s32 4294967295, %s5003_s27   ;;  %p66_p0 = scmp.ne.s32.totalorder %s4995_s25, %s4991_s24  ;;  %s5003_s27 = sphi %s5060_s27, %s5881_s27   ;;  %s4999_s26 = sphi %s5058_s26, %s5885_s26   ;;  %s4995_s25 = sphi %s5056_s25, %s5884_s25   ;;  %s4991_s24 = sphi %s5054_s24, %s5883_s24  }
   0xb   : > { %p67_p1 = scmp.eq.s32.totalorder %s5073_s28, 0  ;;  %p3293_p2 = scmp.ge.s32.totalorder %s5003_s27, 1 }
   0xc   : > { %p218_p3 = scmp.lt.s32.totalorder %s5003_s27, 3  ;;  %p3294_p4 = scmp.ne.s32.totalorder %s5073_s28, 0 }
   0xd   : > { %p5082_p5 = por %p67_p1, %p66_p0  ;;  %s5869_s5 = sld [smem:[#allocation22_spill]] }
   0xe   : > { %p5086_p6 = pnand %p3293_p2, %p218_p3  ;;  %s5005_s11 = smov [#allocation12]  }
   0xf   : > { %s245_s12 = sshll.u32 %s5005_s11, 4  ;;  %s5102_s14 = sadd.s32 1, %s5003_s27   ;;  %s246_s12 = int_to_ptr.vmem [resolvable:$true] %s245_s12 }
  0x10   : > { %p4627_p7 = pneg %p5086_p6  ;;  %5871 = sst [smem:[#allocation19_spill]] %s5102_s14 }
  0x11   : > { %s5858_s15 = smov 64   ;;  %s5861_s16 = smov 4  }
  0x12   : > { %p5097_p8 = pnand %p4627_p7, %p67_p1  ;;  %s50_s17 = ssub.s32 %s5003_s27, %s5102_s14 }
  0x13   : > { %s243_s10 = sshll.u32 %s5869_s5, 4  ;;  %s53_s18 = sadd.s32 1, %s4999_s26  ;;  %s244_s10 = int_to_ptr.hbm [resolvable:$true] %s243_s10 }
  0x14   : > { %4633 = dma.hbm_to_vmem [thread:$0]  (!%p5097_p8), %s244_s10, 1024, %s246_s12, [#allocation11], %s5858_s15, %s5858_s15, %s5861_s16  }
  0x15   : > { %p51_p9 = scmp.eq.s32.totalorder %s50_s17, 0  ;;  %p60_p10 = scmp.ne.s32.totalorder %s4999_s26, %s4995_s25 }
  0x16   : > { %p61_p11 = scmp.eq.s32.totalorder %s5003_s27, 0  ;;  %p4646_p12 = scmp.lt.s32.totalorder %s5003_s27, 2 }
  0x17   : > { %s5117_s19 = scalar_select %p51_p9, %s4999_s26, %s53_s18  }
  0x18   : > { %p62_p13 = por %p61_p11, %p60_p10  ;;  %s5860_s20 = sand.u32 1, %s5003_s27  }
  0x19   : > { %5872 = sst [smem:[#allocation20_spill]] %s5117_s19  ;;  %s5857_s21 = sand.u32 1, %s4999_s26  }
  0x1a   : > { %s5123_s22 = smul.u32 192, %s5857_s21  ;;  %p5125_p0 = pnand %p4646_p12, %p62_p13 }
  0x1b   : > { %s5859_s24 = smul.u32 192, %s5003_s27  ;;  %s5874_s1 = sld [smem:[#allocation21_spill]] }
  0x1c   : > { %s266_s11 = scalar_lea.vmem [#allocation7], %s5123_s22  ;;  %s5138_s18 = scalar_lea.sflag [#allocation8], %s5860_s20 }
  0x1d   : > { %s274_s12 = sshll.u32 %s266_s11, 4  ;;  %p4809_p3 = pneg %p5125_p0  ;;  %s275_s12 = int_to_ptr.vmem [resolvable:$true] %s274_s12 }
  0x21   : > { %s271_s10 = scalar_lea.hbm %s5874_s1, %s5859_s24  ;;  %s4812_s11 = scalar_lea.hbm %s5874_s1, 384 }
  0x22   : > { %s272_s17 = sshll.u32 %s271_s10, 4  ;;  %s273_s17 = int_to_ptr.hbm [resolvable:$true] %s272_s17 }
  0x23   : > { %s4805_s21 = sshra.s32 %s273_s17, 4  ;;  %s4806_s21 = int_to_ptr.hbm [resolvable:$true] %s4805_s21 }
  0x24   : > { %s4807_s15 = scalar_lea.hbm %s4806_s21, 192  ;;  %p4813_p10 = scmp.lt.s32.totalorder %s4806_s21, %s5874_s1 }
  0x25   : > { %p4808_p2 = scmp.ne.s32.totalorder %s4806_s21, %s4807_s15  ;;  %p4814_p11 = scmp.lt.s32.totalorder %s4812_s11, %s4807_s15 }
  0x27   : > { %p4810_p7 = pnand %p4809_p3, %p4808_p2  ;;  %p4815_p12 = por %p4814_p11, %p4813_p10 }
  0x29   : > { %p4811_p9 = pneg %p4810_p7 }
  0x2b   : > { %p4816_p13 = pnand %p4815_p12, %p4811_p9 }
  0x2d   : > { %4819 = shalt.err (!%p4816_p13)
}
  0x2e   : > { %s5864_s20 = smov 192   ;;  %s5009_s16 = smov 12  }
  0x2f   : > { %4637 = dma.hbm_to_vmem [thread:$0]  (!%p5125_p0), %s273_s17, 3072, %s275_s12, %s5138_s18, %s5864_s20, %s5864_s20, %s5009_s16  }
  0x30   : > { %s229_s21 = sshll.u32 %s5849_s0, 4  ;;  %s5010_s15 = smov [#allocation4]   ;;  %s230_s21 = int_to_ptr.hbm [resolvable:$true] %s229_s21 }
  0x31   : > { %s231_s24 = sshll.u32 %s5010_s15, 4  ;;  %s5875_s11 = smov 4   ;;  %s232_s24 = int_to_ptr.vmem [resolvable:$true] %s231_s24 }
  0x32   : > { %s5876_s10 = smov 64   ;;  %s5877_s1 = smul.u32 192, %s5003_s27 }
  0x33   : > { %4630 = dma.hbm_to_vmem [thread:$0]  (!%p5097_p8), %s230_s21, 512, %s232_s24, [#allocation5], %s5876_s10, %s5876_s10, %s5875_s11  }
  0x34   : > { %s293_s14 = scalar_lea.hbm %s5851_s2, %s5877_s1  ;;  %s288_s12 = scalar_lea.vmem [#allocation9], %s5123_s22 }
  0x35   : > { %s296_s17 = sshll.u32 %s288_s12, 4  ;;  %s294_s20 = sshll.u32 %s293_s14, 4  ;;  %s297_s17 = int_to_ptr.vmem [resolvable:$true] %s296_s17  ;;  %s295_s20 = int_to_ptr.hbm [resolvable:$true] %s294_s20 }
  0x36   : > { %s4865_s8 = sshra.s32 %s295_s20, 4  ;;  %s4872_s15 = scalar_lea.hbm %s5851_s2, 384  ;;  %s4866_s8 = int_to_ptr.hbm [resolvable:$true] %s4865_s8 }
  0x37   : > { %s4867_s9 = scalar_lea.hbm %s4866_s8, 192  ;;  %p4873_p8 = scmp.lt.s32.totalorder %s4866_s8, %s5851_s2 }
  0x38   : > { %p4868_p2 = scmp.ne.s32.totalorder %s4866_s8, %s4867_s9  ;;  %p4874_p10 = scmp.lt.s32.totalorder %s4872_s15, %s4867_s9 }
  0x3a   : > { %p4870_p7 = pnand %p4868_p2, %p4809_p3  ;;  %p4875_p11 = por %p4874_p10, %p4873_p8 }
  0x3c   : > { %p4871_p9 = pneg %p4870_p7 }
  0x3e   : > { %p4876_p12 = pnand %p4875_p11, %p4871_p9 }
  0x40   : > { %4879 = shalt.err (!%p4876_p12)
}
  0x41   : > { %s5878_s1 = smov 192   ;;  %s5879_s14 = sand.u32 1, %s4999_s26  }
  0x42   : > { %4640 = dma.hbm_to_vmem [thread:$0]  (!%p5125_p0), %s295_s20, 3072, %s297_s17, %s5138_s18, %s5878_s1, %s5878_s1, %s5009_s16  }
  0x43   : > { %s4605_s19 = smul.u32 3, %s5879_s14  ;;  %s5880_s21 = sand.u32 1, %s5003_s27  }
  0x44   : > { %s4606_s22 = smul.u32 3, %s5003_s27  ;;  %s307_s15 = scalar_lea.sflag [#allocation11], %s5880_s21 }
  0x45   : > { %s310_s8 = scalar_lea.vmem [#allocation10], %s4605_s19  ;;  %s4902_s18 = scalar_lea.hbm %s5852_s3, 6 }
  0x46   : > { %s314_s12 = scalar_lea.hbm %s5852_s3, %s4606_s22  ;;  %s318_s9 = sshll.u32 %s310_s8, 4  ;;  %s319_s9 = int_to_ptr.vmem [resolvable:$true] %s318_s9 }
  0x47   : > { %s316_s13 = sshll.u32 %s314_s12, 4  ;;  %s317_s13 = int_to_ptr.hbm [resolvable:$true] %s316_s13 }
  0x48   : > { %s4895_s24 = sshra.s32 %s317_s13, 4  ;;  %s4896_s24 = int_to_ptr.hbm [resolvable:$true] %s4895_s24 }
  0x49   : > { %s4897_s5 = scalar_lea.hbm %s4896_s24, 3  ;;  %p4903_p9 = scmp.lt.s32.totalorder %s4896_s24, %s5852_s3 }
  0x4a   : > { %p4898_p13 = scmp.ne.s32.totalorder %s4896_s24, %s4897_s5  ;;  %p4904_p8 = scmp.lt.s32.totalorder %s4902_s18, %s4897_s5 }
  0x4c   : > { %p4900_p2 = pnand %p4898_p13, %p4809_p3  ;;  %p4905_p10 = por %p4904_p8, %p4903_p9 }
  0x4e   : > { %p4901_p7 = pneg %p4900_p2 }
  0x50   : > { %p4906_p11 = pnand %p4905_p10, %p4901_p7 }
  0x52   : > { %4909 = shalt.err (!%p4906_p11)
}
  0x53   : > { %4643 = dma.hbm_to_vmem [thread:$0]  (!%p5125_p0), %s317_s13, 48, %s319_s9, %s307_s15  }
  0x54   : > { %333 = sbr.rel (%p5086_p6) target bundleno = 2193 (0x891), region = 48 }
  0x59   : > { %4970 = dma.done.wait (%p67_p1), [#allocation5], 512  }
  0x5a   : > { %4972 = vsyncadd (%p67_p1), [#allocation5], 4294966784  ;;  %s340_s27 = sand.u32 1, %s5073_s28   ;;  %s342_s14 = sand.u32 1, %s4995_s25  }
  0x5b   : > { %s4607_s19 = smul.u32 192, %s342_s14  ;;  %s341_s22 = scalar_lea.sflag [#allocation8], %s340_s27 }
  0x5d   : > { %s5213_s11 = scalar_lea.vmem [#allocation7], %s4607_s19 }
  0x5e   : > { %4974 = dma.done.wait (%p5082_p5), %s341_s22, 6144  }
  0x5f   : > { %4976 = vsyncadd (%p5082_p5), %s341_s22, 4294961152  ;;  %s5219_s30 = smul.u32 3, %s342_s14  ;;  %s5221_s23 = scalar_lea.vmem [#allocation9], %s4607_s19 }
  0x60   : > { %s361_s10 = scalar_lea.sflag [#allocation11], %s340_s27 }
  0x61   : > { %s364_s12 = scalar_lea.vmem [#allocation10], %s5219_s30 }
  0x62   : > { %4978 = dma.done.wait (%p5082_p5), %s361_s10, 48  }
  0x63   : > { %4980 = vsyncadd (%p5082_p5), %s361_s10, 4294967248 }
  0x64   : > { %4982 = dma.done.wait (%p67_p1), [#allocation11], 1024  }
  0x65   : > { %4984 = vsyncadd (%p67_p1), [#allocation11], 4294966272  ;;  %p409_p6 = scmp.lt.s32.totalorder %s5073_s28, 1  ;;  %416 = sbr.rel (%p3294_p4) target bundleno = 332 (0x14c), region = 72 }
  0x67   : > { %s410_s8 = scalar_select %p409_p6, %s5073_s28, 1 }
  0x69   : > { %s5237_s21 = scalar_lea.vmem %s5853_s4, %s410_s8 }
  0x6a   : > { %v4358_v0 = vld [vmem:[%s5213_s11 + $0xac] sm:$0xf]  ;;  %v3407_v1 = vld [vmem:[%s5213_s11 + $0xb4] sm:$0xf0]  ;;  %v3413_v2 = vld [vmem:[%s5213_s11 + $0xb0] sm:$0xf] }
  0x6b   : > { %v3410_v3 = vor.u32 %v4358_v0, %v3407_v1  ;;  %v4360_v4 = vld [vmem:[%s5213_s11 + $0xb8] sm:$0xf0]  ;;  %v4355_v5 = vld [vmem:[%s5213_s11 + $0x94] sm:$0xf]  ;;  %v3395_v6 = vld [vmem:[%s5213_s11 + $0x9c] sm:$0xf0] }
  0x6c   : > { %v3414_v7 = vor.u32 %v4360_v4, %v3413_v2  ;;  %v3401_v8 = vld [vmem:[%s5213_s11 + $0x98] sm:$0xf]  ;;  %v4357_v9 = vld [vmem:[%s5213_s11 + $0xa0] sm:$0xf0]  ;;  %v3405_v10 = vld [vmem:[%s5213_s11 + $0xa8] sm:$0xf]  ;;  %v3398_v11 = vor.u32 %v4355_v5, %v3395_v6 }
  0x6d   : > { %647 = vmatpush.bf16.msra.mxu1 %v3410_v3  ;;  %v4359_v12 = vld [vmem:[%s5213_s11 + $0xb0] sm:$0xf0]  ;;  %v3402_v13 = vor.u32 %v4357_v9, %v3401_v8  ;;  %v4352_v15 = vld [vmem:[%s5213_s11 + $0x7c] sm:$0xf]  ;;  %v3383_v16 = vld [vmem:[%s5213_s11 + $0x84] sm:$0xf0] }
  0x6e   : > { %676 = vmatpush.bf16.msra.mxu2 %v3414_v7  ;;  %v3406_v14 = vor.u32 %v4359_v12, %v3405_v10  ;;  %v3393_v17 = vld [vmem:[%s5213_s11 + $0x90] sm:$0xf]  ;;  %v3389_v18 = vld [vmem:[%s5213_s11 + $0x80] sm:$0xf]  ;;  %v4354_v19 = vld [vmem:[%s5213_s11 + $0x88] sm:$0xf0]  ;;  %v3386_v22 = vor.u32 %v4352_v15, %v3383_v16 }
  0x6f   : > { %v4356_v20 = vld [vmem:[%s5213_s11 + $0x98] sm:$0xf0]  ;;  %v3381_v23 = vld [vmem:[%s5213_s11 + $0x78] sm:$0xf]  ;;  %v4353_v24 = vld [vmem:[%s5213_s11 + $0x80] sm:$0xf0]  ;;  %v3390_v25 = vor.u32 %v4354_v19, %v3389_v18 }
  0x70   : > { %4585 = vmatpush.bf16.msra.mxu3 %v3406_v14  ;;  %v3394_v21 = vor.u32 %v4356_v20, %v3393_v17  ;;  %618 = vmatpush.bf16.msra.mxu0 %v3406_v14  ;;  %v4349_v26 = vld [vmem:[%s5213_s11 + $0x64] sm:$0xf]  ;;  %v3371_v27 = vld [vmem:[%s5213_s11 + $0x6c] sm:$0xf0]  ;;  %v3377_v28 = vld [vmem:[%s5213_s11 + $0x68] sm:$0xf]  ;;  %v3382_v30 = vor.u32 %v4353_v24, %v3381_v23 }
  0x71   : > { %648 = vmatpush.bf16.msra.mxu1 %v3398_v11  ;;  %v4351_v29 = vld [vmem:[%s5213_s11 + $0x70] sm:$0xf0]  ;;  %v3374_v31 = vor.u32 %v4349_v26, %v3371_v27  ;;  %v3369_v32 = vld [vmem:[%s5213_s11 + $0x60] sm:$0xf]  ;;  %v4350_v33 = vld [vmem:[%s5213_s11 + $0x68] sm:$0xf0] }
  0x72   : > { %677 = vmatpush.bf16.msra.mxu2 %v3402_v13  ;;  %v3378_v34 = vor.u32 %v4351_v29, %v3377_v28  ;;  %v4346_v35 = vld [vmem:[%s5213_s11 + $0x4c] sm:$0xf]  ;;  %v3359_v36 = vld [vmem:[%s5213_s11 + $0x54] sm:$0xf0]  ;;  %v3365_v37 = vld [vmem:[%s5213_s11 + $0x50] sm:$0xf]  ;;  %v3370_v39 = vor.u32 %v4350_v33, %v3369_v32 }
  0x73   : > { %v4348_v38 = vld [vmem:[%s5213_s11 + $0x58] sm:$0xf0]  ;;  %v3362_v40 = vor.u32 %v4346_v35, %v3359_v36  ;;  %v3357_v41 = vld [vmem:[%s5213_s11 + $0x48] sm:$0xf]  ;;  %v4347_v42 = vld [vmem:[%s5213_s11 + $0x50] sm:$0xf0] }
  0x74   : > { %4586 = vmatpush.bf16.msra.mxu3 %v3394_v21  ;;  %619 = vmatpush.bf16.msra.mxu0 %v3394_v21  ;;  %v3366_v43 = vor.u32 %v4348_v38, %v3365_v37  ;;  %v4343_v44 = vld [vmem:[%s5213_s11 + $0x34] sm:$0xf]  ;;  %v3347_v45 = vld [vmem:[%s5213_s11 + $0x3c] sm:$0xf0]  ;;  %v5011_v46 = vmov 0.0   ;;  %v3358_v49 = vor.u32 %v4347_v42, %v3357_v41  ;;  %v4334_v10 = vld [vmem:[#allocation4 + $0x8] sm:$0xff] }
  0x75   : > { %649 = vmatpush.bf16.msra.mxu1 %v3386_v22  ;;  %417 = vst [vmem:[#allocation13] sm:$0xff] %v5011_v46  ;;  %v3353_v47 = vld [vmem:[%s5213_s11 + $0x38] sm:$0xf]  ;;  %v4345_v48 = vld [vmem:[%s5213_s11 + $0x40] sm:$0xf0]  ;;  %v3350_v50 = vor.u32 %v4343_v44, %v3347_v45  ;;  %v4335_v11 = vld [vmem:[#allocation4 + $0x10] sm:$0xff] }
  0x76   : > { %678 = vmatpush.bf16.msra.mxu2 %v3390_v25  ;;  %v3345_v51 = vld [vmem:[%s5213_s11 + $0x30] sm:$0xf]  ;;  %v4344_v52 = vld [vmem:[%s5213_s11 + $0x38] sm:$0xf0]  ;;  %v3354_v53 = vor.u32 %v4345_v48, %v3353_v47  ;;  %v3335_v55 = vld [vmem:[%s5213_s11 + $0x24] sm:$0xf0] }
  0x77   : > { %v4340_v54 = vld [vmem:[%s5213_s11 + $0x1c] sm:$0xf]  ;;  %v3341_v56 = vld [vmem:[%s5213_s11 + $0x20] sm:$0xf]  ;;  %v4342_v57 = vld [vmem:[%s5213_s11 + $0x28] sm:$0xf0]  ;;  %v3346_v58 = vor.u32 %v4344_v52, %v3345_v51 }
  0x78   : > { %4587 = vmatpush.bf16.msra.mxu3 %v3382_v30  ;;  %620 = vmatpush.bf16.msra.mxu0 %v3382_v30  ;;  %v3338_v59 = vor.u32 %v4340_v54, %v3335_v55  ;;  %v3333_v60 = vld [vmem:[%s5213_s11 + $0x18] sm:$0xf]  ;;  %v4341_v61 = vld [vmem:[%s5213_s11 + $0x20] sm:$0xf0]  ;;  %v3342_v62 = vor.u32 %v4342_v57, %v3341_v56  ;;  %v3323_v0 = vld [vmem:[%s5213_s11 + $0xc] sm:$0xf0] }
  0x79   : > { %650 = vmatpush.bf16.msra.mxu1 %v3374_v31  ;;  %v4337_v63 = vld [vmem:[%s5213_s11 + $0x4] sm:$0xf]  ;;  %v3329_v1 = vld [vmem:[%s5213_s11 + $0x8] sm:$0xf]  ;;  %v4339_v2 = vld [vmem:[%s5213_s11 + $0x10] sm:$0xf0]  ;;  %v3334_v3 = vor.u32 %v4341_v61, %v3333_v60 }
  0x7a   : > { %679 = vmatpush.bf16.msra.mxu2 %v3378_v34  ;;  %v3326_v4 = vor.u32 %v4337_v63, %v3323_v0  ;;  %v3321_v5 = vld [vmem:[%s5213_s11] sm:$0xf]  ;;  %v4338_v6 = vld [vmem:[%s5213_s11 + $0x8] sm:$0xf0]  ;;  %v3330_v7 = vor.u32 %v4339_v2, %v3329_v1  ;;  %v4336_v12 = vld [vmem:[#allocation4 + $0x18] sm:$0xff] }
  0x7b   : > { %v4333_v8 = vld [vmem:[#allocation4] sm:$0xff]  ;;  %v3322_v9 = vor.u32 %v4338_v6, %v3321_v5 }
  0x7c   : > { %4588 = vmatpush.bf16.msra.mxu3 %v3370_v39  ;;  %621 = vmatpush.bf16.msra.mxu0 %v3370_v39  ;;  %v458_v13 = vld [vmem:[%s364_s12] sm:$0x7] }
  0x7d   : > { %651 = vmatpush.bf16.msra.mxu1 %v3362_v40  ;;  %v5291_v14 = vperm.slane %v458_v13, 1  ;;  %v5294_v17 = vperm.slane %v458_v13, 2  ;;  %v460_v18 = vperm.slane %v458_v13, 0 }
  0x7e   : > { %680 = vmatpush.bf16.msra.mxu2 %v3366_v43 }
  0x80   : > { %4589 = vmatpush.bf16.msra.mxu3 %v3358_v49  ;;  %622 = vmatpush.bf16.msra.mxu0 %v3358_v49 }
  0x81   : > { %652 = vmatpush.bf16.msra.mxu1 %v3350_v50 }
  0x82   : > { %681 = vmatpush.bf16.msra.mxu2 %v3354_v53 }
  0x84   : > { %4590 = vmatpush.bf16.msra.mxu3 %v3346_v58  ;;  %623 = vmatpush.bf16.msra.mxu0 %v3346_v58 }
  0x85   : > { %653 = vmatpush.bf16.msra.mxu1 %v3338_v59 }
  0x86   : > { %682 = vmatpush.bf16.msra.mxu2 %v3342_v62 }
  0x88   : > { %4591 = vmatpush.bf16.msra.mxu3 %v3334_v3  ;;  %624 = vmatpush.bf16.msra.mxu0 %v3334_v3 }
  0x89   : > { %654 = vmatpush.bf16.msra.mxu1 %v3326_v4 }
  0x8a   : > { %683 = vmatpush.bf16.msra.mxu2 %v3330_v7 }
  0x8c   : > { %655 = vmatmul.bf16.vlgmr.msra.gmra.mxu1 %v4333_v8  ;;  %4592 = vmatpush.bf16.msra.mxu3 %v3322_v9 }
  0x8d   : > { %684 = vmatmul.bf16.vlgmr.msra.gmra.mxu2 %v4333_v8  ;;  %625 = vmatpush.bf16.msra.mxu0 %v3322_v9 }
  0x8f   : > { %631 = vmatmul.bf16.vlgmr.msra.gmra.mxu3 %v4334_v10 }
  0x90   : > { %626 = vmatmul.bf16.vlgmr.msra.gmra.mxu0 %v4333_v8 }
  0x9c   : > { %660 = vmatmul.bf16.gmra.mxu1 %v4334_v10 }
  0x9d   : > { %689 = vmatmul.bf16.gmra.mxu2 %v4334_v10 }
  0x9f   : > { %636 = vmatmul.bf16.gmra.mxu3 %v4335_v11 }
  0xac   : > { %665 = vmatmul.bf16.gmra.mxu1 %v4335_v11 }
  0xad   : > { %694 = vmatmul.bf16.gmra.mxu2 %v4335_v11 }
  0xaf   : > { %641 = vmatmul.bf16.gmra.mxu3 %v4336_v12 }
  0xbc   : > { %670 = vmatmul.bf16.gmra.mxu1 %v4336_v12 }
  0xbd   : > { %699 = vmatmul.bf16.gmra.mxu2 %v4336_v12 }
 0x109   : > { %v656_v15 = vpop.f32.mrf.mxu1 }
 0x10a   : > { %v657_v16 = vadd.f32 %v656_v15, %v5291_v14 }
 0x10c   : > { %706 = vst [vmem:[#allocation3 + $0x18] sm:$0xff] %v657_v16 }
 0x10d   : > { %v627_v25 = vpop.f32.mrf.mxu0 }
 0x10e   : > { %v628_v26 = vadd.f32 %v627_v25, %v460_v18 }
 0x110   : > { %v685_v19 = vpop.f32.mrf.mxu2  ;;  %705 = vst [vmem:[#allocation3] sm:$0xff] %v628_v26 }
 0x111   : > { %v686_v20 = vadd.f32 %v685_v19, %v5294_v17  ;;  %v658_v21 = vpop.f32.mrf.mxu1 }
 0x112   : > { %v659_v22 = vadd.f32 %v658_v21, %v5291_v14  ;;  %v632_v23 = vpop.f32.mrf.mxu3 }
 0x113   : > { %707 = vst [vmem:[#allocation3 + $0x50] sm:$0xff] %v686_v20  ;;  %v633_v24 = vadd.f32 %v632_v23, %v460_v18 }
 0x114   : > { %709 = vst [vmem:[#allocation3 + $0xb8] sm:$0xff] %v659_v22 }
 0x115   : > { %711 = vst [vmem:[#allocation3 + $0x30] sm:$0xff] %v633_v24  ;;  %v629_v33 = vpop.f32.mrf.mxu0 }
 0x116   : > { %v630_v34 = vadd.f32 %v629_v33, %v460_v18 }
 0x118   : > { %v687_v27 = vpop.f32.mrf.mxu2  ;;  %708 = vst [vmem:[#allocation3 + $0x58] sm:$0xff] %v630_v34 }
 0x119   : > { %v688_v28 = vadd.f32 %v687_v27, %v5294_v17  ;;  %v661_v29 = vpop.f32.mrf.mxu1 }
 0x11a   : > { %v662_v30 = vadd.f32 %v661_v29, %v5291_v14  ;;  %v634_v31 = vpop.f32.mrf.mxu3 }
 0x11b   : > { %710 = vst [vmem:[#allocation3 + $0x88] sm:$0xff] %v688_v28  ;;  %v635_v32 = vadd.f32 %v634_v31, %v460_v18 }
 0x11c   : > { %712 = vst [vmem:[#allocation3 + $0x78] sm:$0xff] %v662_v30 }
 0x11d   : > { %714 = vst [vmem:[#allocation3 + $0x10] sm:$0xff] %v635_v32 }
 0x120   : > { %v690_v35 = vpop.f32.mrf.mxu2 }
 0x121   : > { %v691_v36 = vadd.f32 %v690_v35, %v5294_v17  ;;  %v663_v37 = vpop.f32.mrf.mxu1 }
 0x122   : > { %v664_v38 = vadd.f32 %v663_v37, %v5291_v14  ;;  %v637_v39 = vpop.f32.mrf.mxu3 }
 0x123   : > { %713 = vst [vmem:[#allocation3 + $0x40] sm:$0xff] %v691_v36  ;;  %v638_v40 = vadd.f32 %v637_v39, %v460_v18 }
 0x124   : > { %715 = vst [vmem:[#allocation3 + $0x80] sm:$0xff] %v664_v38 }
 0x125   : > { %717 = vst [vmem:[#allocation3 + $0x90] sm:$0xff] %v638_v40 }
 0x128   : > { %v692_v41 = vpop.f32.mrf.mxu2 }
 0x129   : > { %v693_v42 = vadd.f32 %v692_v41, %v5294_v17  ;;  %v666_v43 = vpop.f32.mrf.mxu1 }
 0x12a   : > { %v667_v44 = vadd.f32 %v666_v43, %v5291_v14  ;;  %v639_v45 = vpop.f32.mrf.mxu3 }
 0x12b   : > { %716 = vst [vmem:[#allocation3 + $0x48] sm:$0xff] %v693_v42  ;;  %v640_v46 = vadd.f32 %v639_v45, %v460_v18 }
 0x12c   : > { %718 = vst [vmem:[#allocation3 + $0xa8] sm:$0xff] %v667_v44 }
 0x12d   : > { %720 = vst [vmem:[#allocation3 + $0x38] sm:$0xff] %v640_v46 }
 0x130   : > { %v695_v47 = vpop.f32.mrf.mxu2 }
 0x131   : > { %v696_v48 = vadd.f32 %v695_v47, %v5294_v17  ;;  %v668_v49 = vpop.f32.mrf.mxu1 }
 0x132   : > { %v669_v50 = vadd.f32 %v668_v49, %v5291_v14  ;;  %v642_v51 = vpop.f32.mrf.mxu3 }
 0x133   : > { %719 = vst [vmem:[#allocation3 + $0x8] sm:$0xff] %v696_v48  ;;  %v643_v52 = vadd.f32 %v642_v51, %v460_v18 }
 0x134   : > { %721 = vst [vmem:[#allocation3 + $0x60] sm:$0xff] %v669_v50 }
 0x135   : > { %723 = vst [vmem:[#allocation3 + $0x28] sm:$0xff] %v643_v52 }
 0x138   : > { %v697_v53 = vpop.f32.mrf.mxu2 }
 0x139   : > { %v698_v54 = vadd.f32 %v697_v53, %v5294_v17  ;;  %v671_v55 = vpop.f32.mrf.mxu1 }
 0x13a   : > { %v672_v56 = vadd.f32 %v671_v55, %v5291_v14  ;;  %v644_v57 = vpop.f32.mrf.mxu3 }
 0x13b   : > { %722 = vst [vmem:[#allocation3 + $0x70] sm:$0xff] %v698_v54  ;;  %v645_v58 = vadd.f32 %v644_v57, %v460_v18 }
 0x13c   : > { %724 = vst [vmem:[#allocation3 + $0xa0] sm:$0xff] %v672_v56 }
 0x13d   : > { %726 = vst [vmem:[#allocation3 + $0x98] sm:$0xff] %v645_v58 }
 0x140   : > { %v700_v59 = vpop.f32.mrf.mxu2 }
 0x141   : > { %v701_v60 = vadd.f32 %v700_v59, %v5294_v17  ;;  %v673_v61 = vpop.f32.mrf.mxu1 }
 0x142   : > { %v674_v62 = vadd.f32 %v673_v61, %v5291_v14 }
 0x143   : > { %725 = vst [vmem:[#allocation3 + $0x68] sm:$0xff] %v701_v60 }
 0x144   : > { %727 = vst [vmem:[#allocation3 + $0xb0] sm:$0xff] %v674_v62 }
 0x148   : > { %v702_v63 = vpop.f32.mrf.mxu2 }
 0x149   : > { %v703_v0 = vadd.f32 %v702_v63, %v5294_v17 }
 0x14b   : > { %728 = vst [vmem:[#allocation3 + $0x20] sm:$0xff] %v703_v0 }
 0x14c PF: > { %p3415_p1 = scmp.le.s32.totalorder %s5073_s28, 0 }
 0x14e   : > { %732 = sbr.rel (%p3415_p1) target bundleno = 565 (0x235), region = 76 }
 0x153   : > { %v4382_v1 = vld [vmem:[%s5213_s11 + $0xac] sm:$0xf]  ;;  %v3504_v2 = vld [vmem:[%s5213_s11 + $0xb4] sm:$0xf0]  ;;  %v3510_v3 = vld [vmem:[%s5213_s11 + $0xb0] sm:$0xf] }
 0x154   : > { %v3507_v4 = vor.u32 %v4382_v1, %v3504_v2  ;;  %v4384_v5 = vld [vmem:[%s5213_s11 + $0xb8] sm:$0xf0]  ;;  %v4379_v6 = vld [vmem:[%s5213_s11 + $0x94] sm:$0xf]  ;;  %v3492_v7 = vld [vmem:[%s5213_s11 + $0x9c] sm:$0xf0] }
 0x155   : > { %v3511_v8 = vor.u32 %v4384_v5, %v3510_v3  ;;  %v3498_v9 = vld [vmem:[%s5213_s11 + $0x98] sm:$0xf]  ;;  %v4381_v10 = vld [vmem:[%s5213_s11 + $0xa0] sm:$0xf0]  ;;  %v3502_v11 = vld [vmem:[%s5213_s11 + $0xa8] sm:$0xf]  ;;  %v3495_v12 = vor.u32 %v4379_v6, %v3492_v7 }
 0x156   : > { %942 = vmatpush.bf16.msra.mxu1 %v3507_v4  ;;  %v4383_v13 = vld [vmem:[%s5213_s11 + $0xb0] sm:$0xf0]  ;;  %v3499_v14 = vor.u32 %v4381_v10, %v3498_v9  ;;  %v4376_v16 = vld [vmem:[%s5213_s11 + $0x7c] sm:$0xf]  ;;  %v3480_v17 = vld [vmem:[%s5213_s11 + $0x84] sm:$0xf0] }
 0x157   : > { %971 = vmatpush.bf16.msra.mxu2 %v3511_v8  ;;  %v3503_v15 = vor.u32 %v4383_v13, %v3502_v11  ;;  %v3490_v18 = vld [vmem:[%s5213_s11 + $0x90] sm:$0xf]  ;;  %v3486_v19 = vld [vmem:[%s5213_s11 + $0x80] sm:$0xf]  ;;  %v4378_v20 = vld [vmem:[%s5213_s11 + $0x88] sm:$0xf0]  ;;  %v3483_v23 = vor.u32 %v4376_v16, %v3480_v17 }
 0x158   : > { %v4380_v21 = vld [vmem:[%s5213_s11 + $0x98] sm:$0xf0]  ;;  %v3478_v24 = vld [vmem:[%s5213_s11 + $0x78] sm:$0xf]  ;;  %v4377_v25 = vld [vmem:[%s5213_s11 + $0x80] sm:$0xf0]  ;;  %v3487_v26 = vor.u32 %v4378_v20, %v3486_v19 }
 0x159   : > { %4593 = vmatpush.bf16.msra.mxu3 %v3503_v15  ;;  %v3491_v22 = vor.u32 %v4380_v21, %v3490_v18  ;;  %913 = vmatpush.bf16.msra.mxu0 %v3503_v15  ;;  %v4373_v27 = vld [vmem:[%s5213_s11 + $0x64] sm:$0xf]  ;;  %v3468_v28 = vld [vmem:[%s5213_s11 + $0x6c] sm:$0xf0]  ;;  %v3474_v29 = vld [vmem:[%s5213_s11 + $0x68] sm:$0xf]  ;;  %v3479_v31 = vor.u32 %v4377_v25, %v3478_v24 }
 0x15a   : > { %943 = vmatpush.bf16.msra.mxu1 %v3495_v12  ;;  %v4375_v30 = vld [vmem:[%s5213_s11 + $0x70] sm:$0xf0]  ;;  %v3471_v32 = vor.u32 %v4373_v27, %v3468_v28  ;;  %v3466_v33 = vld [vmem:[%s5213_s11 + $0x60] sm:$0xf]  ;;  %v4374_v34 = vld [vmem:[%s5213_s11 + $0x68] sm:$0xf0] }
 0x15b   : > { %972 = vmatpush.bf16.msra.mxu2 %v3499_v14  ;;  %v3475_v35 = vor.u32 %v4375_v30, %v3474_v29  ;;  %v4370_v36 = vld [vmem:[%s5213_s11 + $0x4c] sm:$0xf]  ;;  %v3456_v37 = vld [vmem:[%s5213_s11 + $0x54] sm:$0xf0]  ;;  %v3462_v38 = vld [vmem:[%s5213_s11 + $0x50] sm:$0xf]  ;;  %v3467_v40 = vor.u32 %v4374_v34, %v3466_v33 }
 0x15c   : > { %v4372_v39 = vld [vmem:[%s5213_s11 + $0x58] sm:$0xf0]  ;;  %v3459_v41 = vor.u32 %v4370_v36, %v3456_v37  ;;  %v3454_v42 = vld [vmem:[%s5213_s11 + $0x48] sm:$0xf]  ;;  %v4371_v43 = vld [vmem:[%s5213_s11 + $0x50] sm:$0xf0] }
 0x15d   : > { %4594 = vmatpush.bf16.msra.mxu3 %v3491_v22  ;;  %914 = vmatpush.bf16.msra.mxu0 %v3491_v22  ;;  %v3463_v44 = vor.u32 %v4372_v39, %v3462_v38  ;;  %v4367_v45 = vld [vmem:[%s5213_s11 + $0x34] sm:$0xf]  ;;  %v3444_v46 = vld [vmem:[%s5213_s11 + $0x3c] sm:$0xf0]  ;;  %v3450_v47 = vld [vmem:[%s5213_s11 + $0x38] sm:$0xf]  ;;  %v3455_v49 = vor.u32 %v4371_v43, %v3454_v42 }
 0x15e   : > { %944 = vmatpush.bf16.msra.mxu1 %v3483_v23  ;;  %v4369_v48 = vld [vmem:[%s5213_s11 + $0x40] sm:$0xf0]  ;;  %v3447_v50 = vor.u32 %v4367_v45, %v3444_v46  ;;  %v3442_v51 = vld [vmem:[%s5213_s11 + $0x30] sm:$0xf]  ;;  %v4368_v52 = vld [vmem:[%s5213_s11 + $0x38] sm:$0xf0] }
 0x15f   : > { %973 = vmatpush.bf16.msra.mxu2 %v3487_v26  ;;  %v3451_v53 = vor.u32 %v4369_v48, %v3450_v47  ;;  %v4364_v54 = vld [vmem:[%s5213_s11 + $0x1c] sm:$0xf]  ;;  %v3432_v55 = vld [vmem:[%s5213_s11 + $0x24] sm:$0xf0]  ;;  %v3438_v56 = vld [vmem:[%s5213_s11 + $0x20] sm:$0xf]  ;;  %v3443_v58 = vor.u32 %v4368_v52, %v3442_v51 }
 0x160   : > { %v4366_v57 = vld [vmem:[%s5213_s11 + $0x28] sm:$0xf0]  ;;  %v3435_v59 = vor.u32 %v4364_v54, %v3432_v55  ;;  %v3430_v60 = vld [vmem:[%s5213_s11 + $0x18] sm:$0xf]  ;;  %v4365_v61 = vld [vmem:[%s5213_s11 + $0x20] sm:$0xf0] }
 0x161   : > { %4595 = vmatpush.bf16.msra.mxu3 %v3479_v31  ;;  %915 = vmatpush.bf16.msra.mxu0 %v3479_v31  ;;  %v3439_v62 = vor.u32 %v4366_v57, %v3438_v56  ;;  %v4361_v63 = vld [vmem:[%s5213_s11 + $0x4] sm:$0xf]  ;;  %v3420_v0 = vld [vmem:[%s5213_s11 + $0xc] sm:$0xf0]  ;;  %v3426_v1 = vld [vmem:[%s5213_s11 + $0x8] sm:$0xf]  ;;  %v3431_v4 = vor.u32 %v4365_v61, %v3430_v60 }
 0x162   : > { %945 = vmatpush.bf16.msra.mxu1 %v3471_v32  ;;  %v4363_v2 = vld [vmem:[%s5213_s11 + $0x10] sm:$0xf0]  ;;  %v3423_v5 = vor.u32 %v4361_v63, %v3420_v0  ;;  %v734_v6 = vld [vmem:[#allocation2] sm:$0xff]  ;;  %v4362_v8 = vld [vmem:[%s5213_s11 + $0x8] sm:$0xf0] }
 0x163   : > { %974 = vmatpush.bf16.msra.mxu2 %v3475_v35  ;;  %v733_v3 = vld [vmem:[#allocation2 + $0x30] sm:$0xff]  ;;  %v3418_v7 = vld [vmem:[%s5213_s11] sm:$0xf]  ;;  %v3427_v9 = vor.u32 %v4363_v2, %v3426_v1  ;;  %v735_v12 = vld [vmem:[#allocation2 + $0x18] sm:$0xff] }
 0x164   : > { %v741_v10 = vpack.c.bf16 %v734_v6, %v733_v3  ;;  %v3419_v11 = vor.u32 %v4362_v8, %v3418_v7  ;;  %v736_v13 = vld [vmem:[#allocation2 + $0x10] sm:$0xff]  ;;  %v737_v15 = vld [vmem:[#allocation2 + $0x8] sm:$0xff]  ;;  %v738_v16 = vld [vmem:[#allocation2 + $0x20] sm:$0xff] }
 0x165   : > { %4596 = vmatpush.bf16.msra.mxu3 %v3467_v40  ;;  %916 = vmatpush.bf16.msra.mxu0 %v3467_v40  ;;  %v742_v14 = vpack.c.bf16 %v736_v13, %v735_v12  ;;  %v743_v17 = vpack.c.bf16 %v738_v16, %v737_v15  ;;  %v739_v18 = vld [vmem:[#allocation2 + $0x28] sm:$0xff]  ;;  %v740_v19 = vld [vmem:[#allocation2 + $0x38] sm:$0xff]  ;;  %v777_v21 = vld [vmem:[%s364_s12] sm:$0x7] }
 0x166   : > { %946 = vmatpush.bf16.msra.mxu1 %v3459_v41  ;;  %v744_v20 = vpack.c.bf16 %v740_v19, %v739_v18  ;;  %v5362_v22 = vperm.slane %v777_v21, 1  ;;  %v5365_v25 = vperm.slane %v777_v21, 2  ;;  %v779_v26 = vperm.slane %v777_v21, 0 }
 0x167   : > { %975 = vmatpush.bf16.msra.mxu2 %v3463_v44 }
 0x169   : > { %4597 = vmatpush.bf16.msra.mxu3 %v3455_v49  ;;  %917 = vmatpush.bf16.msra.mxu0 %v3455_v49 }
 0x16a   : > { %947 = vmatpush.bf16.msra.mxu1 %v3447_v50 }
 0x16b   : > { %976 = vmatpush.bf16.msra.mxu2 %v3451_v53 }
 0x16d   : > { %4598 = vmatpush.bf16.msra.mxu3 %v3443_v58  ;;  %918 = vmatpush.bf16.msra.mxu0 %v3443_v58 }
 0x16e   : > { %948 = vmatpush.bf16.msra.mxu1 %v3435_v59 }
 0x16f   : > { %977 = vmatpush.bf16.msra.mxu2 %v3439_v62 }
 0x171   : > { %4599 = vmatpush.bf16.msra.mxu3 %v3431_v4  ;;  %919 = vmatpush.bf16.msra.mxu0 %v3431_v4 }
 0x172   : > { %949 = vmatpush.bf16.msra.mxu1 %v3423_v5 }
 0x173   : > { %978 = vmatpush.bf16.msra.mxu2 %v3427_v9 }
 0x175   : > { %950 = vmatmul.bf16.vlgmr.msra.gmra.mxu1 %v741_v10  ;;  %4600 = vmatpush.bf16.msra.mxu3 %v3419_v11 }
 0x176   : > { %979 = vmatmul.bf16.vlgmr.msra.gmra.mxu2 %v741_v10  ;;  %920 = vmatpush.bf16.msra.mxu0 %v3419_v11 }
 0x178   : > { %926 = vmatmul.bf16.vlgmr.msra.gmra.mxu3 %v742_v14 }
 0x179   : > { %921 = vmatmul.bf16.vlgmr.msra.gmra.mxu0 %v741_v10 }
 0x185   : > { %955 = vmatmul.bf16.gmra.mxu1 %v742_v14 }
 0x186   : > { %984 = vmatmul.bf16.gmra.mxu2 %v742_v14 }
 0x188   : > { %931 = vmatmul.bf16.gmra.mxu3 %v743_v17 }
 0x195   : > { %960 = vmatmul.bf16.gmra.mxu1 %v743_v17 }
 0x196   : > { %989 = vmatmul.bf16.gmra.mxu2 %v743_v17 }
 0x198   : > { %936 = vmatmul.bf16.gmra.mxu3 %v744_v20 }
 0x1a5   : > { %965 = vmatmul.bf16.gmra.mxu1 %v744_v20 }
 0x1a6   : > { %994 = vmatmul.bf16.gmra.mxu2 %v744_v20 }
 0x1f2   : > { %v951_v23 = vpop.f32.mrf.mxu1 }
 0x1f3   : > { %v952_v24 = vadd.f32 %v951_v23, %v5362_v22 }
 0x1f5   : > { %1001 = vst [vmem:[#allocation3 + $0x18] sm:$0xff] %v952_v24 }
 0x1f6   : > { %v922_v33 = vpop.f32.mrf.mxu0 }
 0x1f7   : > { %v923_v34 = vadd.f32 %v922_v33, %v779_v26 }
 0x1f9   : > { %v980_v27 = vpop.f32.mrf.mxu2  ;;  %1000 = vst [vmem:[#allocation3] sm:$0xff] %v923_v34 }
 0x1fa   : > { %v981_v28 = vadd.f32 %v980_v27, %v5365_v25  ;;  %v953_v29 = vpop.f32.mrf.mxu1 }
 0x1fb   : > { %v954_v30 = vadd.f32 %v953_v29, %v5362_v22  ;;  %v927_v31 = vpop.f32.mrf.mxu3 }
 0x1fc   : > { %1002 = vst [vmem:[#allocation3 + $0x50] sm:$0xff] %v981_v28  ;;  %v928_v32 = vadd.f32 %v927_v31, %v779_v26 }
 0x1fd   : > { %1004 = vst [vmem:[#allocation3 + $0xb8] sm:$0xff] %v954_v30 }
 0x1fe   : > { %1006 = vst [vmem:[#allocation3 + $0x30] sm:$0xff] %v928_v32  ;;  %v924_v41 = vpop.f32.mrf.mxu0 }
 0x1ff   : > { %v925_v42 = vadd.f32 %v924_v41, %v779_v26 }
 0x201   : > { %v982_v35 = vpop.f32.mrf.mxu2  ;;  %1003 = vst [vmem:[#allocation3 + $0x58] sm:$0xff] %v925_v42 }
 0x202   : > { %v983_v36 = vadd.f32 %v982_v35, %v5365_v25  ;;  %v956_v37 = vpop.f32.mrf.mxu1 }
 0x203   : > { %v957_v38 = vadd.f32 %v956_v37, %v5362_v22  ;;  %v929_v39 = vpop.f32.mrf.mxu3 }
 0x204   : > { %1005 = vst [vmem:[#allocation3 + $0x88] sm:$0xff] %v983_v36  ;;  %v930_v40 = vadd.f32 %v929_v39, %v779_v26 }
 0x205   : > { %1007 = vst [vmem:[#allocation3 + $0x78] sm:$0xff] %v957_v38 }
 0x206   : > { %1009 = vst [vmem:[#allocation3 + $0x10] sm:$0xff] %v930_v40 }
 0x209   : > { %v985_v43 = vpop.f32.mrf.mxu2 }
 0x20a   : > { %v986_v44 = vadd.f32 %v985_v43, %v5365_v25  ;;  %v958_v45 = vpop.f32.mrf.mxu1 }
 0x20b   : > { %v959_v46 = vadd.f32 %v958_v45, %v5362_v22  ;;  %v932_v47 = vpop.f32.mrf.mxu3 }
 0x20c   : > { %1008 = vst [vmem:[#allocation3 + $0x40] sm:$0xff] %v986_v44  ;;  %v933_v48 = vadd.f32 %v932_v47, %v779_v26 }
 0x20d   : > { %1010 = vst [vmem:[#allocation3 + $0x80] sm:$0xff] %v959_v46 }
 0x20e   : > { %1012 = vst [vmem:[#allocation3 + $0x90] sm:$0xff] %v933_v48 }
 0x211   : > { %v987_v49 = vpop.f32.mrf.mxu2 }
 0x212   : > { %v988_v50 = vadd.f32 %v987_v49, %v5365_v25  ;;  %v961_v51 = vpop.f32.mrf.mxu1 }
 0x213   : > { %v962_v52 = vadd.f32 %v961_v51, %v5362_v22  ;;  %v934_v53 = vpop.f32.mrf.mxu3 }
 0x214   : > { %1011 = vst [vmem:[#allocation3 + $0x48] sm:$0xff] %v988_v50  ;;  %v935_v54 = vadd.f32 %v934_v53, %v779_v26 }
 0x215   : > { %1013 = vst [vmem:[#allocation3 + $0xa8] sm:$0xff] %v962_v52 }
 0x216   : > { %1015 = vst [vmem:[#allocation3 + $0x38] sm:$0xff] %v935_v54 }
 0x219   : > { %v990_v55 = vpop.f32.mrf.mxu2 }
 0x21a   : > { %v991_v56 = vadd.f32 %v990_v55, %v5365_v25  ;;  %v963_v57 = vpop.f32.mrf.mxu1 }
 0x21b   : > { %v964_v58 = vadd.f32 %v963_v57, %v5362_v22  ;;  %v937_v59 = vpop.f32.mrf.mxu3 }
 0x21c   : > { %1014 = vst [vmem:[#allocation3 + $0x8] sm:$0xff] %v991_v56  ;;  %v938_v60 = vadd.f32 %v937_v59, %v779_v26 }
 0x21d   : > { %1016 = vst [vmem:[#allocation3 + $0x60] sm:$0xff] %v964_v58 }
 0x21e   : > { %1018 = vst [vmem:[#allocation3 + $0x28] sm:$0xff] %v938_v60 }
 0x221   : > { %v992_v61 = vpop.f32.mrf.mxu2 }
 0x222   : > { %v993_v62 = vadd.f32 %v992_v61, %v5365_v25  ;;  %v966_v63 = vpop.f32.mrf.mxu1 }
 0x223   : > { %v967_v0 = vadd.f32 %v966_v63, %v5362_v22  ;;  %v939_v1 = vpop.f32.mrf.mxu3 }
 0x224   : > { %1017 = vst [vmem:[#allocation3 + $0x70] sm:$0xff] %v993_v62  ;;  %v940_v2 = vadd.f32 %v939_v1, %v779_v26 }
 0x225   : > { %1019 = vst [vmem:[#allocation3 + $0xa0] sm:$0xff] %v967_v0 }
 0x226   : > { %1021 = vst [vmem:[#allocation3 + $0x98] sm:$0xff] %v940_v2 }
 0x229   : > { %v995_v3 = vpop.f32.mrf.mxu2 }
 0x22a   : > { %v996_v4 = vadd.f32 %v995_v3, %v5365_v25  ;;  %v968_v5 = vpop.f32.mrf.mxu1 }
 0x22b   : > { %v969_v6 = vadd.f32 %v968_v5, %v5362_v22 }
 0x22c   : > { %1020 = vst [vmem:[#allocation3 + $0x68] sm:$0xff] %v996_v4 }
 0x22d   : > { %1022 = vst [vmem:[#allocation3 + $0xb0] sm:$0xff] %v969_v6 }
 0x231   : > { %v997_v7 = vpop.f32.mrf.mxu2 }
 0x232   : > { %v998_v8 = vadd.f32 %v997_v7, %v5365_v25 }
 0x234   : > { %1023 = vst [vmem:[#allocation3 + $0x20] sm:$0xff] %v998_v8 }
 0x235 PF: > { %v3598_v9 = vld [vmem:[%s5221_s23 + $0xa8] sm:$0xf]  ;;  %v4407_v10 = vld [vmem:[%s5221_s23 + $0xb0] sm:$0xf0]  ;;  %v4406_v11 = vld [vmem:[%s5221_s23 + $0xac] sm:$0xf] }
 0x236   : > { %v3599_v12 = vor.u32 %v4407_v10, %v3598_v9  ;;  %v3600_v13 = vld [vmem:[%s5221_s23 + $0xb4] sm:$0xf0]  ;;  %v3586_v14 = vld [vmem:[%s5221_s23 + $0x90] sm:$0xf]  ;;  %v4404_v15 = vld [vmem:[%s5221_s23 + $0x98] sm:$0xf0] }
 0x237   : > { %v3603_v16 = vor.u32 %v4406_v11, %v3600_v13  ;;  %v4403_v17 = vld [vmem:[%s5221_s23 + $0x94] sm:$0xf]  ;;  %v3588_v18 = vld [vmem:[%s5221_s23 + $0x9c] sm:$0xf0]  ;;  %v3587_v19 = vor.u32 %v4404_v15, %v3586_v14  ;;  %v3574_v21 = vld [vmem:[%s5221_s23 + $0x78] sm:$0xf] }
 0x238   : > { %1188 = vmatpush.bf16.msra.mxu0 %v3599_v12  ;;  %v3591_v20 = vor.u32 %v4403_v17, %v3588_v18  ;;  %v4401_v22 = vld [vmem:[%s5221_s23 + $0x80] sm:$0xf0]  ;;  %v4400_v23 = vld [vmem:[%s5221_s23 + $0x7c] sm:$0xf]  ;;  %v3576_v24 = vld [vmem:[%s5221_s23 + $0x84] sm:$0xf0] }
 0x239   : > { %1201 = vmatpush.bf16.msra.mxu1 %v3603_v16  ;;  %v3606_v25 = vld [vmem:[%s5221_s23 + $0xb0] sm:$0xf]  ;;  %v4408_v26 = vld [vmem:[%s5221_s23 + $0xb8] sm:$0xf0]  ;;  %v3575_v28 = vor.u32 %v4401_v22, %v3574_v21  ;;  %v3594_v29 = vld [vmem:[%s5221_s23 + $0x98] sm:$0xf]  ;;  %v3579_v31 = vor.u32 %v4400_v23, %v3576_v24 }
 0x23a   : > { %v3607_v27 = vor.u32 %v4408_v26, %v3606_v25  ;;  %v4405_v30 = vld [vmem:[%s5221_s23 + $0xa0] sm:$0xf0]  ;;  %v3562_v32 = vld [vmem:[%s5221_s23 + $0x60] sm:$0xf]  ;;  %v4398_v33 = vld [vmem:[%s5221_s23 + $0x68] sm:$0xf0] }
 0x23b   : > { %v4397_v34 = vld [vmem:[%s5221_s23 + $0x64] sm:$0xf]  ;;  %v3595_v35 = vor.u32 %v4405_v30, %v3594_v29  ;;  %v3564_v36 = vld [vmem:[%s5221_s23 + $0x6c] sm:$0xf0]  ;;  %v3582_v37 = vld [vmem:[%s5221_s23 + $0x80] sm:$0xf]  ;;  %v3563_v39 = vor.u32 %v4398_v33, %v3562_v32 }
 0x23c   : > { %1189 = vmatpush.bf16.msra.mxu0 %v3587_v19  ;;  %1214 = vmatpush.bf16.msra.mxu2 %v3607_v27  ;;  %v4402_v38 = vld [vmem:[%s5221_s23 + $0x88] sm:$0xf0]  ;;  %v3567_v40 = vor.u32 %v4397_v34, %v3564_v36  ;;  %v3550_v41 = vld [vmem:[%s5221_s23 + $0x48] sm:$0xf]  ;;  %v4395_v42 = vld [vmem:[%s5221_s23 + $0x50] sm:$0xf0] }
 0x23d   : > { %1202 = vmatpush.bf16.msra.mxu1 %v3591_v20  ;;  %v4394_v43 = vld [vmem:[%s5221_s23 + $0x4c] sm:$0xf]  ;;  %v3583_v44 = vor.u32 %v4402_v38, %v3582_v37  ;;  %v3552_v45 = vld [vmem:[%s5221_s23 + $0x54] sm:$0xf0]  ;;  %v3570_v46 = vld [vmem:[%s5221_s23 + $0x68] sm:$0xf]  ;;  %v3551_v48 = vor.u32 %v4395_v42, %v3550_v41 }
 0x23e   : > { %v4399_v47 = vld [vmem:[%s5221_s23 + $0x70] sm:$0xf0]  ;;  %v3538_v49 = vld [vmem:[%s5221_s23 + $0x30] sm:$0xf]  ;;  %v3555_v50 = vor.u32 %v4394_v43, %v3552_v45  ;;  %v4392_v51 = vld [vmem:[%s5221_s23 + $0x38] sm:$0xf0] }
 0x23f   : > { %v4391_v52 = vld [vmem:[%s5221_s23 + $0x34] sm:$0xf]  ;;  %v3571_v53 = vor.u32 %v4399_v47, %v3570_v46  ;;  %v3540_v54 = vld [vmem:[%s5221_s23 + $0x3c] sm:$0xf0]  ;;  %v3558_v55 = vld [vmem:[%s5221_s23 + $0x50] sm:$0xf]  ;;  %v3539_v57 = vor.u32 %v4392_v51, %v3538_v49 }
 0x240   : > { %1190 = vmatpush.bf16.msra.mxu0 %v3575_v28  ;;  %1215 = vmatpush.bf16.msra.mxu2 %v3595_v35  ;;  %v4396_v56 = vld [vmem:[%s5221_s23 + $0x58] sm:$0xf0]  ;;  %v3543_v58 = vor.u32 %v4391_v52, %v3540_v54  ;;  %v3526_v59 = vld [vmem:[%s5221_s23 + $0x18] sm:$0xf]  ;;  %v4389_v60 = vld [vmem:[%s5221_s23 + $0x20] sm:$0xf0] }
 0x241   : > { %1203 = vmatpush.bf16.msra.mxu1 %v3579_v31  ;;  %v4388_v61 = vld [vmem:[%s5221_s23 + $0x1c] sm:$0xf]  ;;  %v3559_v62 = vor.u32 %v4396_v56, %v3558_v55  ;;  %v3528_v63 = vld [vmem:[%s5221_s23 + $0x24] sm:$0xf0]  ;;  %v3546_v0 = vld [vmem:[%s5221_s23 + $0x38] sm:$0xf]  ;;  %v3527_v2 = vor.u32 %v4389_v60, %v3526_v59 }
 0x242   : > { %v4393_v1 = vld [vmem:[%s5221_s23 + $0x40] sm:$0xf0]  ;;  %v3531_v3 = vor.u32 %v4388_v61, %v3528_v63  ;;  %v3514_v4 = vld [vmem:[%s5221_s23] sm:$0xf]  ;;  %v4386_v5 = vld [vmem:[%s5221_s23 + $0x8] sm:$0xf0] }
 0x243   : > { %v4385_v6 = vld [vmem:[%s5221_s23 + $0x4] sm:$0xf]  ;;  %v3547_v7 = vor.u32 %v4393_v1, %v3546_v0  ;;  %v3516_v8 = vld [vmem:[%s5221_s23 + $0xc] sm:$0xf0]  ;;  %v3534_v9 = vld [vmem:[%s5221_s23 + $0x20] sm:$0xf]  ;;  %v3515_v11 = vor.u32 %v4386_v5, %v3514_v4 }
 0x244   : > { %1191 = vmatpush.bf16.msra.mxu0 %v3563_v39  ;;  %1216 = vmatpush.bf16.msra.mxu2 %v3583_v44  ;;  %v4390_v10 = vld [vmem:[%s5221_s23 + $0x28] sm:$0xf0]  ;;  %v3519_v12 = vor.u32 %v4385_v6, %v3516_v8  ;;  %v3522_v14 = vld [vmem:[%s5221_s23 + $0x8] sm:$0xf]  ;;  %v4387_v15 = vld [vmem:[%s5221_s23 + $0x10] sm:$0xf0] }
 0x245   : > { %1204 = vmatpush.bf16.msra.mxu1 %v3567_v40  ;;  %v3535_v13 = vor.u32 %v4390_v10, %v3534_v9  ;;  %v3523_v16 = vor.u32 %v4387_v15, %v3522_v14  ;;  %v5012_v17 = vmov 0   ;;  %v3696_v18 = vld [vmem:[%s5221_s23 + $0xa8] sm:$0xf]  ;;  %v4431_v19 = vld [vmem:[%s5221_s23 + $0xb0] sm:$0xf0]  ;;  %v1230_v44 = vld [vmem:[#allocation3] sm:$0xff] }
 0x246   : > { %v4430_v20 = vld [vmem:[%s5221_s23 + $0xac] sm:$0xf]  ;;  %v3697_v21 = vor.u32 %v4431_v19, %v3696_v18  ;;  %v3698_v22 = vld [vmem:[%s5221_s23 + $0xb4] sm:$0xf0]  ;;  %v3704_v23 = vld [vmem:[%s5221_s23 + $0xb0] sm:$0xf] }
 0x247   : > { %v4432_v24 = vld [vmem:[%s5221_s23 + $0xb8] sm:$0xf0]  ;;  %v3701_v25 = vor.u32 %v4430_v20, %v3698_v22  ;;  %v3684_v27 = vld [vmem:[%s5221_s23 + $0x90] sm:$0xf]  ;;  %v4427_v29 = vld [vmem:[%s5221_s23 + $0x94] sm:$0xf] }
 0x248   : > { %1192 = vmatpush.bf16.msra.mxu0 %v3551_v48  ;;  %1217 = vmatpush.bf16.msra.mxu2 %v3571_v53  ;;  %v3705_v26 = vor.u32 %v4432_v24, %v3704_v23  ;;  %v4428_v28 = vld [vmem:[%s5221_s23 + $0x98] sm:$0xf0]  ;;  %v3686_v31 = vld [vmem:[%s5221_s23 + $0x9c] sm:$0xf0]  ;;  %v3692_v32 = vld [vmem:[%s5221_s23 + $0x98] sm:$0xf] }
 0x249   : > { %1205 = vmatpush.bf16.msra.mxu1 %v3555_v50  ;;  %1442 = vmatpush.bf16.msra.mxu3 %v3697_v21  ;;  %v3685_v30 = vor.u32 %v4428_v28, %v3684_v27  ;;  %v4429_v33 = vld [vmem:[%s5221_s23 + $0xa0] sm:$0xf0]  ;;  %v3689_v34 = vor.u32 %v4427_v29, %v3686_v31  ;;  %v3672_v36 = vld [vmem:[%s5221_s23 + $0x78] sm:$0xf]  ;;  %v4424_v38 = vld [vmem:[%s5221_s23 + $0x7c] sm:$0xf] }
 0x24a   : > { %v3693_v35 = vor.u32 %v4429_v33, %v3692_v32  ;;  %v4425_v37 = vld [vmem:[%s5221_s23 + $0x80] sm:$0xf0]  ;;  %v3674_v40 = vld [vmem:[%s5221_s23 + $0x84] sm:$0xf0]  ;;  %v3680_v42 = vld [vmem:[%s5221_s23 + $0x80] sm:$0xf] }
 0x24b   : > { %v3673_v39 = vor.u32 %v4425_v37, %v3672_v36  ;;  %v3677_v41 = vor.u32 %v4424_v38, %v3674_v40  ;;  %v4426_v43 = vld [vmem:[%s5221_s23 + $0x88] sm:$0xf0]  ;;  %v3660_v46 = vld [vmem:[%s5221_s23 + $0x60] sm:$0xf]  ;;  %v4421_v48 = vld [vmem:[%s5221_s23 + $0x64] sm:$0xf] }
 0x24c   : > { %1193 = vmatpush.bf16.msra.mxu0 %v3539_v57  ;;  %1218 = vmatpush.bf16.msra.mxu2 %v3559_v62  ;;  %v3681_v45 = vor.u32 %v4426_v43, %v3680_v42  ;;  %v4422_v47 = vld [vmem:[%s5221_s23 + $0x68] sm:$0xf0]  ;;  %v3662_v50 = vld [vmem:[%s5221_s23 + $0x6c] sm:$0xf0]  ;;  %v3668_v51 = vld [vmem:[%s5221_s23 + $0x68] sm:$0xf] }
 0x24d   : > { %1206 = vmatpush.bf16.msra.mxu1 %v3543_v58  ;;  %1443 = vmatpush.bf16.msra.mxu3 %v3685_v30  ;;  %v3661_v49 = vor.u32 %v4422_v47, %v3660_v46  ;;  %v4423_v52 = vld [vmem:[%s5221_s23 + $0x70] sm:$0xf0]  ;;  %v1231_v53 = vld [vmem:[#allocation3 + $0x18] sm:$0xff]  ;;  %v3665_v54 = vor.u32 %v4421_v48, %v3662_v50  ;;  %v3648_v59 = vld [vmem:[%s5221_s23 + $0x48] sm:$0xf]  ;;  %p4296_p4 = scmp.ne.s32.totalorder %s5073_s28, 1 }
 0x24e   : > { %v3669_v55 = vor.u32 %v4423_v52, %v3668_v51  ;;  %v4419_v60 = vld [vmem:[%s5221_s23 + $0x50] sm:$0xf0]  ;;  %v4418_v61 = vld [vmem:[%s5221_s23 + $0x4c] sm:$0xf]  ;;  %v3650_v0 = vld [vmem:[%s5221_s23 + $0x54] sm:$0xf0] }
 0x24f   : > { %v3649_v63 = vor.u32 %v4419_v60, %v3648_v59  ;;  %v3656_v1 = vld [vmem:[%s5221_s23 + $0x50] sm:$0xf]  ;;  %v3653_v4 = vor.u32 %v4418_v61, %v3650_v0  ;;  %v4416_v8 = vld [vmem:[%s5221_s23 + $0x38] sm:$0xf0]  ;;  %v4415_v9 = vld [vmem:[%s5221_s23 + $0x34] sm:$0xf] }
 0x250   : > { %1194 = vmatpush.bf16.msra.mxu0 %v3527_v2  ;;  %1219 = vmatpush.bf16.msra.mxu2 %v3547_v7  ;;  %v4420_v2 = vld [vmem:[%s5221_s23 + $0x58] sm:$0xf0]  ;;  %v3636_v7 = vld [vmem:[%s5221_s23 + $0x30] sm:$0xf]  ;;  %v3624_v18 = vld [vmem:[%s5221_s23 + $0x18] sm:$0xf] }
 0x251   : > { %1207 = vmatpush.bf16.msra.mxu1 %v3531_v3  ;;  %1444 = vmatpush.bf16.msra.mxu3 %v3673_v39  ;;  %v3657_v5 = vor.u32 %v4420_v2, %v3656_v1  ;;  %v3637_v10 = vor.u32 %v4416_v8, %v3636_v7  ;;  %v4413_v19 = vld [vmem:[%s5221_s23 + $0x20] sm:$0xf0]  ;;  %v4412_v20 = vld [vmem:[%s5221_s23 + $0x1c] sm:$0xf]  ;;  %v3626_v22 = vld [vmem:[%s5221_s23 + $0x24] sm:$0xf0] }
 0x252   : > { %v3625_v21 = vor.u32 %v4413_v19, %v3624_v18  ;;  %v3632_v23 = vld [vmem:[%s5221_s23 + $0x20] sm:$0xf]  ;;  %v4414_v24 = vld [vmem:[%s5221_s23 + $0x28] sm:$0xf0]  ;;  %v3629_v27 = vor.u32 %v4412_v20, %v3626_v22  ;;  %v4409_v31 = vld [vmem:[%s5221_s23 + $0x4] sm:$0xf] }
 0x253   : > { %v3633_v28 = vor.u32 %v4414_v24, %v3632_v23  ;;  %v3612_v29 = vld [vmem:[%s5221_s23] sm:$0xf]  ;;  %v4410_v30 = vld [vmem:[%s5221_s23 + $0x8] sm:$0xf0]  ;;  %v3620_v36 = vld [vmem:[%s5221_s23 + $0x8] sm:$0xf] }
 0x254   : > { %1195 = vmatpush.bf16.msra.mxu0 %v3515_v11  ;;  %1220 = vmatpush.bf16.msra.mxu2 %v3535_v13  ;;  %v3638_v11 = vld [vmem:[%s5221_s23 + $0x3c] sm:$0xf0]  ;;  %v4417_v13 = vld [vmem:[%s5221_s23 + $0x40] sm:$0xf0]  ;;  %v4411_v39 = vld [vmem:[%s5221_s23 + $0x10] sm:$0xf0] }
 0x255   : > { %1208 = vmatpush.bf16.msra.mxu1 %v3519_v12  ;;  %1445 = vmatpush.bf16.msra.mxu3 %v3661_v49  ;;  %v3644_v12 = vld [vmem:[%s5221_s23 + $0x38] sm:$0xf]  ;;  %v3641_v14 = vor.u32 %v4415_v9, %v3638_v11  ;;  %v3621_v40 = vor.u32 %v4411_v39, %v3620_v36  ;;  %v3794_v8 = vld [vmem:[%s5221_s23 + $0xa8] sm:$0xf]  ;;  %v4455_v9 = vld [vmem:[%s5221_s23 + $0xb0] sm:$0xf0] }
 0x256   : > { %v3645_v15 = vor.u32 %v4417_v13, %v3644_v12  ;;  %v3795_v11 = vor.u32 %v4455_v9, %v3794_v8  ;;  %v3796_v12 = vld [vmem:[%s5221_s23 + $0xb4] sm:$0xf0]  ;;  %v3802_v13 = vld [vmem:[%s5221_s23 + $0xb0] sm:$0xf]  ;;  %v4452_v18 = vld [vmem:[%s5221_s23 + $0x98] sm:$0xf0] }
 0x257   : > { %1196 = vmatmul.bf16.vlgmr.msra.gmra.mxu0 %v5012_v17  ;;  %v4451_v19 = vld [vmem:[%s5221_s23 + $0x94] sm:$0xf]  ;;  %v3790_v22 = vld [vmem:[%s5221_s23 + $0x98] sm:$0xf]  ;;  %v4453_v23 = vld [vmem:[%s5221_s23 + $0xa0] sm:$0xf0] }
 0x258   : > { %1209 = vmatmul.bf16.vlgmr.msra.gmra.mxu1 %v5012_v17  ;;  %1221 = vmatpush.bf16.msra.mxu2 %v3523_v16  ;;  %v1484_v39 = vld [vmem:[#allocation3 + $0x58] sm:$0xff] }
 0x259   : > { %1455 = vmatpush.bf16.msrb.mxu0 %v3701_v25  ;;  %1468 = vmatpush.bf16.msrb.mxu1 %v3705_v26 }
 0x25a   : > { %1446 = vmatpush.bf16.msra.mxu3 %v3649_v63 }
 0x25b   : > { %1222 = vmatmul.bf16.vlgmr.msra.gmra.mxu2 %v5012_v17 }
 0x25c   : > { %1697 = vmatpush.bf16.msrb.mxu2 %v3795_v11  ;;  %v4437_v11 = vld [vmem:[%s5221_s23 + $0x20] sm:$0xf0] }
 0x25d   : > { %1456 = vmatpush.bf16.msrb.mxu0 %v3689_v34  ;;  %1469 = vmatpush.bf16.msrb.mxu1 %v3693_v35  ;;  %v3613_v34 = vor.u32 %v4410_v30, %v3612_v29  ;;  %v3614_v35 = vld [vmem:[%s5221_s23 + $0xc] sm:$0xf0]  ;;  %v4448_v29 = vld [vmem:[%s5221_s23 + $0x7c] sm:$0xf] }
 0x25e   : > { %1447 = vmatpush.bf16.msra.mxu3 %v3637_v10  ;;  %v3617_v38 = vor.u32 %v4409_v31, %v3614_v35  ;;  %v4454_v10 = vld [vmem:[%s5221_s23 + $0xac] sm:$0xf] }
 0x261   : > { %1457 = vmatpush.bf16.msrb.mxu0 %v3677_v41  ;;  %1470 = vmatpush.bf16.msrb.mxu1 %v3681_v45  ;;  %v5479_v45 = vld [vmem:[%s5237_s21] ss:$0 sm:$0xff] }
 0x262   : > { %1448 = vmatpush.bf16.msra.mxu3 %v3625_v21  ;;  %v3784_v21 = vld [vmem:[%s5221_s23 + $0x9c] sm:$0xf0] }
 0x263   : > { %v3787_v24 = vor.u32 %v4451_v19, %v3784_v21  ;;  %v3710_v21 = vld [vmem:[%s5221_s23] sm:$0xf] }
 0x265   : > { %1458 = vmatpush.bf16.msrb.mxu0 %v3665_v54  ;;  %1471 = vmatpush.bf16.msrb.mxu1 %v3669_v55 }
 0x266   : > { %1449 = vmatpush.bf16.msra.mxu3 %v3613_v34  ;;  %v4450_v34 = vld [vmem:[%s5221_s23 + $0x88] sm:$0xf0] }
 0x269   : > { %1459 = vmatpush.bf16.msrb.mxu0 %v3653_v4  ;;  %1472 = vmatpush.bf16.msrb.mxu1 %v3657_v5 }
 0x26d   : > { %1460 = vmatpush.bf16.msrb.mxu0 %v3641_v14  ;;  %1473 = vmatpush.bf16.msrb.mxu1 %v3645_v15  ;;  %v4456_v14 = vld [vmem:[%s5221_s23 + $0xb8] sm:$0xf0]  ;;  %v3799_v15 = vor.u32 %v4454_v10, %v3796_v12  ;;  %v3722_v10 = vld [vmem:[%s5221_s23 + $0x18] sm:$0xf] }
 0x26e   : > { %v3723_v19 = vor.u32 %v4437_v11, %v3722_v10  ;;  %v4476_v10 = vld [vmem:[%s5221_s23 + $0x98] sm:$0xf0]  ;;  %v4475_v11 = vld [vmem:[%s5221_s23 + $0x94] sm:$0xf] }
 0x26f   : > { %1710 = vmatpush.bf16.msrb.mxu3 %v3799_v15  ;;  %v3730_v15 = vld [vmem:[%s5221_s23 + $0x20] sm:$0xf] }
 0x271   : > { %1461 = vmatpush.bf16.msrb.mxu0 %v3629_v27  ;;  %1474 = vmatpush.bf16.msrb.mxu1 %v3633_v28  ;;  %v3770_v27 = vld [vmem:[%s5221_s23 + $0x78] sm:$0xf]  ;;  %v4449_v28 = vld [vmem:[%s5221_s23 + $0x80] sm:$0xf0] }
 0x272   : > { %v3771_v31 = vor.u32 %v4449_v28, %v3770_v27  ;;  %v3718_v28 = vld [vmem:[%s5221_s23 + $0x8] sm:$0xf] }
 0x273   : > { %1711 = vmatpush.bf16.msrb.mxu3 %v3787_v24  ;;  %v4433_v24 = vld [vmem:[%s5221_s23 + $0x4] sm:$0xf] }
 0x275   : > { %1462 = vmatpush.bf16.msrb.mxu0 %v3617_v38  ;;  %1475 = vmatpush.bf16.msrb.mxu1 %v3621_v40 }
 0x2d4   : > { %v1197_v56 = vpop.f32.mrf.mxu0 }
 0x2d5   : > { %v1233_v57 = vadd.f32 %v1230_v44, %v1197_v56  ;;  %v1210_v58 = vpop.f32.mrf.mxu1  ;;  %v1232_v56 = vld [vmem:[#allocation3 + $0x50] sm:$0xff] }
 0x2d6   : > { %v1253_v62 = vadd.f32 %v1231_v53, %v1210_v58 }
 0x2d7   : > { %v3608_v3 = vmul.f32 -1.442695, %v1233_v57 }
 0x2d8   : > { %v3609_v6 = vmul.f32 -1.442695, %v1253_v62 }
 0x2d9   : > { %4693 = vpow2.f32 %v3608_v3 }
 0x2da   : > { %4695 = vpow2.f32 %v3609_v6 }
 0x2dc   : > { %v1199_v16 = vpop.f32.mrf.mxu0 }
 0x2dd   : > { %v1212_v17 = vpop.f32.mrf.mxu1  ;;  %v3803_v16 = vor.u32 %v4456_v14, %v3802_v13  ;;  %v4436_v13 = vld [vmem:[%s5221_s23 + $0x1c] sm:$0xf]  ;;  %v3724_v14 = vld [vmem:[%s5221_s23 + $0x24] sm:$0xf0] }
 0x2de   : > { %v1223_v26 = vpop.f32.mrf.mxu2  ;;  %v3782_v17 = vld [vmem:[%s5221_s23 + $0x90] sm:$0xf] }
 0x2df   : > { %v4694_v25 = vpop.eup %4693  ;;  %v1273_v52 = vadd.f32 %v5479_v45, %v1223_v26  ;;  %1723 = vmatpush.bf16.msra.mxu0 %v3803_v16  ;;  %v3783_v20 = vor.u32 %v4452_v18, %v3782_v17  ;;  %v1485_v26 = vld [vmem:[#allocation3 + $0xb8] sm:$0xff]  ;;  %v4438_v16 = vld [vmem:[%s5221_s23 + $0x28] sm:$0xf0] }
 0x2e0   : > { %v4696_v32 = vpop.eup %4695  ;;  %v1237_v33 = vadd.f32 1.0, %v4694_v25  ;;  %v3791_v25 = vor.u32 %v4453_v23, %v3790_v22  ;;  %v4434_v22 = vld [vmem:[%s5221_s23 + $0x8] sm:$0xf0]  ;;  %v3731_v23 = vor.u32 %v4438_v16, %v3730_v15  ;;  %v4477_v15 = vld [vmem:[%s5221_s23 + $0xa0] sm:$0xf0] }
 0x2e1   : > { %v1257_v37 = vadd.f32 1.0, %v4696_v32  ;;  %1698 = vmatpush.bf16.msrb.mxu2 %v3783_v20  ;;  %v3772_v32 = vld [vmem:[%s5221_s23 + $0x84] sm:$0xf0]  ;;  %v3727_v20 = vor.u32 %v4436_v13, %v3724_v14  ;;  %v3882_v13 = vld [vmem:[%s5221_s23 + $0x9c] sm:$0xf0] }
 0x2e2   : > { %4697 = vrcp.f32 %v1237_v33  ;;  %v1249_v48 = vand.u32 2147483648, %v1237_v33  ;;  %v1247_v50 = vand.u32 2147483647, %v1237_v33  ;;  %vm1243_vm1 = vweird.f32 %v1237_v33  ;;  %v3888_v14 = vld [vmem:[%s5221_s23 + $0x98] sm:$0xf] }
 0x2e3   : > { %4699 = vrcp.f32 %v1257_v37  ;;  %vm1263_vm4 = vweird.f32 %v1257_v37  ;;  %v1269_v61 = vand.u32 2147483648, %v1257_v37  ;;  %v1267_v63 = vand.u32 2147483647, %v1257_v37  ;;  %1724 = vmatpush.bf16.msra.mxu0 %v3791_v25  ;;  %v3712_v25 = vld [vmem:[%s5221_s23 + $0xc] sm:$0xf0] }
 0x2e4   : > { %v1250_v54 = vor.u32 1.1754944e-38, %v1249_v48  ;;  %vm1248_vm3 = vcmp.eq.f32.partialorder %v1247_v50, 8.507059e+37  ;;  %v3746_v50 = vld [vmem:[%s5221_s23 + $0x48] sm:$0xf]  ;;  %v3885_v16 = vor.u32 %v4475_v11, %v3882_v13  ;;  %v3808_v13 = vld [vmem:[%s5221_s23] sm:$0xf] }
 0x2e5   : > { %v1270_v0 = vor.u32 1.1754944e-38, %v1269_v61  ;;  %vm1268_vm7 = vcmp.eq.f32.partialorder %v1267_v63, 8.507059e+37  ;;  %1699 = vmatpush.bf16.msrb.mxu2 %v3771_v31  ;;  %v3734_v61 = vld [vmem:[%s5221_s23 + $0x30] sm:$0xf]  ;;  %v3711_v31 = vor.u32 %v4434_v22, %v3710_v21  ;;  %v3870_v22 = vld [vmem:[%s5221_s23 + $0x84] sm:$0xf0] }
 0x2e6   : > { %v1225_v41 = vpop.f32.mrf.mxu2 }
 0x2e7   : > { %v3758_v41 = vld [vmem:[%s5221_s23 + $0x60] sm:$0xf] }
 0x2e8   : > { %v4698_v42 = vpop.eup %4697 }
 0x2e9   : > { %v4700_v43 = vpop.eup %4699  ;;  %v1239_v44 = vmul.f32 %v4698_v42, %v1237_v33  ;;  %vm1244_vm0 = vweird.f32 %v4698_v42  ;;  %v3778_v33 = vld [vmem:[%s5221_s23 + $0x80] sm:$0xf] }
 0x2ea   : > { %v1259_v47 = vmul.f32 %v4700_v43, %v1257_v37  ;;  %vm1245_vm2 = vmor %vm1243_vm1, %vm1244_vm0  ;;  %vm1264_vm5 = vweird.f32 %v4700_v43  ;;  %v3775_v37 = vor.u32 %v4448_v29, %v3772_v32  ;;  %v3779_v38 = vor.u32 %v4450_v34, %v3778_v33  ;;  %v4435_v29 = vld [vmem:[%s5221_s23 + $0x10] sm:$0xf0] }
 0x2eb   : > { %v1240_v46 = vsub.f32 1.0, %v1239_v44  ;;  %vm1265_vm6 = vmor %vm1263_vm4, %vm1264_vm5  ;;  %v4445_v44 = vld [vmem:[%s5221_s23 + $0x64] sm:$0xf]  ;;  %v3715_v32 = vor.u32 %v4433_v24, %v3712_v25  ;;  %v3719_v33 = vor.u32 %v4435_v29, %v3718_v28  ;;  %v4474_v24 = vld [vmem:[%s5221_s23 + $0x88] sm:$0xf0] }
 0x2ec   : > { %v1260_v53 = vsub.f32 1.0, %v1259_v47  ;;  %1712 = vmatpush.bf16.msrb.mxu3 %v3775_v37  ;;  %1725 = vmatpush.bf16.msra.mxu0 %v3779_v38  ;;  %v3766_v47 = vld [vmem:[%s5221_s23 + $0x68] sm:$0xf]  ;;  %v1739_v28 = vld [vmem:[#allocation3 + $0x30] sm:$0xff]  ;;  %v1740_v29 = vld [vmem:[#allocation3 + $0x78] sm:$0xff] }
 0x2ed   : > { %v1241_v49 = vmul.f32 %v4698_v42, %v1240_v46  ;;  %v3760_v46 = vld [vmem:[%s5221_s23 + $0x6c] sm:$0xf0] }
 0x2ee   : > { %v1261_v59 = vmul.f32 %v4700_v43, %v1260_v53  ;;  %v3763_v48 = vor.u32 %v4445_v44, %v3760_v46 }
 0x2ef   : > { %v1242_v51 = vadd.f32 %v4698_v42, %v1241_v49  ;;  %v4447_v49 = vld [vmem:[%s5221_s23 + $0x70] sm:$0xf0] }
 0x2f0   : > { %v1262_v62 = vadd.f32 %v4700_v43, %v1261_v59  ;;  %v3767_v53 = vor.u32 %v4447_v49, %v3766_v47  ;;  %1713 = vmatpush.bf16.msrb.mxu3 %v3763_v48 }
 0x2f1   : > { %v1246_v55 = vsel %vm1245_vm2, %v4698_v42, %v1242_v51  ;;  %v4446_v42 = vld [vmem:[%s5221_s23 + $0x68] sm:$0xf0]  ;;  %v4443_v51 = vld [vmem:[%s5221_s23 + $0x50] sm:$0xf0] }
 0x2f2   : > { %v1251_v57 = vsel %vm1248_vm3, %v1250_v54, %v1246_v55  ;;  %v1266_v1 = vsel %vm1265_vm6, %v4700_v43, %v1262_v62  ;;  %v3759_v43 = vor.u32 %v4446_v42, %v3758_v41  ;;  %v3747_v54 = vor.u32 %v4443_v51, %v3746_v50  ;;  %v4442_v55 = vld [vmem:[%s5221_s23 + $0x4c] sm:$0xf]  ;;  %v4440_v62 = vld [vmem:[%s5221_s23 + $0x38] sm:$0xf0]  ;;  %1726 = vmatpush.bf16.msra.mxu0 %v3767_v53 }
 0x2f3   : > { %v1274_v58 = vmul.f32 %v1273_v52, %v1251_v57  ;;  %v1271_v4 = vsel %vm1268_vm7, %v1270_v0, %v1266_v1  ;;  %v3754_v57 = vld [vmem:[%s5221_s23 + $0x50] sm:$0xf]  ;;  %v4439_v1 = vld [vmem:[%s5221_s23 + $0x34] sm:$0xf]  ;;  %v3735_v8 = vor.u32 %v4440_v62, %v3734_v61  ;;  %v1486_v50 = vld [vmem:[#allocation3 + $0x88] sm:$0xff] }
 0x2f4   : > { %1700 = vmatpush.bf16.msrb.mxu2 %v3759_v43 }
 0x2f5   : > { %v1275_v60 = vadd.f32 %v1274_v58, %v1232_v56  ;;  %v3748_v56 = vld [vmem:[%s5221_s23 + $0x54] sm:$0xf0] }
 0x2f6   : > { %v3751_v59 = vor.u32 %v4442_v55, %v3748_v56 }
 0x2f7   : > { %4701 = vtanh.f32 %v1275_v60  ;;  %v4444_v60 = vld [vmem:[%s5221_s23 + $0x58] sm:$0xf0] }
 0x2f8   : > { %v3755_v0 = vor.u32 %v4444_v60, %v3754_v57  ;;  %1701 = vmatpush.bf16.msrb.mxu2 %v3747_v54  ;;  %1714 = vmatpush.bf16.msrb.mxu3 %v3751_v59 }
 0x2fa   : > { %1727 = vmatpush.bf16.msra.mxu0 %v3755_v0  ;;  %v3892_v0 = vld [vmem:[%s5221_s23 + $0xa8] sm:$0xf] }
 0x2fc   : > { %1702 = vmatpush.bf16.msrb.mxu2 %v3735_v8 }
 0x2fd   : > { %v4702_v2 = vpop.eup %4701 }
 0x2fe   : > { %v1277_v3 = vsub.f32 0.0, %v4702_v2 }
 0x300   : > { %v1278_v5 = vmul.f32 %v1277_v3, %v1271_v4  ;;  %1703 = vmatpush.bf16.msrb.mxu2 %v3723_v19  ;;  %v4473_v19 = vld [vmem:[%s5221_s23 + $0x80] sm:$0xf0] }
 0x302   : > { %v5482_v6 = vadd.f32 %v4702_v2, %v1278_v5  ;;  %v3736_v2 = vld [vmem:[%s5221_s23 + $0x3c] sm:$0xf0]  ;;  %v3742_v5 = vld [vmem:[%s5221_s23 + $0x38] sm:$0xf] }
 0x303   : > { %v3739_v9 = vor.u32 %v4439_v1, %v3736_v2  ;;  %v4479_v1 = vld [vmem:[%s5221_s23 + $0xb0] sm:$0xf0] }
 0x304   : > { %1280 = vst [vmem:[#allocation2 + $0x30] sm:$0xff] %v5482_v6  ;;  %v1281_v7 = vpack.c.bf16 %v5482_v6, %v5482_v6  ;;  %1704 = vmatpush.bf16.msrb.mxu2 %v3711_v31  ;;  %v3893_v2 = vor.u32 %v4479_v1, %v3892_v0  ;;  %v4470_v31 = vld [vmem:[%s5221_s23 + $0x68] sm:$0xf0] }
 0x305   : > { %1715 = vmatpush.bf16.msrb.mxu3 %v3739_v9  ;;  %v3880_v9 = vld [vmem:[%s5221_s23 + $0x90] sm:$0xf] }
 0x306   : > { %1450 = vmatmul.bf16.vlgmr.msra.gmra.mxu3 %v1281_v7  ;;  %1463 = vmatmul.bf16.vlgmr.msrb.gmra.mxu0 %v1281_v7 }
 0x307   : > { %1476 = vmatmul.bf16.vlgmr.msrb.gmra.mxu1 %v1281_v7  ;;  %v4441_v7 = vld [vmem:[%s5221_s23 + $0x40] sm:$0xf0] }
 0x308   : > { %v3743_v12 = vor.u32 %v4441_v7, %v3742_v5  ;;  %v4480_v5 = vld [vmem:[%s5221_s23 + $0xb8] sm:$0xf0]  ;;  %1952 = vmatpush.bf16.msra.mxu1 %v3893_v2  ;;  %v4461_v2 = vld [vmem:[%s5221_s23 + $0x20] sm:$0xf0] }
 0x309   : > { %1716 = vmatpush.bf16.msrb.mxu3 %v3727_v20  ;;  %v4472_v20 = vld [vmem:[%s5221_s23 + $0x7c] sm:$0xf] }
 0x30a   : > { %1728 = vmatpush.bf16.msra.mxu0 %v3743_v12  ;;  %v3881_v12 = vor.u32 %v4476_v10, %v3880_v9 }
 0x30c   : > { %1953 = vmatpush.bf16.msra.mxu1 %v3881_v12 }
 0x30d   : > { %1717 = vmatpush.bf16.msrb.mxu3 %v3715_v32  ;;  %v4469_v32 = vld [vmem:[%s5221_s23 + $0x64] sm:$0xf] }
 0x30e   : > { %1729 = vmatpush.bf16.msra.mxu0 %v3731_v23  ;;  %v3876_v23 = vld [vmem:[%s5221_s23 + $0x80] sm:$0xf] }
 0x312   : > { %1730 = vmatpush.bf16.msra.mxu0 %v3719_v33 }
 0x383   : > { %v1464_v30 = vpop.f32.mrf.mxu0 }
 0x384   : > { %v1507_v35 = vadd.f32 %v1485_v26, %v1464_v30  ;;  %v5505_v36 = vpop.f32.mrf.mxu1 }
 0x385   : > { %v1527_v47 = vadd.f32 %v5479_v45, %v5505_v36 }
 0x386   : > { %v3707_v40 = vmul.f32 -1.442695, %v1507_v35 }
 0x388   : > { %4703 = vpow2.f32 %v3707_v40 }
 0x389   : > { %v1451_v52 = vpop.f32.mrf.mxu3 }
 0x38a   : > { %v1487_v58 = vadd.f32 %v1484_v39, %v1451_v52 }
 0x38b   : > { %v1466_v63 = vpop.f32.mrf.mxu0 }
 0x38c   : > { %v3706_v3 = vmul.f32 -1.442695, %v1487_v58  ;;  %v1479_v4 = vpop.f32.mrf.mxu1 }
 0x38d   : > { %v3900_v4 = vld [vmem:[%s5221_s23 + $0xb0] sm:$0xf] }
 0x38e   : > { %4705 = vpow2.f32 %v3706_v3  ;;  %v4704_v17 = vpop.eup %4703  ;;  %v3894_v3 = vld [vmem:[%s5221_s23 + $0xb4] sm:$0xf0]  ;;  %v3901_v8 = vor.u32 %v4480_v5, %v3900_v4  ;;  %v3822_v4 = vld [vmem:[%s5221_s23 + $0x24] sm:$0xf0]  ;;  %v3828_v5 = vld [vmem:[%s5221_s23 + $0x20] sm:$0xf] }
 0x38f   : > { %v1511_v27 = vadd.f32 1.0, %v4704_v17  ;;  %v3889_v17 = vor.u32 %v4477_v15, %v3888_v14  ;;  %v4458_v14 = vld [vmem:[%s5221_s23 + $0x8] sm:$0xf0]  ;;  %v4457_v15 = vld [vmem:[%s5221_s23 + $0x4] sm:$0xf] }
 0x390   : > { %1978 = vmatpush.bf16.msra.mxu3 %v3901_v8 }
 0x391   : > { %v1453_v18 = vpop.f32.mrf.mxu3  ;;  %v1523_v55 = vand.u32 2147483648, %v1511_v27  ;;  %vm1517_vm13 = vweird.f32 %v1511_v27  ;;  %v1521_v56 = vand.u32 2147483647, %v1511_v27 }
 0x392   : > { %v3868_v18 = vld [vmem:[%s5221_s23 + $0x78] sm:$0xf] }
 0x393   : > { %v1524_v36 = vor.u32 1.1754944e-38, %v1523_v55  ;;  %vm1522_vm15 = vcmp.eq.f32.partialorder %v1521_v56, 8.507059e+37  ;;  %v3869_v21 = vor.u32 %v4473_v19, %v3868_v18  ;;  %v4463_v55 = vld [vmem:[%s5221_s23 + $0x34] sm:$0xf] }
 0x394   : > { %v4706_v26 = vpop.eup %4705  ;;  %1979 = vmatpush.bf16.msra.mxu3 %v3889_v17  ;;  %v3816_v17 = vld [vmem:[%s5221_s23 + $0x8] sm:$0xf]  ;;  %v4459_v18 = vld [vmem:[%s5221_s23 + $0x10] sm:$0xf0] }
 0x395   : > { %v1491_v30 = vadd.f32 1.0, %v4706_v26  ;;  %v3873_v26 = vor.u32 %v4472_v20, %v3870_v22  ;;  %1954 = vmatpush.bf16.msra.mxu1 %v3869_v21  ;;  %v3809_v22 = vor.u32 %v4458_v14, %v3808_v13  ;;  %v3968_v14 = vld [vmem:[%s5221_s23 + $0x84] sm:$0xf0] }
 0x397   : > { %4707 = vrcp.f32 %v1491_v30  ;;  %v1503_v40 = vand.u32 2147483648, %v1491_v30  ;;  %v1501_v42 = vand.u32 2147483647, %v1491_v30  ;;  %vm1497_vm9 = vweird.f32 %v1491_v30 }
 0x398   : > { %4709 = vrcp.f32 %v1511_v27 }
 0x399   : > { %v1504_v46 = vor.u32 1.1754944e-38, %v1503_v40  ;;  %vm1502_vm11 = vcmp.eq.f32.partialorder %v1501_v42, 8.507059e+37  ;;  %v3844_v40 = vld [vmem:[%s5221_s23 + $0x48] sm:$0xf]  ;;  %v4466_v42 = vld [vmem:[%s5221_s23 + $0x4c] sm:$0xf] }
 0x39d   : > { %v4708_v34 = vpop.eup %4707 }
 0x39e   : > { %v4710_v35 = vpop.eup %4709  ;;  %v1493_v37 = vmul.f32 %v4708_v34, %v1491_v30  ;;  %vm1498_vm8 = vweird.f32 %v4708_v34  ;;  %v3856_v30 = vld [vmem:[%s5221_s23 + $0x60] sm:$0xf] }
 0x39f   : > { %v1513_v39 = vmul.f32 %v4710_v35, %v1511_v27  ;;  %vm1499_vm10 = vmor %vm1497_vm9, %vm1498_vm8  ;;  %vm1518_vm12 = vweird.f32 %v4710_v35  ;;  %v3877_v27 = vor.u32 %v4474_v24, %v3876_v23  ;;  %v3857_v33 = vor.u32 %v4470_v31, %v3856_v30 }
 0x3a0   : > { %v1494_v38 = vsub.f32 1.0, %v1493_v37  ;;  %vm1519_vm14 = vmor %vm1517_vm13, %vm1518_vm12  ;;  %v4471_v37 = vld [vmem:[%s5221_s23 + $0x70] sm:$0xf0] }
 0x3a1   : > { %v1514_v44 = vsub.f32 1.0, %v1513_v39  ;;  %1980 = vmatpush.bf16.msra.mxu3 %v3877_v27  ;;  %1955 = vmatpush.bf16.msra.mxu1 %v3857_v33 }
 0x3a2   : > { %v1495_v41 = vmul.f32 %v4708_v34, %v1494_v38 }
 0x3a3   : > { %v1515_v52 = vmul.f32 %v4710_v35, %v1514_v44 }
 0x3a4   : > { %v1496_v43 = vadd.f32 %v4708_v34, %v1495_v41  ;;  %v4467_v41 = vld [vmem:[%s5221_s23 + $0x50] sm:$0xf0] }
 0x3a5   : > { %v1516_v54 = vadd.f32 %v4710_v35, %v1515_v52 }
 0x3a6   : > { %v1500_v48 = vsel %vm1499_vm10, %v4708_v34, %v1496_v43  ;;  %v3858_v34 = vld [vmem:[%s5221_s23 + $0x6c] sm:$0xf0] }
 0x3a7   : > { %v1505_v49 = vsel %vm1502_vm11, %v1504_v46, %v1500_v48  ;;  %v1520_v57 = vsel %vm1519_vm14, %v4710_v35, %v1516_v54  ;;  %v3864_v35 = vld [vmem:[%s5221_s23 + $0x68] sm:$0xf]  ;;  %v3861_v38 = vor.u32 %v4469_v32, %v3858_v34  ;;  %v3845_v46 = vor.u32 %v4467_v41, %v3844_v40  ;;  %v3852_v48 = vld [vmem:[%s5221_s23 + $0x50] sm:$0xf]  ;;  %v4464_v54 = vld [vmem:[%s5221_s23 + $0x38] sm:$0xf0] }
 0x3a8   : > { %v1528_v51 = vmul.f32 %v1527_v47, %v1505_v49  ;;  %v1525_v60 = vsel %vm1522_vm15, %v1524_v36, %v1520_v57  ;;  %v3865_v39 = vor.u32 %v4471_v37, %v3864_v35  ;;  %v3846_v47 = vld [vmem:[%s5221_s23 + $0x54] sm:$0xf0]  ;;  %v4468_v49 = vld [vmem:[%s5221_s23 + $0x58] sm:$0xf0]  ;;  %v3834_v57 = vld [vmem:[%s5221_s23 + $0x3c] sm:$0xf0] }
 0x3a9   : > { %v3849_v52 = vor.u32 %v4466_v42, %v3846_v47  ;;  %v3853_v56 = vor.u32 %v4468_v49, %v3852_v48  ;;  %v4465_v36 = vld [vmem:[%s5221_s23 + $0x40] sm:$0xf0]  ;;  %1956 = vmatpush.bf16.msra.mxu1 %v3845_v46  ;;  %v3837_v0 = vor.u32 %v4463_v55, %v3834_v57  ;;  %v3990_v57 = vld [vmem:[%s5221_s23 + $0xa8] sm:$0xf] }
 0x3aa   : > { %v1529_v53 = vadd.f32 %v1528_v51, %v1486_v50  ;;  %1981 = vmatpush.bf16.msra.mxu3 %v3865_v39  ;;  %v1741_v42 = vld [vmem:[#allocation3 + $0x40] sm:$0xff] }
 0x3ac   : > { %4711 = vtanh.f32 %v1529_v53  ;;  %v3832_v53 = vld [vmem:[%s5221_s23 + $0x30] sm:$0xf] }
 0x3ae   : > { %1982 = vmatpush.bf16.msra.mxu3 %v3853_v56 }
 0x3b2   : > { %v4712_v58 = vpop.eup %4711 }
 0x3b3   : > { %v1531_v59 = vsub.f32 %v5482_v6, %v4712_v58  ;;  %v4478_v6 = vld [vmem:[%s5221_s23 + $0xac] sm:$0xf] }
 0x3b4   : > { %v3897_v7 = vor.u32 %v4478_v6, %v3894_v3  ;;  %v3820_v6 = vld [vmem:[%s5221_s23 + $0x18] sm:$0xf]  ;;  %v4460_v3 = vld [vmem:[%s5221_s23 + $0x1c] sm:$0xf] }
 0x3b5   : > { %v1532_v61 = vmul.f32 %v1531_v59, %v1525_v60  ;;  %v3821_v10 = vor.u32 %v4461_v2, %v3820_v6  ;;  %v3825_v11 = vor.u32 %v4460_v3, %v3822_v4  ;;  %v4500_v6 = vld [vmem:[%s5221_s23 + $0x98] sm:$0xf0]  ;;  %v4499_v2 = vld [vmem:[%s5221_s23 + $0x94] sm:$0xf]  ;;  %v3980_v4 = vld [vmem:[%s5221_s23 + $0x9c] sm:$0xf0] }
 0x3b6   : > { %1965 = vmatpush.bf16.msra.mxu2 %v3897_v7  ;;  %v4462_v7 = vld [vmem:[%s5221_s23 + $0x28] sm:$0xf0] }
 0x3b7   : > { %v5540_v62 = vadd.f32 %v4712_v58, %v1532_v61  ;;  %v3840_v58 = vld [vmem:[%s5221_s23 + $0x38] sm:$0xf]  ;;  %v3829_v12 = vor.u32 %v4462_v7, %v3828_v5  ;;  %v4501_v7 = vld [vmem:[%s5221_s23 + $0xa0] sm:$0xf0] }
 0x3b8   : > { %v3841_v1 = vor.u32 %v4465_v36, %v3840_v58  ;;  %v4503_v58 = vld [vmem:[%s5221_s23 + $0xb0] sm:$0xf0]  ;;  %v3986_v5 = vld [vmem:[%s5221_s23 + $0x98] sm:$0xf] }
 0x3b9   : > { %1535 = vst [vmem:[#allocation2] sm:$0xff] %v5540_v62  ;;  %v1536_v63 = vpack.c.bf16 %v5540_v62, %v5540_v62  ;;  %v3991_v36 = vor.u32 %v4503_v58, %v3990_v57 }
 0x3ba   : > { %1966 = vmatpush.bf16.msra.mxu2 %v3885_v16  ;;  %1983 = vmatpush.bf16.msra.mxu3 %v3841_v1  ;;  %v3810_v16 = vld [vmem:[%s5221_s23 + $0xc] sm:$0xf0] }
 0x3bb   : > { %1705 = vmatmul.bf16.vlgmr.msrb.gmra.mxu2 %v1536_v63  ;;  %1718 = vmatmul.bf16.vlgmr.msrb.gmra.mxu3 %v1536_v63  ;;  %v3813_v24 = vor.u32 %v4457_v15, %v3810_v16  ;;  %v3978_v1 = vld [vmem:[%s5221_s23 + $0x90] sm:$0xf]  ;;  %v3974_v15 = vld [vmem:[%s5221_s23 + $0x80] sm:$0xf]  ;;  %v4498_v16 = vld [vmem:[%s5221_s23 + $0x88] sm:$0xf0] }
 0x3bc   : > { %1731 = vmatmul.bf16.vlgmr.msra.gmra.mxu0 %v1536_v63  ;;  %v3833_v63 = vor.u32 %v4464_v54, %v3832_v53  ;;  %v3979_v3 = vor.u32 %v4500_v6, %v3978_v1  ;;  %v4486_v6 = vld [vmem:[%s5221_s23 + $0x28] sm:$0xf0] }
 0x3bd   : > { %2207 = vmatpush.bf16.msrb.mxu0 %v3991_v36  ;;  %v4485_v36 = vld [vmem:[%s5221_s23 + $0x20] sm:$0xf0] }
 0x3be   : > { %1967 = vmatpush.bf16.msra.mxu2 %v3873_v26  ;;  %1957 = vmatpush.bf16.msra.mxu1 %v3833_v63  ;;  %v3817_v26 = vor.u32 %v4459_v18, %v3816_v17  ;;  %v3975_v18 = vor.u32 %v4498_v16, %v3974_v15 }
 0x3bf   : > { %1984 = vmatpush.bf16.msra.mxu3 %v3829_v12  ;;  %v4496_v12 = vld [vmem:[%s5221_s23 + $0x7c] sm:$0xf] }
 0x3c0   : > { %v3971_v17 = vor.u32 %v4496_v12, %v3968_v14  ;;  %v4483_v12 = vld [vmem:[%s5221_s23 + $0x10] sm:$0xf0] }
 0x3c1   : > { %2208 = vmatpush.bf16.msrb.mxu0 %v3979_v3  ;;  %v4482_v3 = vld [vmem:[%s5221_s23 + $0x8] sm:$0xf0] }
 0x3c2   : > { %1968 = vmatpush.bf16.msra.mxu2 %v3861_v38  ;;  %1958 = vmatpush.bf16.msra.mxu1 %v3821_v10  ;;  %v3966_v10 = vld [vmem:[%s5221_s23 + $0x78] sm:$0xf] }
 0x3c3   : > { %1985 = vmatpush.bf16.msra.mxu3 %v3817_v26  ;;  %v3962_v26 = vld [vmem:[%s5221_s23 + $0x68] sm:$0xf] }
 0x3c6   : > { %1969 = vmatpush.bf16.msra.mxu2 %v3849_v52  ;;  %1959 = vmatpush.bf16.msra.mxu1 %v3809_v22  ;;  %v4493_v22 = vld [vmem:[%s5221_s23 + $0x64] sm:$0xf] }
 0x3ca   : > { %1970 = vmatpush.bf16.msra.mxu2 %v3837_v0 }
 0x3ce   : > { %1971 = vmatpush.bf16.msra.mxu2 %v3825_v11  ;;  %v4497_v11 = vld [vmem:[%s5221_s23 + $0x80] sm:$0xf0] }
 0x3cf   : > { %v3967_v13 = vor.u32 %v4497_v11, %v3966_v10  ;;  %v3914_v11 = vld [vmem:[%s5221_s23 + $0x8] sm:$0xf] }
 0x3d0   : > { %v3915_v15 = vor.u32 %v4483_v12, %v3914_v11  ;;  %v2250_v11 = vld [vmem:[#allocation3 + $0xa8] sm:$0xff]  ;;  %v4052_v12 = vld [vmem:[%s5221_s23 + $0x60] sm:$0xf] }
 0x3d1   : > { %2209 = vmatpush.bf16.msrb.mxu0 %v3967_v13 }
 0x3d2   : > { %1972 = vmatpush.bf16.msra.mxu2 %v3813_v24  ;;  %v3956_v24 = vld [vmem:[%s5221_s23 + $0x6c] sm:$0xf0] }
 0x439   : > { %v5563_v25 = vpop.f32.mrf.mxu0 }
 0x43a   : > { %v1782_v39 = vadd.f32 %v5479_v45, %v5563_v25 }
 0x43e   : > { %v1706_v43 = vpop.f32.mrf.mxu2  ;;  %v1719_v44 = vpop.f32.mrf.mxu3 }
 0x43f   : > { %v1742_v50 = vadd.f32 %v1739_v28, %v1706_v43  ;;  %v1762_v51 = vadd.f32 %v1740_v29, %v1719_v44 }
 0x441   : > { %v3804_v59 = vmul.f32 -1.442695, %v1742_v50  ;;  %v3805_v60 = vmul.f32 -1.442695, %v1762_v51  ;;  %v1734_v61 = vpop.f32.mrf.mxu0 }
 0x442   : > { %v4504_v61 = vld [vmem:[%s5221_s23 + $0xb8] sm:$0xf0] }
 0x443   : > { %4713 = vpow2.f32 %v3804_v59  ;;  %v3992_v59 = vld [vmem:[%s5221_s23 + $0xb4] sm:$0xf0] }
 0x444   : > { %4715 = vpow2.f32 %v3805_v60  ;;  %v3998_v60 = vld [vmem:[%s5221_s23 + $0xb0] sm:$0xf] }
 0x445   : > { %v3999_v0 = vor.u32 %v4504_v61, %v3998_v60  ;;  %v4484_v60 = vld [vmem:[%s5221_s23 + $0x1c] sm:$0xf]  ;;  %v3920_v61 = vld [vmem:[%s5221_s23 + $0x24] sm:$0xf0] }
 0x446   : > { %v1708_v8 = vpop.f32.mrf.mxu2  ;;  %v1721_v9 = vpop.f32.mrf.mxu3  ;;  %v3923_v1 = vor.u32 %v4484_v60, %v3920_v61  ;;  %v4084_v60 = vld [vmem:[%s5221_s23 + $0x98] sm:$0xf]  ;;  %v4525_v61 = vld [vmem:[%s5221_s23 + $0xa0] sm:$0xf0] }
 0x447   : > { %2233 = vmatpush.bf16.msrb.mxu2 %v3999_v0  ;;  %v3983_v8 = vor.u32 %v4499_v2, %v3980_v4  ;;  %v3987_v9 = vor.u32 %v4501_v7, %v3986_v5  ;;  %v3906_v2 = vld [vmem:[%s5221_s23] sm:$0xf] }
 0x448   : > { %v3907_v7 = vor.u32 %v4482_v3, %v3906_v2  ;;  %v4520_v2 = vld [vmem:[%s5221_s23 + $0x7c] sm:$0xf] }
 0x449   : > { %v4714_v19 = vpop.eup %4713 }
 0x44a   : > { %v4716_v20 = vpop.eup %4715  ;;  %v1746_v21 = vadd.f32 1.0, %v4714_v19  ;;  %v1994_v19 = vld [vmem:[#allocation3 + $0x10] sm:$0xff] }
 0x44b   : > { %v1766_v23 = vadd.f32 1.0, %v4716_v20  ;;  %2234 = vmatpush.bf16.msrb.mxu2 %v3987_v9  ;;  %v3954_v20 = vld [vmem:[%s5221_s23 + $0x60] sm:$0xf]  ;;  %v3908_v9 = vld [vmem:[%s5221_s23 + $0xc] sm:$0xf0] }
 0x44c   : > { %4717 = vrcp.f32 %v1746_v21  ;;  %v1758_v31 = vand.u32 2147483648, %v1746_v21  ;;  %v1756_v34 = vand.u32 2147483647, %v1746_v21  ;;  %vm1752_vm1 = vweird.f32 %v1746_v21 }
 0x44d   : > { %4719 = vrcp.f32 %v1766_v23  ;;  %v1778_v48 = vand.u32 2147483648, %v1766_v23  ;;  %vm1772_vm5 = vweird.f32 %v1766_v23  ;;  %v1776_v49 = vand.u32 2147483647, %v1766_v23 }
 0x44e   : > { %v1759_v37 = vor.u32 1.1754944e-38, %v1758_v31  ;;  %vm1757_vm3 = vcmp.eq.f32.partialorder %v1756_v34, 8.507059e+37 }
 0x44f   : > { %v1779_v25 = vor.u32 1.1754944e-38, %v1778_v48  ;;  %vm1777_vm7 = vcmp.eq.f32.partialorder %v1776_v49, 8.507059e+37  ;;  %2235 = vmatpush.bf16.msrb.mxu2 %v3975_v18 }
 0x452   : > { %v4718_v27 = vpop.eup %4717 }
 0x453   : > { %v4720_v28 = vpop.eup %4719  ;;  %v1748_v29 = vmul.f32 %v4718_v27, %v1746_v21  ;;  %vm1753_vm0 = vweird.f32 %v4718_v27  ;;  %v4494_v21 = vld [vmem:[%s5221_s23 + $0x68] sm:$0xf0] }
 0x454   : > { %v1768_v32 = vmul.f32 %v4720_v28, %v1766_v23  ;;  %vm1754_vm2 = vmor %vm1752_vm1, %vm1753_vm0  ;;  %vm1773_vm4 = vweird.f32 %v4720_v28  ;;  %v3955_v23 = vor.u32 %v4494_v21, %v3954_v20 }
 0x455   : > { %v1749_v30 = vsub.f32 1.0, %v1748_v29  ;;  %vm1774_vm6 = vmor %vm1772_vm5, %vm1773_vm4 }
 0x456   : > { %v1769_v38 = vsub.f32 1.0, %v1768_v32  ;;  %2210 = vmatpush.bf16.msrb.mxu0 %v3955_v23  ;;  %v3942_v32 = vld [vmem:[%s5221_s23 + $0x48] sm:$0xf] }
 0x457   : > { %v1750_v33 = vmul.f32 %v4718_v27, %v1749_v30 }
 0x458   : > { %v1770_v44 = vmul.f32 %v4720_v28, %v1769_v38  ;;  %v3950_v38 = vld [vmem:[%s5221_s23 + $0x50] sm:$0xf] }
 0x459   : > { %v1751_v35 = vadd.f32 %v4718_v27, %v1750_v33  ;;  %v4491_v33 = vld [vmem:[%s5221_s23 + $0x50] sm:$0xf0] }
 0x45a   : > { %v1771_v47 = vadd.f32 %v4720_v28, %v1770_v44  ;;  %v3943_v34 = vor.u32 %v4491_v33, %v3942_v32  ;;  %v3930_v44 = vld [vmem:[%s5221_s23 + $0x30] sm:$0xf]  ;;  %v1996_v32 = vld [vmem:[#allocation3 + $0x48] sm:$0xff] }
 0x45b   : > { %v1755_v40 = vsel %vm1754_vm2, %v4718_v27, %v1751_v35  ;;  %v4495_v27 = vld [vmem:[%s5221_s23 + $0x70] sm:$0xf0]  ;;  %v4490_v35 = vld [vmem:[%s5221_s23 + $0x4c] sm:$0xf] }
 0x45c   : > { %v1760_v41 = vsel %vm1757_vm3, %v1759_v37, %v1755_v40  ;;  %v1775_v50 = vsel %vm1774_vm6, %v4720_v28, %v1771_v47  ;;  %v3959_v28 = vor.u32 %v4493_v22, %v3956_v24  ;;  %v3963_v29 = vor.u32 %v4495_v27, %v3962_v26  ;;  %v3944_v37 = vld [vmem:[%s5221_s23 + $0x54] sm:$0xf0]  ;;  %2211 = vmatpush.bf16.msrb.mxu0 %v3943_v34  ;;  %v4487_v47 = vld [vmem:[%s5221_s23 + $0x34] sm:$0xf] }
 0x45d   : > { %v1783_v43 = vmul.f32 %v1782_v39, %v1760_v41  ;;  %v1780_v53 = vsel %vm1777_vm7, %v1779_v25, %v1775_v50  ;;  %v3947_v40 = vor.u32 %v4490_v35, %v3944_v37  ;;  %v4492_v41 = vld [vmem:[%s5221_s23 + $0x58] sm:$0xf0]  ;;  %v3932_v50 = vld [vmem:[%s5221_s23 + $0x3c] sm:$0xf0]  ;;  %v4489_v25 = vld [vmem:[%s5221_s23 + $0x40] sm:$0xf0] }
 0x45e   : > { %2236 = vmatpush.bf16.msrb.mxu2 %v3963_v29 }
 0x45f   : > { %v1784_v46 = vadd.f32 %v1783_v43, %v1741_v42  ;;  %v1995_v42 = vld [vmem:[#allocation3 + $0x80] sm:$0xff]  ;;  %v3951_v43 = vor.u32 %v4492_v41, %v3950_v38 }
 0x461   : > { %4721 = vtanh.f32 %v1784_v46  ;;  %v4488_v46 = vld [vmem:[%s5221_s23 + $0x38] sm:$0xf0] }
 0x462   : > { %2237 = vmatpush.bf16.msrb.mxu2 %v3951_v43  ;;  %v3931_v49 = vor.u32 %v4488_v46, %v3930_v44 }
 0x464   : > { %2212 = vmatpush.bf16.msrb.mxu0 %v3931_v49  ;;  %v4088_v49 = vld [vmem:[%s5221_s23 + $0xa8] sm:$0xf] }
 0x467   : > { %v4722_v51 = vpop.eup %4721 }
 0x468   : > { %v1786_v52 = vsub.f32 %v5540_v62, %v4722_v51  ;;  %v4502_v62 = vld [vmem:[%s5221_s23 + $0xac] sm:$0xf] }
 0x469   : > { %v3995_v63 = vor.u32 %v4502_v62, %v3992_v59  ;;  %v3918_v62 = vld [vmem:[%s5221_s23 + $0x18] sm:$0xf] }
 0x46a   : > { %v1787_v54 = vmul.f32 %v1786_v52, %v1780_v53  ;;  %v3919_v59 = vor.u32 %v4485_v36, %v3918_v62  ;;  %v4523_v62 = vld [vmem:[%s5221_s23 + $0x94] sm:$0xf] }
 0x46b   : > { %2220 = vmatpush.bf16.msrb.mxu1 %v3995_v63  ;;  %v3926_v63 = vld [vmem:[%s5221_s23 + $0x20] sm:$0xf] }
 0x46c   : > { %v5598_v55 = vadd.f32 %v4722_v51, %v1787_v54  ;;  %v3938_v51 = vld [vmem:[%s5221_s23 + $0x38] sm:$0xf]  ;;  %v3935_v54 = vor.u32 %v4487_v47, %v3932_v50  ;;  %2213 = vmatpush.bf16.msrb.mxu0 %v3919_v59  ;;  %v3927_v5 = vor.u32 %v4486_v6, %v3926_v63  ;;  %v4527_v50 = vld [vmem:[%s5221_s23 + $0xb0] sm:$0xf0]  ;;  %v4078_v59 = vld [vmem:[%s5221_s23 + $0x9c] sm:$0xf0] }
 0x46d   : > { %v4081_v63 = vor.u32 %v4523_v62, %v4078_v59  ;;  %v4521_v6 = vld [vmem:[%s5221_s23 + $0x80] sm:$0xf0]  ;;  %v4506_v59 = vld [vmem:[%s5221_s23 + $0x8] sm:$0xf0] }
 0x46e   : > { %1790 = vst [vmem:[#allocation2 + $0x18] sm:$0xff] %v5598_v55  ;;  %v1791_v56 = vpack.c.bf16 %v5598_v55, %v5598_v55 }
 0x46f   : > { %2221 = vmatpush.bf16.msrb.mxu1 %v3983_v8  ;;  %v4481_v8 = vld [vmem:[%s5221_s23 + $0x4] sm:$0xf] }
 0x470   : > { %1960 = vmatmul.bf16.vlgmr.msra.gmra.mxu1 %v1791_v56  ;;  %1973 = vmatmul.bf16.vlgmr.msra.gmra.mxu2 %v1791_v56  ;;  %v3911_v10 = vor.u32 %v4481_v8, %v3908_v9 }
 0x471   : > { %1986 = vmatmul.bf16.vlgmr.msra.gmra.mxu3 %v1791_v56  ;;  %v3939_v56 = vor.u32 %v4489_v25, %v3938_v51  ;;  %2214 = vmatpush.bf16.msrb.mxu0 %v3907_v7  ;;  %v4089_v51 = vor.u32 %v4527_v50, %v4088_v49  ;;  %v4090_v25 = vld [vmem:[%s5221_s23 + $0xb4] sm:$0xf0]  ;;  %v4522_v7 = vld [vmem:[%s5221_s23 + $0x88] sm:$0xf0] }
 0x473   : > { %2222 = vmatpush.bf16.msrb.mxu1 %v3971_v17  ;;  %2238 = vmatpush.bf16.msrb.mxu2 %v3939_v56 }
 0x474   : > { %2462 = vmatpush.bf16.msrb.mxu3 %v4089_v51  ;;  %v4509_v51 = vld [vmem:[%s5221_s23 + $0x20] sm:$0xf0] }
 0x477   : > { %2223 = vmatpush.bf16.msrb.mxu1 %v3959_v28  ;;  %2239 = vmatpush.bf16.msrb.mxu2 %v3927_v5  ;;  %v4072_v5 = vld [vmem:[%s5221_s23 + $0x80] sm:$0xf] }
 0x478   : > { %v4073_v9 = vor.u32 %v4522_v7, %v4072_v5 }
 0x47b   : > { %2224 = vmatpush.bf16.msrb.mxu1 %v3947_v40  ;;  %2240 = vmatpush.bf16.msrb.mxu2 %v3915_v15 }
 0x47f   : > { %2225 = vmatpush.bf16.msrb.mxu1 %v3935_v54 }
 0x483   : > { %2226 = vmatpush.bf16.msrb.mxu1 %v3923_v1  ;;  %v4064_v1 = vld [vmem:[%s5221_s23 + $0x78] sm:$0xf] }
 0x484   : > { %v4065_v3 = vor.u32 %v4521_v6, %v4064_v1  ;;  %v4006_v1 = vld [vmem:[%s5221_s23 + $0xc] sm:$0xf0] }
 0x487   : > { %2227 = vmatpush.bf16.msrb.mxu1 %v3911_v10  ;;  %v2249_v10 = vld [vmem:[#allocation3 + $0x90] sm:$0xff] }
 0x4ed   : > { %v1961_v30 = vpop.f32.mrf.mxu1 }
 0x4ee   : > { %v1997_v31 = vadd.f32 %v1994_v19, %v1961_v30 }
 0x4f0   : > { %v3902_v39 = vmul.f32 -1.442695, %v1997_v31 }
 0x4f2   : > { %4723 = vpow2.f32 %v3902_v39 }
 0x4f3   : > { %v1974_v48 = vpop.f32.mrf.mxu2 }
 0x4f4   : > { %v2017_v52 = vadd.f32 %v1995_v42, %v1974_v48  ;;  %v1987_v53 = vpop.f32.mrf.mxu3 }
 0x4f5   : > { %v1963_v57 = vpop.f32.mrf.mxu1  ;;  %v2037_v31 = vadd.f32 %v5479_v45, %v1987_v53  ;;  %v4528_v53 = vld [vmem:[%s5221_s23 + $0xb8] sm:$0xf0] }
 0x4f6   : > { %v3903_v58 = vmul.f32 -1.442695, %v2017_v52  ;;  %v4096_v52 = vld [vmem:[%s5221_s23 + $0xb0] sm:$0xf] }
 0x4f7   : > { %v4097_v56 = vor.u32 %v4528_v53, %v4096_v52  ;;  %v4076_v57 = vld [vmem:[%s5221_s23 + $0x90] sm:$0xf]  ;;  %v4018_v53 = vld [vmem:[%s5221_s23 + $0x24] sm:$0xf0] }
 0x4f8   : > { %v4724_v0 = vpop.eup %4723  ;;  %4725 = vpow2.f32 %v3903_v58  ;;  %v4524_v58 = vld [vmem:[%s5221_s23 + $0x98] sm:$0xf0] }
 0x4f9   : > { %v2001_v4 = vadd.f32 1.0, %v4724_v0  ;;  %2488 = vmatpush.bf16.msra.mxu1 %v4097_v56  ;;  %v4077_v36 = vor.u32 %v4524_v58, %v4076_v57  ;;  %v4085_v0 = vor.u32 %v4525_v61, %v4084_v60  ;;  %v4510_v56 = vld [vmem:[%s5221_s23 + $0x28] sm:$0xf0]  ;;  %v4505_v60 = vld [vmem:[%s5221_s23 + $0x4] sm:$0xf] }
 0x4fb   : > { %4727 = vrcp.f32 %v2001_v4  ;;  %v1976_v13 = vpop.f32.mrf.mxu2  ;;  %v2013_v21 = vand.u32 2147483648, %v2001_v4  ;;  %v2011_v23 = vand.u32 2147483647, %v2001_v4  ;;  %vm2007_vm9 = vweird.f32 %v2001_v4  ;;  %2463 = vmatpush.bf16.msrb.mxu3 %v4077_v36  ;;  %v4004_v36 = vld [vmem:[%s5221_s23] sm:$0xf] }
 0x4fc   : > { %v1989_v14 = vpop.f32.mrf.mxu3  ;;  %v4518_v13 = vld [vmem:[%s5221_s23 + $0x68] sm:$0xf0] }
 0x4fd   : > { %v2014_v28 = vor.u32 1.1754944e-38, %v2013_v21  ;;  %vm2012_vm11 = vcmp.eq.f32.partialorder %v2011_v23, 8.507059e+37  ;;  %2489 = vmatpush.bf16.msra.mxu1 %v4085_v0  ;;  %v4517_v14 = vld [vmem:[%s5221_s23 + $0x64] sm:$0xf]  ;;  %v4053_v15 = vor.u32 %v4518_v13, %v4052_v12  ;;  %v4005_v0 = vor.u32 %v4506_v59, %v4004_v36  ;;  %v4544_v36 = vld [vmem:[%s5221_s23 + $0x7c] sm:$0xf] }
 0x4fe   : > { %v4726_v16 = vpop.eup %4725 }
 0x4ff   : > { %v2021_v17 = vadd.f32 1.0, %v4726_v16  ;;  %2464 = vmatpush.bf16.msrb.mxu3 %v4065_v3  ;;  %v4054_v16 = vld [vmem:[%s5221_s23 + $0x6c] sm:$0xf0]  ;;  %v4012_v3 = vld [vmem:[%s5221_s23 + $0x8] sm:$0xf] }
 0x501   : > { %v4728_v18 = vpop.eup %4727  ;;  %4729 = vrcp.f32 %v2021_v17  ;;  %v2033_v39 = vand.u32 2147483648, %v2021_v17  ;;  %vm2027_vm13 = vweird.f32 %v2021_v17  ;;  %v2031_v40 = vand.u32 2147483647, %v2021_v17  ;;  %2490 = vmatpush.bf16.msra.mxu1 %v4073_v9 }
 0x502   : > { %v2003_v19 = vmul.f32 %v4728_v18, %v2001_v4  ;;  %vm2008_vm8 = vweird.f32 %v4728_v18  ;;  %v4066_v4 = vld [vmem:[%s5221_s23 + $0x84] sm:$0xf0] }
 0x503   : > { %vm2009_vm10 = vmor %vm2007_vm9, %vm2008_vm8  ;;  %v2034_v43 = vor.u32 1.1754944e-38, %v2033_v39  ;;  %vm2032_vm15 = vcmp.eq.f32.partialorder %v2031_v40, 8.507059e+37  ;;  %v4069_v8 = vor.u32 %v4520_v2, %v4066_v4  ;;  %2465 = vmatpush.bf16.msrb.mxu3 %v4053_v15  ;;  %v4512_v39 = vld [vmem:[%s5221_s23 + $0x38] sm:$0xf0]  ;;  %v4511_v40 = vld [vmem:[%s5221_s23 + $0x34] sm:$0xf]  ;;  %v4009_v2 = vor.u32 %v4505_v60, %v4006_v1 }
 0x504   : > { %v2004_v20 = vsub.f32 1.0, %v2003_v19  ;;  %v4057_v19 = vor.u32 %v4517_v14, %v4054_v16  ;;  %v4507_v4 = vld [vmem:[%s5221_s23 + $0x10] sm:$0xf0] }
 0x505   : > { %v4013_v7 = vor.u32 %v4507_v4, %v4012_v3  ;;  %v2504_v4 = vld [vmem:[#allocation3 + $0x38] sm:$0xff] }
 0x506   : > { %v2005_v22 = vmul.f32 %v4728_v18, %v2004_v20 }
 0x507   : > { %v4730_v24 = vpop.eup %4729 }
 0x508   : > { %v2023_v26 = vmul.f32 %v4730_v24, %v2021_v17  ;;  %v2006_v27 = vadd.f32 %v4728_v18, %v2005_v22  ;;  %vm2028_vm12 = vweird.f32 %v4730_v24  ;;  %v4060_v17 = vld [vmem:[%s5221_s23 + $0x68] sm:$0xf] }
 0x509   : > { %vm2029_vm14 = vmor %vm2027_vm13, %vm2028_vm12 }
 0x50a   : > { %v2024_v29 = vsub.f32 1.0, %v2023_v26  ;;  %v2010_v30 = vsel %vm2009_vm10, %v4728_v18, %v2006_v27  ;;  %v4519_v18 = vld [vmem:[%s5221_s23 + $0x70] sm:$0xf0]  ;;  %v4040_v26 = vld [vmem:[%s5221_s23 + $0x48] sm:$0xf] }
 0x50b   : > { %v2015_v33 = vsel %vm2012_vm11, %v2014_v28, %v2010_v30  ;;  %v4061_v20 = vor.u32 %v4519_v18, %v4060_v17  ;;  %v4515_v27 = vld [vmem:[%s5221_s23 + $0x50] sm:$0xf0]  ;;  %v4514_v28 = vld [vmem:[%s5221_s23 + $0x4c] sm:$0xf]  ;;  %v4042_v30 = vld [vmem:[%s5221_s23 + $0x54] sm:$0xf0] }
 0x50c   : > { %v2038_v34 = vmul.f32 %v2037_v31, %v2015_v33  ;;  %v2025_v35 = vmul.f32 %v4730_v24, %v2024_v29  ;;  %v4041_v29 = vor.u32 %v4515_v27, %v4040_v26  ;;  %v4048_v31 = vld [vmem:[%s5221_s23 + $0x50] sm:$0xf] }
 0x50d   : > { %2491 = vmatpush.bf16.msra.mxu1 %v4061_v20  ;;  %v5707_v20 = vld [vmem:[%s5237_s21] ss:$0 sm:$0xff] }
 0x50e   : > { %v2039_v37 = vadd.f32 %v2038_v34, %v1996_v32  ;;  %v2026_v38 = vadd.f32 %v4730_v24, %v2025_v35  ;;  %v4516_v32 = vld [vmem:[%s5221_s23 + $0x58] sm:$0xf0]  ;;  %v4045_v35 = vor.u32 %v4514_v28, %v4042_v30  ;;  %2466 = vmatpush.bf16.msrb.mxu3 %v4041_v29 }
 0x510   : > { %4731 = vtanh.f32 %v2039_v37  ;;  %v2030_v41 = vsel %vm2029_vm14, %v4730_v24, %v2026_v38  ;;  %v4049_v37 = vor.u32 %v4516_v32, %v4048_v31  ;;  %v4028_v38 = vld [vmem:[%s5221_s23 + $0x30] sm:$0xf] }
 0x511   : > { %v2035_v44 = vsel %vm2032_vm15, %v2034_v43, %v2030_v41  ;;  %v4029_v41 = vor.u32 %v4512_v39, %v4028_v38  ;;  %v4036_v43 = vld [vmem:[%s5221_s23 + $0x38] sm:$0xf] }
 0x512   : > { %2492 = vmatpush.bf16.msra.mxu1 %v4049_v37 }
 0x513   : > { %2467 = vmatpush.bf16.msrb.mxu3 %v4029_v41  ;;  %v4551_v41 = vld [vmem:[%s5221_s23 + $0xb0] sm:$0xf0] }
 0x516   : > { %v4732_v42 = vpop.eup %4731 }
 0x517   : > { %v2041_v45 = vsub.f32 %v5598_v55, %v4732_v42  ;;  %v4526_v55 = vld [vmem:[%s5221_s23 + $0xac] sm:$0xf] }
 0x518   : > { %v4093_v54 = vor.u32 %v4526_v55, %v4090_v25  ;;  %v4016_v55 = vld [vmem:[%s5221_s23 + $0x18] sm:$0xf]  ;;  %v4508_v25 = vld [vmem:[%s5221_s23 + $0x1c] sm:$0xf] }
 0x519   : > { %v2042_v46 = vmul.f32 %v2041_v45, %v2035_v44  ;;  %v4513_v45 = vld [vmem:[%s5221_s23 + $0x40] sm:$0xf0]  ;;  %v4017_v52 = vor.u32 %v4509_v51, %v4016_v55  ;;  %v4021_v58 = vor.u32 %v4508_v25, %v4018_v53  ;;  %v4547_v55 = vld [vmem:[%s5221_s23 + $0x94] sm:$0xf]  ;;  %v4176_v25 = vld [vmem:[%s5221_s23 + $0x9c] sm:$0xf0] }
 0x51a   : > { %2475 = vmatpush.bf16.msra.mxu0 %v4093_v54  ;;  %v4024_v54 = vld [vmem:[%s5221_s23 + $0x20] sm:$0xf]  ;;  %v4549_v53 = vld [vmem:[%s5221_s23 + $0xa0] sm:$0xf0] }
 0x51b   : > { %v5653_v47 = vadd.f32 %v4732_v42, %v2042_v46  ;;  %v4030_v42 = vld [vmem:[%s5221_s23 + $0x3c] sm:$0xf0]  ;;  %v4025_v62 = vor.u32 %v4510_v56, %v4024_v54  ;;  %2468 = vmatpush.bf16.msrb.mxu3 %v4017_v52  ;;  %v4182_v52 = vld [vmem:[%s5221_s23 + $0x98] sm:$0xf]  ;;  %v4179_v54 = vor.u32 %v4547_v55, %v4176_v25 }
 0x51c   : > { %v4033_v46 = vor.u32 %v4511_v40, %v4030_v42  ;;  %v4186_v40 = vld [vmem:[%s5221_s23 + $0xa8] sm:$0xf]  ;;  %v4183_v56 = vor.u32 %v4549_v53, %v4182_v52  ;;  %v4102_v25 = vld [vmem:[%s5221_s23] sm:$0xf]  ;;  %v4530_v52 = vld [vmem:[%s5221_s23 + $0x8] sm:$0xf0] }
 0x51d   : > { %2045 = vst [vmem:[#allocation2 + $0x10] sm:$0xff] %v5653_v47  ;;  %v2046_v48 = vpack.c.bf16 %v5653_v47, %v5653_v47  ;;  %v4187_v42 = vor.u32 %v4551_v41, %v4186_v40 }
 0x51e   : > { %2476 = vmatpush.bf16.msra.mxu0 %v4081_v63 }
 0x51f   : > { %2215 = vmatmul.bf16.vlgmr.msrb.gmra.mxu0 %v2046_v48  ;;  %2228 = vmatmul.bf16.vlgmr.msrb.gmra.mxu1 %v2046_v48 }
 0x520   : > { %2241 = vmatmul.bf16.vlgmr.msrb.gmra.mxu2 %v2046_v48  ;;  %v4037_v48 = vor.u32 %v4513_v45, %v4036_v43  ;;  %2469 = vmatpush.bf16.msrb.mxu3 %v4005_v0  ;;  %v4188_v43 = vld [vmem:[%s5221_s23 + $0xb4] sm:$0xf0]  ;;  %v4194_v45 = vld [vmem:[%s5221_s23 + $0xb0] sm:$0xf]  ;;  %v4546_v0 = vld [vmem:[%s5221_s23 + $0x88] sm:$0xf0] }
 0x521   : > { %2717 = vmatpush.bf16.msra.mxu2 %v4187_v42  ;;  %v4533_v42 = vld [vmem:[%s5221_s23 + $0x20] sm:$0xf0] }
 0x522   : > { %2477 = vmatpush.bf16.msra.mxu0 %v4069_v8  ;;  %2493 = vmatpush.bf16.msra.mxu1 %v4037_v48 }
 0x526   : > { %2478 = vmatpush.bf16.msra.mxu0 %v4057_v19  ;;  %2494 = vmatpush.bf16.msra.mxu1 %v4025_v62  ;;  %v4545_v62 = vld [vmem:[%s5221_s23 + $0x80] sm:$0xf0] }
 0x52a   : > { %2479 = vmatpush.bf16.msra.mxu0 %v4045_v35  ;;  %2495 = vmatpush.bf16.msra.mxu1 %v4013_v7  ;;  %v4150_v7 = vld [vmem:[%s5221_s23 + $0x60] sm:$0xf] }
 0x52e   : > { %2480 = vmatpush.bf16.msra.mxu0 %v4033_v46 }
 0x532   : > { %2481 = vmatpush.bf16.msra.mxu0 %v4021_v58  ;;  %v4162_v58 = vld [vmem:[%s5221_s23 + $0x78] sm:$0xf] }
 0x533   : > { %v4163_v60 = vor.u32 %v4545_v62, %v4162_v58  ;;  %v4110_v62 = vld [vmem:[%s5221_s23 + $0x8] sm:$0xf] }
 0x536   : > { %2482 = vmatpush.bf16.msra.mxu0 %v4009_v2 }
 0x59c   : > { %v2216_v21 = vpop.f32.mrf.mxu0  ;;  %v2229_v22 = vpop.f32.mrf.mxu1 }
 0x59d   : > { %v2252_v23 = vadd.f32 %v2249_v10, %v2216_v21  ;;  %v2272_v24 = vadd.f32 %v2250_v11, %v2229_v22  ;;  %v2251_v22 = vld [vmem:[#allocation3 + $0x8] sm:$0xff] }
 0x59f   : > { %v4000_v33 = vmul.f32 -1.442695, %v2252_v23  ;;  %v4001_v34 = vmul.f32 -1.442695, %v2272_v24 }
 0x5a1   : > { %4733 = vpow2.f32 %v4000_v33 }
 0x5a2   : > { %4735 = vpow2.f32 %v4001_v34 }
 0x5a3   : > { %v2242_v44 = vpop.f32.mrf.mxu2 }
 0x5a4   : > { %v2218_v49 = vpop.f32.mrf.mxu0  ;;  %v2231_v50 = vpop.f32.mrf.mxu1  ;;  %v2292_v21 = vadd.f32 %v5707_v20, %v2242_v44  ;;  %v4552_v44 = vld [vmem:[%s5221_s23 + $0xb8] sm:$0xf0] }
 0x5a5   : > { %v4195_v48 = vor.u32 %v4552_v44, %v4194_v45  ;;  %v4174_v49 = vld [vmem:[%s5221_s23 + $0x90] sm:$0xf]  ;;  %v4548_v50 = vld [vmem:[%s5221_s23 + $0x98] sm:$0xf0]  ;;  %v4116_v44 = vld [vmem:[%s5221_s23 + $0x24] sm:$0xf0] }
 0x5a6   : > { %v4175_v51 = vor.u32 %v4548_v50, %v4174_v49  ;;  %v4532_v45 = vld [vmem:[%s5221_s23 + $0x1c] sm:$0xf] }
 0x5a7   : > { %v4734_v57 = vpop.eup %4733  ;;  %2743 = vmatpush.bf16.msrb.mxu0 %v4195_v48  ;;  %v4534_v48 = vld [vmem:[%s5221_s23 + $0x28] sm:$0xf0] }
 0x5a8   : > { %v4736_v61 = vpop.eup %4735  ;;  %v2256_v63 = vadd.f32 1.0, %v4734_v57  ;;  %v2505_v57 = vld [vmem:[#allocation3 + $0x60] sm:$0xff]  ;;  %2718 = vmatpush.bf16.msra.mxu2 %v4175_v51  ;;  %v4119_v51 = vor.u32 %v4532_v45, %v4116_v44  ;;  %v4280_v44 = vld [vmem:[%s5221_s23 + $0x98] sm:$0xf] }
 0x5a9   : > { %v2276_v6 = vadd.f32 1.0, %v4736_v61  ;;  %v4164_v61 = vld [vmem:[%s5221_s23 + $0x84] sm:$0xf0]  ;;  %v4274_v45 = vld [vmem:[%s5221_s23 + $0x9c] sm:$0xf0] }
 0x5aa   : > { %4737 = vrcp.f32 %v2256_v63  ;;  %v2268_v13 = vand.u32 2147483648, %v2256_v63  ;;  %v2266_v15 = vand.u32 2147483647, %v2256_v63  ;;  %vm2262_vm1 = vweird.f32 %v2256_v63 }
 0x5ab   : > { %4739 = vrcp.f32 %v2276_v6  ;;  %v2244_v5 = vpop.f32.mrf.mxu2  ;;  %v2288_v29 = vand.u32 2147483648, %v2276_v6  ;;  %vm2282_vm5 = vweird.f32 %v2276_v6  ;;  %v2286_v30 = vand.u32 2147483647, %v2276_v6  ;;  %2744 = vmatpush.bf16.msrb.mxu0 %v4183_v56  ;;  %v4104_v56 = vld [vmem:[%s5221_s23 + $0xc] sm:$0xf0] }
 0x5ac   : > { %v2269_v18 = vor.u32 1.1754944e-38, %v2268_v13  ;;  %vm2267_vm3 = vcmp.eq.f32.partialorder %v2266_v15, 8.507059e+37  ;;  %v4167_v2 = vor.u32 %v4544_v36, %v4164_v61  ;;  %2719 = vmatpush.bf16.msra.mxu2 %v4163_v60  ;;  %v4138_v15 = vld [vmem:[%s5221_s23 + $0x48] sm:$0xf]  ;;  %v4531_v36 = vld [vmem:[%s5221_s23 + $0x10] sm:$0xf0]  ;;  %v4103_v60 = vor.u32 %v4530_v52, %v4102_v25 }
 0x5ad   : > { %v2289_v33 = vor.u32 1.1754944e-38, %v2288_v29  ;;  %vm2287_vm7 = vcmp.eq.f32.partialorder %v2286_v30, 8.507059e+37  ;;  %v4536_v29 = vld [vmem:[%s5221_s23 + $0x38] sm:$0xf0]  ;;  %v4262_v52 = vld [vmem:[%s5221_s23 + $0x84] sm:$0xf0] }
 0x5b0   : > { %v4738_v8 = vpop.eup %4737 }
 0x5b1   : > { %v4740_v9 = vpop.eup %4739  ;;  %v2258_v10 = vmul.f32 %v4738_v8, %v2256_v63  ;;  %vm2263_vm0 = vweird.f32 %v4738_v8  ;;  %v4170_v63 = vld [vmem:[%s5221_s23 + $0x80] sm:$0xf] }
 0x5b2   : > { %v2278_v12 = vmul.f32 %v4740_v9, %v2276_v6  ;;  %vm2264_vm2 = vmor %vm2262_vm1, %vm2263_vm0  ;;  %vm2283_vm4 = vweird.f32 %v4740_v9  ;;  %v4171_v3 = vor.u32 %v4546_v0, %v4170_v63  ;;  %v4111_v63 = vor.u32 %v4531_v36, %v4110_v62  ;;  %v2759_v62 = vld [vmem:[#allocation3 + $0x28] sm:$0xff]  ;;  %v2760_v36 = vld [vmem:[#allocation3 + $0xa0] sm:$0xff] }
 0x5b3   : > { %v2259_v11 = vsub.f32 1.0, %v2258_v10  ;;  %vm2284_vm6 = vmor %vm2282_vm5, %vm2283_vm4  ;;  %v4541_v10 = vld [vmem:[%s5221_s23 + $0x64] sm:$0xf] }
 0x5b4   : > { %v2279_v17 = vsub.f32 1.0, %v2278_v12  ;;  %2745 = vmatpush.bf16.msrb.mxu0 %v4171_v3  ;;  %v4158_v12 = vld [vmem:[%s5221_s23 + $0x68] sm:$0xf] }
 0x5b5   : > { %v2260_v14 = vmul.f32 %v4738_v8, %v2259_v11  ;;  %v4152_v11 = vld [vmem:[%s5221_s23 + $0x6c] sm:$0xf0] }
 0x5b6   : > { %v2280_v26 = vmul.f32 %v4740_v9, %v2279_v17  ;;  %v4155_v13 = vor.u32 %v4541_v10, %v4152_v11 }
 0x5b7   : > { %v2261_v16 = vadd.f32 %v4738_v8, %v2260_v14  ;;  %v4543_v14 = vld [vmem:[%s5221_s23 + $0x70] sm:$0xf0] }
 0x5b8   : > { %v2281_v28 = vadd.f32 %v4740_v9, %v2280_v26 }
 0x5b9   : > { %v2265_v19 = vsel %vm2264_vm2, %v4738_v8, %v2261_v16  ;;  %v4542_v8 = vld [vmem:[%s5221_s23 + $0x68] sm:$0xf0]  ;;  %v4539_v16 = vld [vmem:[%s5221_s23 + $0x50] sm:$0xf0] }
 0x5ba   : > { %v2270_v23 = vsel %vm2267_vm3, %v2269_v18, %v2265_v19  ;;  %v2285_v31 = vsel %vm2284_vm6, %v4740_v9, %v2281_v28  ;;  %v4151_v9 = vor.u32 %v4542_v8, %v4150_v7  ;;  %v4159_v18 = vor.u32 %v4543_v14, %v4158_v12  ;;  %v4126_v28 = vld [vmem:[%s5221_s23 + $0x30] sm:$0xf] }
 0x5bb   : > { %v2293_v24 = vmul.f32 %v2292_v21, %v2270_v23  ;;  %v2290_v35 = vsel %vm2287_vm7, %v2289_v33, %v2285_v31  ;;  %v4139_v19 = vor.u32 %v4539_v16, %v4138_v15  ;;  %v4538_v21 = vld [vmem:[%s5221_s23 + $0x4c] sm:$0xf]  ;;  %v4146_v23 = vld [vmem:[%s5221_s23 + $0x50] sm:$0xf]  ;;  %v4128_v33 = vld [vmem:[%s5221_s23 + $0x3c] sm:$0xf0]  ;;  %v4127_v40 = vor.u32 %v4536_v29, %v4126_v28 }
 0x5bc   : > { %2720 = vmatpush.bf16.msra.mxu2 %v4151_v9  ;;  %2746 = vmatpush.bf16.msrb.mxu0 %v4159_v18  ;;  %v2506_v15 = vld [vmem:[#allocation3 + $0x70] sm:$0xff] }
 0x5bd   : > { %v2294_v27 = vadd.f32 %v2293_v24, %v2251_v22  ;;  %v4140_v22 = vld [vmem:[%s5221_s23 + $0x54] sm:$0xf0] }
 0x5be   : > { %v4143_v26 = vor.u32 %v4538_v21, %v4140_v22 }
 0x5bf   : > { %4741 = vtanh.f32 %v2294_v27  ;;  %v4540_v27 = vld [vmem:[%s5221_s23 + $0x58] sm:$0xf0] }
 0x5c0   : > { %v4147_v31 = vor.u32 %v4540_v27, %v4146_v23  ;;  %2721 = vmatpush.bf16.msra.mxu2 %v4139_v19 }
 0x5c2   : > { %2747 = vmatpush.bf16.msrb.mxu0 %v4147_v31  ;;  %v4284_v31 = vld [vmem:[%s5221_s23 + $0xa8] sm:$0xf] }
 0x5c4   : > { %2722 = vmatpush.bf16.msra.mxu2 %v4127_v40 }
 0x5c5   : > { %v4742_v32 = vpop.eup %4741 }
 0x5c6   : > { %v2296_v34 = vsub.f32 %v5653_v47, %v4742_v32  ;;  %v4550_v47 = vld [vmem:[%s5221_s23 + $0xac] sm:$0xf] }
 0x5c7   : > { %v4191_v46 = vor.u32 %v4550_v47, %v4188_v43  ;;  %v4114_v47 = vld [vmem:[%s5221_s23 + $0x18] sm:$0xf] }
 0x5c8   : > { %v2297_v37 = vmul.f32 %v2296_v34, %v2290_v35  ;;  %v4115_v55 = vor.u32 %v4533_v42, %v4114_v47  ;;  %v4572_v47 = vld [vmem:[%s5221_s23 + $0x98] sm:$0xf0]  ;;  %v4571_v42 = vld [vmem:[%s5221_s23 + $0x94] sm:$0xf] }
 0x5c9   : > { %2730 = vmatpush.bf16.msra.mxu3 %v4191_v46  ;;  %v4122_v46 = vld [vmem:[%s5221_s23 + $0x20] sm:$0xf] }
 0x5ca   : > { %v5711_v38 = vadd.f32 %v4742_v32, %v2297_v37  ;;  %v4535_v32 = vld [vmem:[%s5221_s23 + $0x34] sm:$0xf]  ;;  %v4134_v37 = vld [vmem:[%s5221_s23 + $0x38] sm:$0xf]  ;;  %v4123_v53 = vor.u32 %v4534_v48, %v4122_v46  ;;  %2723 = vmatpush.bf16.msra.mxu2 %v4115_v55  ;;  %v4573_v46 = vld [vmem:[%s5221_s23 + $0xa0] sm:$0xf0]  ;;  %v4277_v48 = vor.u32 %v4571_v42, %v4274_v45 }
 0x5cb   : > { %v4131_v41 = vor.u32 %v4535_v32, %v4128_v33  ;;  %v4575_v32 = vld [vmem:[%s5221_s23 + $0xb0] sm:$0xf0]  ;;  %v4569_v55 = vld [vmem:[%s5221_s23 + $0x80] sm:$0xf0]  ;;  %v4200_v45 = vld [vmem:[%s5221_s23] sm:$0xf] }
 0x5cc   : > { %2300 = vst [vmem:[#allocation2 + $0x8] sm:$0xff] %v5711_v38  ;;  %v2301_v39 = vpack.c.bf16 %v5711_v38, %v5711_v38  ;;  %v4285_v33 = vor.u32 %v4575_v32, %v4284_v31 }
 0x5cd   : > { %2731 = vmatpush.bf16.msra.mxu3 %v4179_v54  ;;  %v4529_v54 = vld [vmem:[%s5221_s23 + $0x4] sm:$0xf] }
 0x5ce   : > { %2470 = vmatmul.bf16.vlgmr.msrb.gmra.mxu3 %v2301_v39  ;;  %2483 = vmatmul.bf16.vlgmr.msra.gmra.mxu0 %v2301_v39  ;;  %v4107_v61 = vor.u32 %v4529_v54, %v4104_v56  ;;  %v4570_v54 = vld [vmem:[%s5221_s23 + $0x88] sm:$0xf0] }
 0x5cf   : > { %2496 = vmatmul.bf16.vlgmr.msra.gmra.mxu1 %v2301_v39  ;;  %v4537_v39 = vld [vmem:[%s5221_s23 + $0x40] sm:$0xf0]  ;;  %2724 = vmatpush.bf16.msra.mxu2 %v4103_v60  ;;  %v4566_v60 = vld [vmem:[%s5221_s23 + $0x68] sm:$0xf0] }
 0x5d0   : > { %v4135_v43 = vor.u32 %v4537_v39, %v4134_v37  ;;  %v4576_v37 = vld [vmem:[%s5221_s23 + $0xb8] sm:$0xf0]  ;;  %2972 = vmatpush.bf16.msrb.mxu1 %v4285_v33  ;;  %v4557_v33 = vld [vmem:[%s5221_s23 + $0x20] sm:$0xf0] }
 0x5d1   : > { %2732 = vmatpush.bf16.msra.mxu3 %v4167_v2 }
 0x5d2   : > { %2748 = vmatpush.bf16.msrb.mxu0 %v4135_v43 }
 0x5d5   : > { %2733 = vmatpush.bf16.msra.mxu3 %v4155_v13 }
 0x5d6   : > { %2749 = vmatpush.bf16.msrb.mxu0 %v4123_v53  ;;  %v4268_v53 = vld [vmem:[%s5221_s23 + $0x80] sm:$0xf] }
 0x5d9   : > { %2734 = vmatpush.bf16.msra.mxu3 %v4143_v26 }
 0x5da   : > { %2750 = vmatpush.bf16.msrb.mxu0 %v4111_v63 }
 0x5dd   : > { %2735 = vmatpush.bf16.msra.mxu3 %v4131_v41  ;;  %v4272_v41 = vld [vmem:[%s5221_s23 + $0x90] sm:$0xf] }
 0x5de   : > { %v4273_v43 = vor.u32 %v4572_v47, %v4272_v41 }
 0x5e0   : > { %2973 = vmatpush.bf16.msrb.mxu1 %v4273_v43 }
 0x5e1   : > { %2736 = vmatpush.bf16.msra.mxu3 %v4119_v51  ;;  %v4568_v51 = vld [vmem:[%s5221_s23 + $0x7c] sm:$0xf] }
 0x5e5   : > { %2737 = vmatpush.bf16.msra.mxu3 %v4107_v61  ;;  %v4565_v61 = vld [vmem:[%s5221_s23 + $0x64] sm:$0xf] }
 0x64b   : > { %v2484_v59 = vpop.f32.mrf.mxu0 }
 0x64c   : > { %v2527_v1 = vadd.f32 %v2505_v57, %v2484_v59  ;;  %v5734_v6 = vpop.f32.mrf.mxu1 }
 0x64d   : > { %v2547_v12 = vadd.f32 %v5707_v20, %v5734_v6 }
 0x64e   : > { %v4099_v5 = vmul.f32 -1.442695, %v2527_v1 }
 0x650   : > { %4743 = vpow2.f32 %v4099_v5 }
 0x651   : > { %v2471_v17 = vpop.f32.mrf.mxu3 }
 0x652   : > { %v2507_v24 = vadd.f32 %v2504_v4, %v2471_v17 }
 0x653   : > { %v2486_v30 = vpop.f32.mrf.mxu0 }
 0x654   : > { %v4098_v34 = vmul.f32 -1.442695, %v2507_v24  ;;  %v2499_v35 = vpop.f32.mrf.mxu1 }
 0x655   : > { %v4292_v35 = vld [vmem:[%s5221_s23 + $0xb0] sm:$0xf] }
 0x656   : > { %4745 = vpow2.f32 %v4098_v34  ;;  %v4744_v49 = vpop.eup %4743  ;;  %v4286_v34 = vld [vmem:[%s5221_s23 + $0xb4] sm:$0xf0]  ;;  %v4293_v40 = vor.u32 %v4576_v37, %v4292_v35  ;;  %v4214_v35 = vld [vmem:[%s5221_s23 + $0x24] sm:$0xf0]  ;;  %v4220_v37 = vld [vmem:[%s5221_s23 + $0x20] sm:$0xf] }
 0x657   : > { %v2531_v58 = vadd.f32 1.0, %v4744_v49  ;;  %v4281_v49 = vor.u32 %v4573_v46, %v4280_v44  ;;  %v4554_v44 = vld [vmem:[%s5221_s23 + $0x8] sm:$0xf0]  ;;  %v4553_v46 = vld [vmem:[%s5221_s23 + $0x4] sm:$0xf] }
 0x658   : > { %2998 = vmatpush.bf16.msrb.mxu3 %v4293_v40 }
 0x659   : > { %v2473_v50 = vpop.f32.mrf.mxu3  ;;  %v2543_v21 = vand.u32 2147483648, %v2531_v58  ;;  %vm2537_vm13 = vweird.f32 %v2531_v58  ;;  %v2541_v22 = vand.u32 2147483647, %v2531_v58 }
 0x65a   : > { %v4260_v50 = vld [vmem:[%s5221_s23 + $0x78] sm:$0xf] }
 0x65b   : > { %v2544_v6 = vor.u32 1.1754944e-38, %v2543_v21  ;;  %vm2542_vm15 = vcmp.eq.f32.partialorder %v2541_v22, 8.507059e+37  ;;  %v4261_v25 = vor.u32 %v4569_v55, %v4260_v50  ;;  %v4559_v21 = vld [vmem:[%s5221_s23 + $0x34] sm:$0xf] }
 0x65c   : > { %v4746_v57 = vpop.eup %4745  ;;  %2999 = vmatpush.bf16.msrb.mxu3 %v4281_v49  ;;  %v4208_v49 = vld [vmem:[%s5221_s23 + $0x8] sm:$0xf]  ;;  %v4555_v50 = vld [vmem:[%s5221_s23 + $0x10] sm:$0xf0] }
 0x65d   : > { %v2511_v59 = vadd.f32 1.0, %v4746_v57  ;;  %v4265_v57 = vor.u32 %v4568_v51, %v4262_v52  ;;  %2974 = vmatpush.bf16.msrb.mxu1 %v4261_v25  ;;  %v4201_v52 = vor.u32 %v4554_v44, %v4200_v45 }
 0x65f   : > { %4747 = vrcp.f32 %v2511_v59  ;;  %v2523_v5 = vand.u32 2147483648, %v2511_v59  ;;  %v2521_v8 = vand.u32 2147483647, %v2511_v59  ;;  %vm2517_vm9 = vweird.f32 %v2511_v59 }
 0x660   : > { %4749 = vrcp.f32 %v2531_v58 }
 0x661   : > { %v2524_v11 = vor.u32 1.1754944e-38, %v2523_v5  ;;  %vm2522_vm11 = vcmp.eq.f32.partialorder %v2521_v8, 8.507059e+37  ;;  %v4236_v5 = vld [vmem:[%s5221_s23 + $0x48] sm:$0xf]  ;;  %v4562_v8 = vld [vmem:[%s5221_s23 + $0x4c] sm:$0xf] }
 0x665   : > { %v4748_v0 = vpop.eup %4747 }
 0x666   : > { %v4750_v1 = vpop.eup %4749  ;;  %v2513_v2 = vmul.f32 %v4748_v0, %v2511_v59  ;;  %vm2518_vm8 = vweird.f32 %v4748_v0  ;;  %v4248_v59 = vld [vmem:[%s5221_s23 + $0x60] sm:$0xf] }
 0x667   : > { %v2533_v4 = vmul.f32 %v4750_v1, %v2531_v58  ;;  %vm2519_vm10 = vmor %vm2517_vm9, %vm2518_vm8  ;;  %vm2538_vm12 = vweird.f32 %v4750_v1  ;;  %v4269_v58 = vor.u32 %v4570_v54, %v4268_v53  ;;  %v4249_v63 = vor.u32 %v4566_v60, %v4248_v59 }
 0x668   : > { %v2514_v3 = vsub.f32 1.0, %v2513_v2  ;;  %vm2539_vm14 = vmor %vm2537_vm13, %vm2538_vm12  ;;  %v4567_v2 = vld [vmem:[%s5221_s23 + $0x70] sm:$0xf0] }
 0x669   : > { %v2534_v10 = vsub.f32 1.0, %v2533_v4  ;;  %3000 = vmatpush.bf16.msrb.mxu3 %v4269_v58  ;;  %2975 = vmatpush.bf16.msrb.mxu1 %v4249_v63 }
 0x66a   : > { %v2515_v7 = vmul.f32 %v4748_v0, %v2514_v3 }
 0x66b   : > { %v2535_v17 = vmul.f32 %v4750_v1, %v2534_v10 }
 0x66c   : > { %v2516_v9 = vadd.f32 %v4748_v0, %v2515_v7  ;;  %v4563_v7 = vld [vmem:[%s5221_s23 + $0x50] sm:$0xf0] }
 0x66d   : > { %v2536_v19 = vadd.f32 %v4750_v1, %v2535_v17 }
 0x66e   : > { %v2520_v13 = vsel %vm2519_vm10, %v4748_v0, %v2516_v9  ;;  %v4250_v0 = vld [vmem:[%s5221_s23 + $0x6c] sm:$0xf0] }
 0x66f   : > { %v2525_v14 = vsel %vm2522_vm11, %v2524_v11, %v2520_v13  ;;  %v2540_v23 = vsel %vm2539_vm14, %v4750_v1, %v2536_v19  ;;  %v4256_v1 = vld [vmem:[%s5221_s23 + $0x68] sm:$0xf]  ;;  %v4253_v3 = vor.u32 %v4565_v61, %v4250_v0  ;;  %v4237_v11 = vor.u32 %v4563_v7, %v4236_v5  ;;  %v4244_v13 = vld [vmem:[%s5221_s23 + $0x50] sm:$0xf]  ;;  %v4560_v19 = vld [vmem:[%s5221_s23 + $0x38] sm:$0xf0] }
 0x670   : > { %v2548_v16 = vmul.f32 %v2547_v12, %v2525_v14  ;;  %v2545_v27 = vsel %vm2542_vm15, %v2544_v6, %v2540_v23  ;;  %v4257_v4 = vor.u32 %v4567_v2, %v4256_v1  ;;  %v4238_v12 = vld [vmem:[%s5221_s23 + $0x54] sm:$0xf0]  ;;  %v4564_v14 = vld [vmem:[%s5221_s23 + $0x58] sm:$0xf0]  ;;  %v4226_v23 = vld [vmem:[%s5221_s23 + $0x3c] sm:$0xf0] }
 0x671   : > { %v4241_v17 = vor.u32 %v4562_v8, %v4238_v12  ;;  %v4245_v22 = vor.u32 %v4564_v14, %v4244_v13  ;;  %v4561_v6 = vld [vmem:[%s5221_s23 + $0x40] sm:$0xf0]  ;;  %2976 = vmatpush.bf16.msrb.mxu1 %v4237_v11  ;;  %v4229_v31 = vor.u32 %v4559_v21, %v4226_v23  ;;  %v2761_v8 = vld [vmem:[#allocation3 + $0x68] sm:$0xff]  ;;  %v3014_v23 = vld [vmem:[#allocation3 + $0x98] sm:$0xff] }
 0x672   : > { %v2549_v18 = vadd.f32 %v2548_v16, %v2506_v15  ;;  %3001 = vmatpush.bf16.msrb.mxu3 %v4257_v4 }
 0x674   : > { %4751 = vtanh.f32 %v2549_v18  ;;  %v4224_v18 = vld [vmem:[%s5221_s23 + $0x30] sm:$0xf] }
 0x676   : > { %3002 = vmatpush.bf16.msrb.mxu3 %v4245_v22 }
 0x67a   : > { %v4752_v24 = vpop.eup %4751 }
 0x67b   : > { %v2551_v26 = vsub.f32 %v5711_v38, %v4752_v24  ;;  %v4574_v38 = vld [vmem:[%s5221_s23 + $0xac] sm:$0xf] }
 0x67c   : > { %v4289_v39 = vor.u32 %v4574_v38, %v4286_v34  ;;  %v4212_v38 = vld [vmem:[%s5221_s23 + $0x18] sm:$0xf]  ;;  %v4556_v34 = vld [vmem:[%s5221_s23 + $0x1c] sm:$0xf] }
 0x67d   : > { %v2552_v28 = vmul.f32 %v2551_v26, %v2545_v27  ;;  %v4213_v47 = vor.u32 %v4557_v33, %v4212_v38  ;;  %v4217_v42 = vor.u32 %v4556_v34, %v4214_v35 }
 0x67e   : > { %2985 = vmatpush.bf16.msrb.mxu2 %v4289_v39  ;;  %v4558_v39 = vld [vmem:[%s5221_s23 + $0x28] sm:$0xf0] }
 0x67f   : > { %v5769_v29 = vadd.f32 %v4752_v24, %v2552_v28  ;;  %v4232_v24 = vld [vmem:[%s5221_s23 + $0x38] sm:$0xf]  ;;  %v4221_v43 = vor.u32 %v4558_v39, %v4220_v37 }
 0x680   : > { %v4233_v32 = vor.u32 %v4561_v6, %v4232_v24 }
 0x681   : > { %2555 = vst [vmem:[#allocation2 + $0x20] sm:$0xff] %v5769_v29  ;;  %v2556_v30 = vpack.c.bf16 %v5769_v29, %v5769_v29 }
 0x682   : > { %2986 = vmatpush.bf16.msrb.mxu2 %v4277_v48  ;;  %3003 = vmatpush.bf16.msrb.mxu3 %v4233_v32  ;;  %v4202_v48 = vld [vmem:[%s5221_s23 + $0xc] sm:$0xf0] }
 0x683   : > { %2725 = vmatmul.bf16.vlgmr.msra.gmra.mxu2 %v2556_v30  ;;  %2738 = vmatmul.bf16.vlgmr.msra.gmra.mxu3 %v2556_v30  ;;  %v4205_v54 = vor.u32 %v4553_v46, %v4202_v48 }
 0x684   : > { %2751 = vmatmul.bf16.vlgmr.msrb.gmra.mxu0 %v2556_v30  ;;  %v4225_v30 = vor.u32 %v4560_v19, %v4224_v18 }
 0x686   : > { %2987 = vmatpush.bf16.msrb.mxu2 %v4265_v57  ;;  %2977 = vmatpush.bf16.msrb.mxu1 %v4225_v30  ;;  %v4209_v57 = vor.u32 %v4555_v50, %v4208_v49 }
 0x687   : > { %3004 = vmatpush.bf16.msrb.mxu3 %v4221_v43 }
 0x68a   : > { %2988 = vmatpush.bf16.msrb.mxu2 %v4253_v3  ;;  %2978 = vmatpush.bf16.msrb.mxu1 %v4213_v47 }
 0x68b   : > { %3005 = vmatpush.bf16.msrb.mxu3 %v4209_v57 }
 0x68e   : > { %2989 = vmatpush.bf16.msrb.mxu2 %v4241_v17  ;;  %2979 = vmatpush.bf16.msrb.mxu1 %v4201_v52 }
 0x692   : > { %2990 = vmatpush.bf16.msrb.mxu2 %v4229_v31 }
 0x696   : > { %2991 = vmatpush.bf16.msrb.mxu2 %v4217_v42 }
 0x69a   : > { %2992 = vmatpush.bf16.msrb.mxu2 %v4205_v54 }
 0x701   : > { %v5792_v56 = vpop.f32.mrf.mxu0 }
 0x702   : > { %v2802_v4 = vadd.f32 %v5707_v20, %v5792_v56 }
 0x706   : > { %v2726_v9 = vpop.f32.mrf.mxu2  ;;  %v2739_v10 = vpop.f32.mrf.mxu3 }
 0x707   : > { %v2762_v15 = vadd.f32 %v2759_v62, %v2726_v9  ;;  %v2782_v16 = vadd.f32 %v2760_v36, %v2739_v10 }
 0x709   : > { %v4196_v26 = vmul.f32 -1.442695, %v2762_v15  ;;  %v4197_v27 = vmul.f32 -1.442695, %v2782_v16  ;;  %v2754_v28 = vpop.f32.mrf.mxu0 }
 0x70b   : > { %4753 = vpow2.f32 %v4196_v26 }
 0x70c   : > { %4755 = vpow2.f32 %v4197_v27  ;;  %v3015_v27 = vld [vmem:[#allocation3 + $0xb0] sm:$0xff] }
 0x70e   : > { %v2728_v40 = vpop.f32.mrf.mxu2  ;;  %v2741_v41 = vpop.f32.mrf.mxu3 }
 0x711   : > { %v4754_v55 = vpop.eup %4753 }
 0x712   : > { %v4756_v51 = vpop.eup %4755  ;;  %v2766_v25 = vadd.f32 1.0, %v4754_v55 }
 0x713   : > { %v2786_v53 = vadd.f32 1.0, %v4756_v51 }
 0x714   : > { %4757 = vrcp.f32 %v2766_v25  ;;  %v2778_v60 = vand.u32 2147483648, %v2766_v25  ;;  %v2776_v0 = vand.u32 2147483647, %v2766_v25  ;;  %vm2772_vm1 = vweird.f32 %v2766_v25 }
 0x715   : > { %4759 = vrcp.f32 %v2786_v53  ;;  %v2798_v13 = vand.u32 2147483648, %v2786_v53  ;;  %vm2792_vm5 = vweird.f32 %v2786_v53  ;;  %v2796_v14 = vand.u32 2147483647, %v2786_v53 }
 0x716   : > { %v2779_v2 = vor.u32 1.1754944e-38, %v2778_v60  ;;  %vm2777_vm3 = vcmp.eq.f32.partialorder %v2776_v0, 8.507059e+37 }
 0x717   : > { %v2799_v17 = vor.u32 1.1754944e-38, %v2798_v13  ;;  %vm2797_vm7 = vcmp.eq.f32.partialorder %v2796_v14, 8.507059e+37 }
 0x71a   : > { %v4758_v58 = vpop.eup %4757 }
 0x71b   : > { %v4760_v62 = vpop.eup %4759  ;;  %v2768_v36 = vmul.f32 %v4758_v58, %v2766_v25  ;;  %vm2773_vm0 = vweird.f32 %v4758_v58  ;;  %v3016_v25 = vld [vmem:[#allocation3 + $0x20] sm:$0xff] }
 0x71c   : > { %v2788_v61 = vmul.f32 %v4760_v62, %v2786_v53  ;;  %vm2774_vm2 = vmor %vm2772_vm1, %vm2773_vm0  ;;  %vm2793_vm4 = vweird.f32 %v4760_v62 }
 0x71d   : > { %v2769_v59 = vsub.f32 1.0, %v2768_v36  ;;  %vm2794_vm6 = vmor %vm2792_vm5, %vm2793_vm4 }
 0x71e   : > { %v2789_v3 = vsub.f32 1.0, %v2788_v61 }
 0x71f   : > { %v2770_v63 = vmul.f32 %v4758_v58, %v2769_v59 }
 0x720   : > { %v2790_v10 = vmul.f32 %v4760_v62, %v2789_v3 }
 0x721   : > { %v2771_v1 = vadd.f32 %v4758_v58, %v2770_v63 }
 0x722   : > { %v2791_v12 = vadd.f32 %v4760_v62, %v2790_v10 }
 0x723   : > { %v2775_v5 = vsel %vm2774_vm2, %v4758_v58, %v2771_v1 }
 0x724   : > { %v2780_v7 = vsel %vm2777_vm3, %v2779_v2, %v2775_v5  ;;  %v2795_v15 = vsel %vm2794_vm6, %v4760_v62, %v2791_v12 }
 0x725   : > { %v2803_v9 = vmul.f32 %v2802_v4, %v2780_v7  ;;  %v2800_v18 = vsel %vm2797_vm7, %v2799_v17, %v2795_v15 }
 0x727   : > { %v2804_v11 = vadd.f32 %v2803_v9, %v2761_v8 }
 0x729   : > { %4761 = vtanh.f32 %v2804_v11 }
 0x72f   : > { %v4762_v16 = vpop.eup %4761 }
 0x730   : > { %v2806_v56 = vsub.f32 %v5769_v29, %v4762_v16 }
 0x732   : > { %v2807_v19 = vmul.f32 %v2806_v56, %v2800_v18 }
 0x734   : > { %v2808_v21 = vadd.f32 %v4762_v16, %v2807_v19 }
 0x736   : > { %2810 = vst [vmem:[#allocation2 + $0x28] sm:$0xff] %v2808_v21  ;;  %v2811_v22 = vpack.c.bf16 %v2808_v21, %v2808_v21 }
 0x738   : > { %2980 = vmatmul.bf16.vlgmr.msrb.gmra.mxu1 %v2811_v22  ;;  %2993 = vmatmul.bf16.vlgmr.msrb.gmra.mxu2 %v2811_v22 }
 0x739   : > { %3006 = vmatmul.bf16.vlgmr.msrb.gmra.mxu3 %v2811_v22 }
 0x7b5   : > { %v2981_v24 = vpop.f32.mrf.mxu1 }
 0x7b6   : > { %v3017_v6 = vadd.f32 %v3014_v23, %v2981_v24 }
 0x7b8   : > { %v4294_v26 = vmul.f32 -1.442695, %v3017_v6 }
 0x7ba   : > { %4763 = vpow2.f32 %v4294_v26 }
 0x7bb   : > { %v2994_v28 = vpop.f32.mrf.mxu2 }
 0x7bc   : > { %v3037_v30 = vadd.f32 %v3015_v27, %v2994_v28  ;;  %v3007_v31 = vpop.f32.mrf.mxu3 }
 0x7bd   : > { %v2983_v32 = vpop.f32.mrf.mxu1  ;;  %v3057_v51 = vadd.f32 %v5707_v20, %v3007_v31 }
 0x7be   : > { %v4295_v38 = vmul.f32 -1.442695, %v3037_v30 }
 0x7c0   : > { %v4764_v29 = vpop.eup %4763  ;;  %4765 = vpow2.f32 %v4295_v38 }
 0x7c1   : > { %v3021_v33 = vadd.f32 1.0, %v4764_v29 }
 0x7c3   : > { %4767 = vrcp.f32 %v3021_v33  ;;  %v2996_v34 = vpop.f32.mrf.mxu2  ;;  %v3033_v42 = vand.u32 2147483648, %v3021_v33  ;;  %v3031_v45 = vand.u32 2147483647, %v3021_v33  ;;  %vm3027_vm9 = vweird.f32 %v3021_v33 }
 0x7c4   : > { %v3009_v35 = vpop.f32.mrf.mxu3 }
 0x7c5   : > { %v3034_v49 = vor.u32 1.1754944e-38, %v3033_v42  ;;  %vm3032_vm11 = vcmp.eq.f32.partialorder %v3031_v45, 8.507059e+37 }
 0x7c6   : > { %v4766_v37 = vpop.eup %4765 }
 0x7c7   : > { %v3041_v39 = vadd.f32 1.0, %v4766_v37 }
 0x7c9   : > { %v4768_v40 = vpop.eup %4767  ;;  %4769 = vrcp.f32 %v3041_v39  ;;  %v3053_v62 = vand.u32 2147483648, %v3041_v39  ;;  %vm3047_vm13 = vweird.f32 %v3041_v39  ;;  %v3051_v36 = vand.u32 2147483647, %v3041_v39 }
 0x7ca   : > { %v3023_v41 = vmul.f32 %v4768_v40, %v3021_v33  ;;  %vm3028_vm8 = vweird.f32 %v4768_v40 }
 0x7cb   : > { %vm3029_vm10 = vmor %vm3027_vm9, %vm3028_vm8  ;;  %v3054_v61 = vor.u32 1.1754944e-38, %v3053_v62  ;;  %vm3052_vm15 = vcmp.eq.f32.partialorder %v3051_v36, 8.507059e+37 }
 0x7cc   : > { %v3024_v47 = vsub.f32 1.0, %v3023_v41 }
 0x7ce   : > { %v3025_v43 = vmul.f32 %v4768_v40, %v3024_v47 }
 0x7cf   : > { %v4770_v44 = vpop.eup %4769 }
 0x7d0   : > { %v3043_v46 = vmul.f32 %v4770_v44, %v3041_v39  ;;  %v3026_v48 = vadd.f32 %v4768_v40, %v3025_v43  ;;  %vm3048_vm12 = vweird.f32 %v4770_v44 }
 0x7d1   : > { %vm3049_vm14 = vmor %vm3047_vm13, %vm3048_vm12 }
 0x7d2   : > { %v3044_v50 = vsub.f32 1.0, %v3043_v46  ;;  %v3030_v55 = vsel %vm3029_vm10, %v4768_v40, %v3026_v48 }
 0x7d3   : > { %v3035_v52 = vsel %vm3032_vm11, %v3034_v49, %v3030_v55 }
 0x7d4   : > { %v3058_v53 = vmul.f32 %v3057_v51, %v3035_v52  ;;  %v3045_v54 = vmul.f32 %v4770_v44, %v3044_v50 }
 0x7d6   : > { %v3059_v57 = vadd.f32 %v3058_v53, %v3016_v25  ;;  %v3046_v58 = vadd.f32 %v4770_v44, %v3045_v54 }
 0x7d8   : > { %4771 = vtanh.f32 %v3059_v57  ;;  %v3050_v59 = vsel %vm3049_vm14, %v4770_v44, %v3046_v58 }
 0x7d9   : > { %v3055_v0 = vsel %vm3052_vm15, %v3054_v61, %v3050_v59 }
 0x7de   : > { %v4772_v60 = vpop.eup %4771 }
 0x7df   : > { %v3061_v63 = vsub.f32 %v2808_v21, %v4772_v60 }
 0x7e1   : > { %v3062_v1 = vmul.f32 %v3061_v63, %v3055_v0  ;;  %3069 = sbr.rel (%p4296_p4) target bundleno = 2188 (0x88c), region = 80 }
 0x7e3   : > { %v3063_v20 = vadd.f32 %v4772_v60, %v3062_v1 }
 0x7e5   : > { %3065 = vst [vmem:[#allocation2 + $0x38] sm:$0xff] %v3063_v20 }
 0x7e6   : > { %v4584_v2 = vld [vmem:[#allocation12 + $0x38] sm:$0xff]  ;;  %v4583_v3 = vld [vmem:[#allocation12 + $0x30] sm:$0xff]  ;;  %v4582_v4 = vld [vmem:[#allocation12 + $0x28] sm:$0xff]  ;;  %v3070_v11 = vpack.c.bf16 %v3063_v20, %v3063_v20 }
 0x7e7   : > { %3139 = vmatpush.bf16.msra.mxu0 %v4584_v2  ;;  %v4581_v5 = vld [vmem:[#allocation12 + $0x20] sm:$0xff]  ;;  %v4580_v7 = vld [vmem:[#allocation12 + $0x18] sm:$0xff]  ;;  %v4579_v8 = vld [vmem:[#allocation12 + $0x10] sm:$0xff] }
 0x7e8   : > { %v4578_v9 = vld [vmem:[#allocation12 + $0x8] sm:$0xff]  ;;  %v4577_v10 = vld [vmem:[#allocation12] sm:$0xff]  ;;  %v4774_v12 = vld [vmem:[%s5855_s6] ss:$0 sm:$0xff] }
 0x7eb   : > { %3140 = vmatpush.bf16.msra.mxu0 %v4583_v3 }
 0x7ef   : > { %3141 = vmatpush.bf16.msra.mxu0 %v4582_v4 }
 0x7f3   : > { %3142 = vmatpush.bf16.msra.mxu0 %v4581_v5 }
 0x7f7   : > { %3143 = vmatpush.bf16.msra.mxu0 %v4580_v7 }
 0x7fb   : > { %3144 = vmatpush.bf16.msra.mxu0 %v4579_v8 }
 0x7ff   : > { %3145 = vmatpush.bf16.msra.mxu0 %v4578_v9 }
 0x803   : > { %3146 = vmatpush.bf16.msra.mxu0 %v4577_v10 }
 0x806   : > { %3147 = vmatmul.bf16.vlgmr.msra.gmra.mxu0 %v3070_v11 }
 0x883   : > { %v3148_v13 = vpop.f32.mrf.mxu0 }
 0x884   : > { %v3149_v14 = vadd.f32 %v4774_v12, %v3148_v13 }
 0x886   : > { %3152 = vst [vmem:[#allocation13] sm:$0xff] %v3149_v14 }
 0x88b   : > { %v3150_v15 = vpop.f32.mrf.mxu0 }
 0x88c PF: > { %p4649_p5 = scmp.eq.s32.totalorder %s5073_s28, 1  ;;  %s5013_s24 = smov [#allocation13]  }
 0x88d   : > { %s3159_s5 = sshll.u32 %s5013_s24, 4  ;;  %s3161_s18 = sshll.u32 %s5856_s7, 4  ;;  %s3160_s5 = int_to_ptr.vmem [resolvable:$true] %s3159_s5  ;;  %s3162_s18 = int_to_ptr.hbm [resolvable:$true] %s3161_s18 }
 0x88e   : > { %4624 = dma.vmem_to_hbm [thread:$0]  (%p4649_p5), %s3160_s5, 128, %s3162_s18, [#allocation6]  }
 0x88f   : > { %4986 = dma.done.wait (%p4649_p5), [#allocation6], 128  }
 0x890   : > { %4988 = vsyncadd (%p4649_p5), [#allocation6], 4294967168 }
 0x891 PF: > { %s5881_s27 = sld [smem:[#allocation19_spill]]  ;;  %s5883_s24 = smov %s4995_s25 }
 0x892   : > { %s5882_s17 = sld [smem:[#allocation20_spill]]  ;;  %s5884_s25 = smov %s4999_s26 }
 0x897   : > { %p22_p0 = scmp.ge.s32.totalorder %s5881_s27, 4  }
 0x898   : > { %s5885_s26 = smov %s5882_s17 }
 0x899   :  { %24 = sbr.rel (!%p22_p0) target bundleno = 10 (0xa), region = 148 }
 0x89e   :  { %3175 = vsyncpa [#allocation5], 1 }
 0x89f   :  { %3177 = vsyncpa [#allocation5 + $0x1], 1 }
 0x8a0   :  { %3178 = vsyncpa [#allocation8], 1 }
 0x8a1   :  { %3180 = vsyncpa [#allocation8 + $0x1], 1 }
 0x8a2   :  { %3181 = vsyncpa [#allocation11], 1 }
 0x8a3   :  { %3183 = vsyncpa [#allocation11 + $0x1], 1 }
 0x8a4   :  { %3184 = vsyncpa [#allocation6], 1 }
 0x8a5   :  { %3186 = vsyncpa [#allocation6 + $0x1], 1 }

</bundles_post_ra>
